<compile_context>
chip_gen: v7x
topology: tpu7x:2x2x1
jax: 0.10.0
libtpu: 0.0.40
codegen_flags: <defaults>
</compile_context>

<pallas_src>
import functools

import jax
import jax.numpy as jnp
from jax import lax
from jax.experimental import pallas as pl
from jax.experimental.pallas import tpu as pltpu


def _round_up(x, m):
    return ((x + m - 1) // m) * m


# ----------------------------------------------------------------------------
# Fused ResidualGroup kernel
#   grid = (B//Bt, n_resblocks); activation resident in a padded VMEM slab.
# ----------------------------------------------------------------------------
def _residual_group_kernel(x_ref, mask_ref, sel_ref, selT_ref,
                           w1_ref, b1_ref, w2_ref, b2_ref,
                           cw1_ref, cb1_ref, cw2_ref, cb2_ref,
                           tw_ref, tb_ref,
                           o_ref,
                           buf_ref, buf2_ref,
                           *, H, W, C, Bt, S):
    PW = W + 2
    Lp = (H + 2) * PW          # one zero-ring padded image, flattened
    M = Bt * Lp                # lane extent of the activation slab
    inv_hw = 1.0 / float(H * W)

    r = pl.program_id(1)
    n_blocks = pl.num_programs(1)

    # ---- per-group init (first block): zero halo/slack, load x into interior.
    # buf/buf2 invariant: positions outside each image's interior are 0; all
    # later interior writes are interior-masked so the invariant is maintained
    # by construction every step (not just relied upon from r == 0).
    @pl.when(r == 0)
    def _init():
        buf_ref[...] = jnp.zeros_like(buf_ref)
        buf2_ref[...] = jnp.zeros_like(buf2_ref)
        buf_ref[:, pl.ds(S, M)] = x_ref[0].astype(jnp.float32)

    mask = mask_ref[...]       # (1, M): 1 at valid pixels, 0 at halo/junk

    def conv3x3(src_ref, wk, bias):
        # src_ref: (C, LB) padded activation buffer (zero borders / slack)
        # wk:      (9*C, C) value, rows grouped per tap: wk[t*C+co, ci]
        # bias:    (C, 1)
        # SAME conv as 9 accumulated K=C dots over lane-shifted views; the
        # junk produced at halo positions is masked out by the callers.
        acc = None
        for dy in range(3):
            for dx in range(3):
                t = 3 * dy + dx
                off = (dy - 1) * PW + (dx - 1)
                v = src_ref[:, pl.ds(S + off, M)]          # (C, M) shifted view
                wt = wk[t * C:(t + 1) * C, :]              # (C_out, C_in)
                d = jnp.dot(wt, v, preferred_element_type=jnp.float32)
                acc = d if acc is None else acc + d
        return acc + bias                                  # (C, M)

    # ---- RCAB block r : conv3x3+ReLU -> conv3x3 -> CA gate -> residual add
    h1 = conv3x3(buf_ref, w1_ref[0], b1_ref[0])
    h1 = jnp.maximum(h1, 0.0) * mask                       # keep zero halo
    buf2_ref[:, pl.ds(S, M)] = h1

    h2 = conv3x3(buf2_ref, w2_ref[0], b2_ref[0])

    # channel attention: per-image pooling / gate broadcast via sel matmuls
    pooled = jnp.dot(h2, selT_ref[...],
                     preferred_element_type=jnp.float32) * inv_hw      # (C, Bt)
    a = jnp.maximum(jnp.dot(cw1_ref[0], pooled,
                            preferred_element_type=jnp.float32) + cb1_ref[0],
                    0.0)                                               # (Cr, Bt)
    g = jnp.dot(cw2_ref[0], a,
                preferred_element_type=jnp.float32) + cb2_ref[0]       # (C, Bt)
    gate = jax.nn.sigmoid(g)
    gate_b = jnp.dot(gate, sel_ref[...],
                     preferred_element_type=jnp.float32)   # (C, M), 0 at halo

    prev = buf_ref[:, pl.ds(S, M)]
    buf_ref[:, pl.ds(S, M)] = h2 * gate_b + prev           # RCAB residual add

    # ---- last block: tail conv + group skip.  The output block index is
    # constant in r, so writing only on the last step is the single HBM
    # writeback per group (documented revisit semantics).
    @pl.when(r == n_blocks - 1)
    def _tail():
        ht = conv3x3(buf_ref, tw_ref[...], tb_ref[...])
        out = ht * mask + x_ref[0].astype(jnp.float32)
        o_ref[0] = out.astype(o_ref.dtype)


def _pick_batch_tile(B, C, Lp, max_bt=8, budget_bytes=6 << 20):
    for bt in range(min(B, max_bt), 0, -1):
        if B % bt:
            continue
        approx = (2 * (bt * Lp + 2 * 128) + 4 * bt * Lp) * C * 4
        if approx <= budget_bytes:
            return bt
    return 1


def residual_group_forward(x_nchw, params, batch_tile=None):
    B, C, H, W = x_nchw.shape
    rcabs = params["rcabs"]
    n = len(rcabs)
    Cr = rcabs[0]["ca_w1"].shape[-1]

    PH, PW = H + 2, W + 2
    Lp = PH * PW
    Bt = batch_tile if batch_tile is not None else _pick_batch_tile(B, C, Lp)
    assert B % Bt == 0
    G = B // Bt
    M = Bt * Lp
    S = _round_up(PW + 1, 128)     # lane-aligned interior start; >= halo reach
    LB = M + 2 * S

    # Host-side one-time weight packing.
    def pack_conv(w):              # HWIO (3,3,Ci,Co) -> (9*Co, Ci), tap-major
        co, ci = w.shape[3], w.shape[2]
        return jnp.transpose(w, (0, 1, 3, 2)).reshape(9 * co, ci)

    w1s = jnp.stack([pack_conv(blk["w_conv1"]) for blk in rcabs])     # (n,9C,C)
    w2s = jnp.stack([pack_conv(blk["w_conv2"]) for blk in rcabs])
    b1s = jnp.stack([blk["b_conv1"].reshape(C, 1) for blk in rcabs])
    b2s = jnp.stack([blk["b_conv2"].reshape(C, 1) for blk in rcabs])
    cw1s = jnp.stack([blk["ca_w1"].T for blk in rcabs])               # (n,Cr,C)
    cb1s = jnp.stack([blk["ca_b1"].reshape(Cr, 1) for blk in rcabs])
    cw2s = jnp.stack([blk["ca_w2"].T for blk in rcabs])               # (n,C,Cr)
    cb2s = jnp.stack([blk["ca_b2"].reshape(C, 1) for blk in rcabs])
    tw = pack_conv(params["tail_w"])
    tb = params["tail_b"].reshape(C, 1)

    # Host-side layout plumbing: NCHW -> zero-padded, flattened, Bt-folded slab.
    xp = jnp.pad(x_nchw, ((0, 0), (0, 0), (1, 1), (1, 1)))            # B,C,PH,PW
    xp = xp.reshape(G, Bt, C, Lp).transpose(0, 2, 1, 3).reshape(G, C, M)

    interior = (jnp.zeros((PH, PW), jnp.float32)
                .at[1:H + 1, 1:W + 1].set(1.0).reshape(Lp))
    sel = jnp.kron(jnp.eye(Bt, dtype=jnp.float32), interior[None, :])  # (Bt,M)
    selT = sel.T                                                       # (M,Bt)
    intmask = jnp.sum(sel, axis=0, keepdims=True)                      # (1,M)

    kernel = functools.partial(_residual_group_kernel,
                               H=H, W=W, C=C, Bt=Bt, S=S)

    out_flat = pl.pallas_call(
        kernel,
        out_shape=jax.ShapeDtypeStruct((G, C, M), x_nchw.dtype),
        grid=(G, n),
        in_specs=[
            pl.BlockSpec((1, C, M), lambda g, r: (g, 0, 0)),       # x slab
            pl.BlockSpec((1, M), lambda g, r: (0, 0)),             # interior mask
            pl.BlockSpec((Bt, M), lambda g, r: (0, 0)),            # per-image sel
            pl.BlockSpec((M, Bt), lambda g, r: (0, 0)),            # sel transpose
            pl.BlockSpec((1, 9 * C, C), lambda g, r: (r, 0, 0)),   # conv1 w
            pl.BlockSpec((1, C, 1), lambda g, r: (r, 0, 0)),       # conv1 b
            pl.BlockSpec((1, 9 * C, C), lambda g, r: (r, 0, 0)),   # conv2 w
            pl.BlockSpec((1, C, 1), lambda g, r: (r, 0, 0)),       # conv2 b
            pl.BlockSpec((1, Cr, C), lambda g, r: (r, 0, 0)),      # CA w1
            pl.BlockSpec((1, Cr, 1), lambda g, r: (r, 0, 0)),      # CA b1
            pl.BlockSpec((1, C, Cr), lambda g, r: (r, 0, 0)),      # CA w2
            pl.BlockSpec((1, C, 1), lambda g, r: (r, 0, 0)),       # CA b2
            pl.BlockSpec((9 * C, C), lambda g, r: (0, 0)),         # tail w
            pl.BlockSpec((C, 1), lambda g, r: (0, 0)),             # tail b
        ],
        out_specs=pl.BlockSpec((1, C, M), lambda g, r: (g, 0, 0)),
        scratch_shapes=[
            pltpu.VMEM((C, LB), jnp.float32),   # resident padded activation
            pltpu.VMEM((C, LB), jnp.float32),   # padded conv1 out (conv2 input)
        ],
        compiler_params=pltpu.CompilerParams(
            dimension_semantics=("parallel", "arbitrary"),
            vmem_limit_bytes=64 * 1024 * 1024),
    )(xp, intmask, sel, selT, w1s, b1s, w2s, b2s, cw1s, cb1s, cw2s, cb2s, tw, tb)

    # Host-side unpack: slab -> NCHW, strip the halo.
    o = out_flat.reshape(G, C, Bt, PH, PW).transpose(0, 2, 1, 3, 4)
    o = o.reshape(B, C, PH, PW)
    return o[:, :, 1:H + 1, 1:W + 1]


# ----------------------------------------------------------------------------
# Pure-JAX reference (for numerical verification)
# ----------------------------------------------------------------------------
def _conv3x3_ref(x, w, b, relu):
    y = lax.conv_general_dilated(
        x, w, window_strides=(1, 1), padding="SAME",
        dimension_numbers=("NHWC", "HWIO", "NHWC"))
    y = y + b.reshape(1, 1, 1, -1)
    return jnp.maximum(y, 0.0) if relu else y


def _residual_group_ref(x_nhwc, params):
    out = x_nhwc
    for blk in params["rcabs"]:
        r = _conv3x3_ref(out, blk["w_conv1"], blk["b_conv1"], True)
        r = _conv3x3_ref(r, blk["w_conv2"], blk["b_conv2"], False)
        pooled = jnp.mean(r, axis=(1, 2))                       # (B, C)
        h = jnp.maximum(pooled @ blk["ca_w1"] + blk["ca_b1"], 0.0)
        gate = jax.nn.sigmoid(h @ blk["ca_w2"] + blk["ca_b2"])
        out = r * gate[:, None, None, :] + out
    res = _conv3x3_ref(out, params["tail_w"], params["tail_b"], False)
    return res + x_nhwc


# ----------------------------------------------------------------------------
# Deterministic parameter init (synthetic; matches PyTorch module's shapes)
# ----------------------------------------------------------------------------
def init_params(key, n_feat, reduction, n_resblocks):
    cr = n_feat // reduction
    rcabs = []
    for _ in range(n_resblocks):
        key, *ks = jax.random.split(key, 9)
        rcabs.append(dict(
            w_conv1=0.05 * jax.random.normal(ks[0], (3, 3, n_feat, n_feat),
                                             jnp.float32),
            b_conv1=0.05 * jax.random.normal(ks[1], (n_feat,), jnp.float32),
            w_conv2=0.05 * jax.random.normal(ks[2], (3, 3, n_feat, n_feat),
                                             jnp.float32),
            b_conv2=0.05 * jax.random.normal(ks[3], (n_feat,), jnp.float32),
            ca_w1=0.1 * jax.random.normal(ks[4], (n_feat, cr), jnp.float32),
            ca_b1=0.1 * jax.random.normal(ks[5], (cr,), jnp.float32),
            ca_w2=0.1 * jax.random.normal(ks[6], (cr, n_feat), jnp.float32),
            ca_b2=0.1 * jax.random.normal(ks[7], (n_feat,), jnp.float32),
        ))
    key, k1, k2 = jax.random.split(key, 3)
    return dict(
        rcabs=rcabs,
        tail_w=0.05 * jax.random.normal(k1, (3, 3, n_feat, n_feat),
                                        jnp.float32),
        tail_b=0.05 * jax.random.normal(k2, (n_feat,), jnp.float32),
    )


if __name__ == "__main__":
    # Small config consistent with the module:
    #   n_feat=16, kernel_size=3, reduction=4, n_resblocks=2
    B, C, H, W = 2, 16, 16, 16
    reduction, n_resblocks = 4, 2

    key = jax.random.PRNGKey(0)
    key, kx = jax.random.split(key)
    x = jax.random.normal(kx, (B, C, H, W), jnp.float32)     # NCHW like PyTorch

    params = init_params(key, C, reduction, n_resblocks)

    out = jax.block_until_ready(residual_group_forward(x, params))

    x_nhwc = jnp.transpose(x, (0, 2, 3, 1))
    ref = jnp.transpose(_residual_group_ref(x_nhwc, params), (0, 3, 1, 2))
    ref = jax.block_until_ready(ref)

    assert out.shape == (B, C, H, W)
    err = float(jnp.max(jnp.abs(out - ref)))
    assert jnp.allclose(out, ref, atol=1e-4, rtol=1e-4), err

    print("KERNEL_OK")
</pallas_src>

<mosaic_0001>
module attributes {stable_mosaic.version = 11 : i64} {
  func.func @_residual_group_kernel(%arg0: i32, %arg1: i32, %arg2: memref<1x16x648xf32, #tpu.memory_space<vmem>>, %arg3: memref<1x648xf32, #tpu.memory_space<vmem>>, %arg4: memref<2x648xf32, #tpu.memory_space<vmem>>, %arg5: memref<648x2xf32, #tpu.memory_space<vmem>>, %arg6: memref<1x144x16xf32, #tpu.memory_space<vmem>>, %arg7: memref<1x16x1xf32, #tpu.memory_space<vmem>>, %arg8: memref<1x144x16xf32, #tpu.memory_space<vmem>>, %arg9: memref<1x16x1xf32, #tpu.memory_space<vmem>>, %arg10: memref<1x4x16xf32, #tpu.memory_space<vmem>>, %arg11: memref<1x4x1xf32, #tpu.memory_space<vmem>>, %arg12: memref<1x16x4xf32, #tpu.memory_space<vmem>>, %arg13: memref<1x16x1xf32, #tpu.memory_space<vmem>>, %arg14: memref<144x16xf32, #tpu.memory_space<vmem>>, %arg15: memref<16x1xf32, #tpu.memory_space<vmem>>, %arg16: memref<1x16x648xf32, #tpu.memory_space<vmem>>, %arg17: memref<16x904xf32, #tpu.memory_space<vmem>>, %arg18: memref<16x904xf32, #tpu.memory_space<vmem>>) attributes {dimension_semantics = [#tpu.dimension_semantics<parallel>, #tpu.dimension_semantics<arbitrary>], iteration_bounds = array<i64: 1, 2>, scalar_prefetch = 0 : i64, scratch_operands = 2 : i64, tpu.core_type = #tpu.core_type<tc>, window_params = [{transform_indices = @transform_0, window_bounds = array<i64: 1, 16, 648>}, {pipeline_mode = #tpu.pipeline_mode<synchronous>, transform_indices = @transform_1, window_bounds = array<i64: 1, 648>}, {pipeline_mode = #tpu.pipeline_mode<synchronous>, transform_indices = @transform_2, window_bounds = array<i64: 2, 648>}, {pipeline_mode = #tpu.pipeline_mode<synchronous>, transform_indices = @transform_3, window_bounds = array<i64: 648, 2>}, {transform_indices = @transform_4, window_bounds = array<i64: 1, 144, 16>}, {transform_indices = @transform_5, window_bounds = array<i64: 1, 16, 1>}, {transform_indices = @transform_6, window_bounds = array<i64: 1, 144, 16>}, {transform_indices = @transform_7, window_bounds = array<i64: 1, 16, 1>}, {transform_indices = @transform_8, window_bounds = array<i64: 1, 4, 16>}, {transform_indices = @transform_9, window_bounds = array<i64: 1, 4, 1>}, {transform_indices = @transform_10, window_bounds = array<i64: 1, 16, 4>}, {transform_indices = @transform_11, window_bounds = array<i64: 1, 16, 1>}, {pipeline_mode = #tpu.pipeline_mode<synchronous>, transform_indices = @transform_12, window_bounds = array<i64: 144, 16>}, {pipeline_mode = #tpu.pipeline_mode<synchronous>, transform_indices = @transform_13, window_bounds = array<i64: 16, 1>}, {transform_indices = @transform_14, window_bounds = array<i64: 1, 16, 648>}]} {
    %c0_i32 = arith.constant 0 : i32
    %0 = arith.cmpi eq, %arg1, %c0_i32 : i32
    %1 = arith.extui %0 : i1 to i32
    %c0_i32_0 = arith.constant 0 : i32
    %2 = arith.cmpi ne, %1, %c0_i32_0 : i32
    scf.if %2 {
      %cst_89 = arith.constant 0.000000e+00 : f32
      %125 = vector.broadcast %cst_89 : f32 to vector<16x904xf32>
      %c0_90 = arith.constant 0 : index
      %c0_91 = arith.constant 0 : index
      %126 = vector.load %arg17[%c0_90, %c0_91] : memref<16x904xf32, #tpu.memory_space<vmem>>, vector<16x904xf32>
      tpu.vector_store %arg17[%c0_90, %c0_91], %125 {strides = array<i32>} : memref<16x904xf32, #tpu.memory_space<vmem>>, vector<16x904xf32>,
      %cst_92 = arith.constant 0.000000e+00 : f32
      %127 = vector.broadcast %cst_92 : f32 to vector<16x904xf32>
      %c0_93 = arith.constant 0 : index
      %c0_94 = arith.constant 0 : index
      %128 = vector.load %arg18[%c0_93, %c0_94] : memref<16x904xf32, #tpu.memory_space<vmem>>, vector<16x904xf32>
      tpu.vector_store %arg18[%c0_93, %c0_94], %127 {strides = array<i32>} : memref<16x904xf32, #tpu.memory_space<vmem>>, vector<16x904xf32>,
      %c0_95 = arith.constant 0 : index
      %c0_96 = arith.constant 0 : index
      %c0_97 = arith.constant 0 : index
      %129 = vector.load %arg2[%c0_95, %c0_96, %c0_97] : memref<1x16x648xf32, #tpu.memory_space<vmem>>, vector<1x16x648xf32>
      %130 = vector.shape_cast %129 : vector<1x16x648xf32> to vector<16x648xf32>
      %c0_98 = arith.constant 0 : index
      %c128_99 = arith.constant 128 : index
      %131 = vector.load %arg17[%c0_98, %c128_99] : memref<16x904xf32, #tpu.memory_space<vmem>>, vector<16x648xf32>
      tpu.vector_store %arg17[%c0_98, %c128_99], %130 {strides = array<i32>} : memref<16x904xf32, #tpu.memory_space<vmem>>, vector<16x648xf32>,
    } else {
    }
    %c0 = arith.constant 0 : index
    %c0_1 = arith.constant 0 : index
    %3 = vector.load %arg3[%c0, %c0_1] : memref<1x648xf32, #tpu.memory_space<vmem>>, vector<1x648xf32>
    %c0_2 = arith.constant 0 : index
    %c0_3 = arith.constant 0 : index
    %c0_4 = arith.constant 0 : index
    %4 = vector.load %arg6[%c0_2, %c0_3, %c0_4] : memref<1x144x16xf32, #tpu.memory_space<vmem>>, vector<1x144x16xf32>
    %5 = vector.shape_cast %4 : vector<1x144x16xf32> to vector<144x16xf32>
    %c0_5 = arith.constant 0 : index
    %c0_6 = arith.constant 0 : index
    %c0_7 = arith.constant 0 : index
    %6 = vector.load %arg7[%c0_5, %c0_6, %c0_7] : memref<1x16x1xf32, #tpu.memory_space<vmem>>, vector<1x16x1xf32>
    %7 = vector.shape_cast %6 : vector<1x16x1xf32> to vector<16x1xf32>
    %c0_8 = arith.constant 0 : index
    %c109 = arith.constant 109 : index
    %8 = vector.load %arg17[%c0_8, %c109] : memref<16x904xf32, #tpu.memory_space<vmem>>, vector<16x648xf32>
    %9 = vector.extract_strided_slice %5 {offsets = [0, 0], sizes = [16, 16], strides = [1, 1]} : vector<144x16xf32> to vector<16x16xf32>
    %cst = arith.constant dense<0.000000e+00> : vector<16x648xf32>
    %10 = tpu.matmul %9, %8, %cst {dimension_numbers = #tpu.dot_dimension_numbers<[1], [0], [0], [1], [0, 0, 1, 1], [], []>} : vector<16x16xf32>, vector<16x648xf32>, vector<16x648xf32> -> vector<16x648xf32>
    %c0_9 = arith.constant 0 : index
    %c110 = arith.constant 110 : index
    %11 = vector.load %arg17[%c0_9, %c110] : memref<16x904xf32, #tpu.memory_space<vmem>>, vector<16x648xf32>
    %12 = vector.extract_strided_slice %5 {offsets = [16, 0], sizes = [16, 16], strides = [1, 1]} : vector<144x16xf32> to vector<16x16xf32>
    %cst_10 = arith.constant dense<0.000000e+00> : vector<16x648xf32>
    %13 = tpu.matmul %12, %11, %cst_10 {dimension_numbers = #tpu.dot_dimension_numbers<[1], [0], [0], [1], [0, 0, 1, 1], [], []>} : vector<16x16xf32>, vector<16x648xf32>, vector<16x648xf32> -> vector<16x648xf32>
    %14 = arith.addf %10, %13 : vector<16x648xf32>
    %c0_11 = arith.constant 0 : index
    %c111 = arith.constant 111 : index
    %15 = vector.load %arg17[%c0_11, %c111] : memref<16x904xf32, #tpu.memory_space<vmem>>, vector<16x648xf32>
    %16 = vector.extract_strided_slice %5 {offsets = [32, 0], sizes = [16, 16], strides = [1, 1]} : vector<144x16xf32> to vector<16x16xf32>
    %cst_12 = arith.constant dense<0.000000e+00> : vector<16x648xf32>
    %17 = tpu.matmul %16, %15, %cst_12 {dimension_numbers = #tpu.dot_dimension_numbers<[1], [0], [0], [1], [0, 0, 1, 1], [], []>} : vector<16x16xf32>, vector<16x648xf32>, vector<16x648xf32> -> vector<16x648xf32>
    %18 = arith.addf %14, %17 : vector<16x648xf32>
    %c0_13 = arith.constant 0 : index
    %c127 = arith.constant 127 : index
    %19 = vector.load %arg17[%c0_13, %c127] : memref<16x904xf32, #tpu.memory_space<vmem>>, vector<16x648xf32>
    %20 = vector.extract_strided_slice %5 {offsets = [48, 0], sizes = [16, 16], strides = [1, 1]} : vector<144x16xf32> to vector<16x16xf32>
    %cst_14 = arith.constant dense<0.000000e+00> : vector<16x648xf32>
    %21 = tpu.matmul %20, %19, %cst_14 {dimension_numbers = #tpu.dot_dimension_numbers<[1], [0], [0], [1], [0, 0, 1, 1], [], []>} : vector<16x16xf32>, vector<16x648xf32>, vector<16x648xf32> -> vector<16x648xf32>
    %22 = arith.addf %18, %21 : vector<16x648xf32>
    %c0_15 = arith.constant 0 : index
    %c128 = arith.constant 128 : index
    %23 = vector.load %arg17[%c0_15, %c128] : memref<16x904xf32, #tpu.memory_space<vmem>>, vector<16x648xf32>
    %24 = vector.extract_strided_slice %5 {offsets = [64, 0], sizes = [16, 16], strides = [1, 1]} : vector<144x16xf32> to vector<16x16xf32>
    %cst_16 = arith.constant dense<0.000000e+00> : vector<16x648xf32>
    %25 = tpu.matmul %24, %23, %cst_16 {dimension_numbers = #tpu.dot_dimension_numbers<[1], [0], [0], [1], [0, 0, 1, 1], [], []>} : vector<16x16xf32>, vector<16x648xf32>, vector<16x648xf32> -> vector<16x648xf32>
    %26 = arith.addf %22, %25 : vector<16x648xf32>
    %c0_17 = arith.constant 0 : index
    %c129 = arith.constant 129 : index
    %27 = vector.load %arg17[%c0_17, %c129] : memref<16x904xf32, #tpu.memory_space<vmem>>, vector<16x648xf32>
    %28 = vector.extract_strided_slice %5 {offsets = [80, 0], sizes = [16, 16], strides = [1, 1]} : vector<144x16xf32> to vector<16x16xf32>
    %cst_18 = arith.constant dense<0.000000e+00> : vector<16x648xf32>
    %29 = tpu.matmul %28, %27, %cst_18 {dimension_numbers = #tpu.dot_dimension_numbers<[1], [0], [0], [1], [0, 0, 1, 1], [], []>} : vector<16x16xf32>, vector<16x648xf32>, vector<16x648xf32> -> vector<16x648xf32>
    %30 = arith.addf %26, %29 : vector<16x648xf32>
    %c0_19 = arith.constant 0 : index
    %c145 = arith.constant 145 : index
    %31 = vector.load %arg17[%c0_19, %c145] : memref<16x904xf32, #tpu.memory_space<vmem>>, vector<16x648xf32>
    %32 = vector.extract_strided_slice %5 {offsets = [96, 0], sizes = [16, 16], strides = [1, 1]} : vector<144x16xf32> to vector<16x16xf32>
    %cst_20 = arith.constant dense<0.000000e+00> : vector<16x648xf32>
    %33 = tpu.matmul %32, %31, %cst_20 {dimension_numbers = #tpu.dot_dimension_numbers<[1], [0], [0], [1], [0, 0, 1, 1], [], []>} : vector<16x16xf32>, vector<16x648xf32>, vector<16x648xf32> -> vector<16x648xf32>
    %34 = arith.addf %30, %33 : vector<16x648xf32>
    %c0_21 = arith.constant 0 : index
    %c146 = arith.constant 146 : index
    %35 = vector.load %arg17[%c0_21, %c146] : memref<16x904xf32, #tpu.memory_space<vmem>>, vector<16x648xf32>
    %36 = vector.extract_strided_slice %5 {offsets = [112, 0], sizes = [16, 16], strides = [1, 1]} : vector<144x16xf32> to vector<16x16xf32>
    %cst_22 = arith.constant dense<0.000000e+00> : vector<16x648xf32>
    %37 = tpu.matmul %36, %35, %cst_22 {dimension_numbers = #tpu.dot_dimension_numbers<[1], [0], [0], [1], [0, 0, 1, 1], [], []>} : vector<16x16xf32>, vector<16x648xf32>, vector<16x648xf32> -> vector<16x648xf32>
    %38 = arith.addf %34, %37 : vector<16x648xf32>
    %c0_23 = arith.constant 0 : index
    %c147 = arith.constant 147 : index
    %39 = vector.load %arg17[%c0_23, %c147] : memref<16x904xf32, #tpu.memory_space<vmem>>, vector<16x648xf32>
    %40 = vector.extract_strided_slice %5 {offsets = [128, 0], sizes = [16, 16], strides = [1, 1]} : vector<144x16xf32> to vector<16x16xf32>
    %cst_24 = arith.constant dense<0.000000e+00> : vector<16x648xf32>
    %41 = tpu.matmul %40, %39, %cst_24 {dimension_numbers = #tpu.dot_dimension_numbers<[1], [0], [0], [1], [0, 0, 1, 1], [], []>} : vector<16x16xf32>, vector<16x648xf32>, vector<16x648xf32> -> vector<16x648xf32>
    %42 = arith.addf %38, %41 : vector<16x648xf32>
    %43 = vector.broadcast %7 : vector<16x1xf32> to vector<16x648xf32>
    %44 = arith.addf %42, %43 : vector<16x648xf32>
    %cst_25 = arith.constant 0.000000e+00 : f32
    %45 = vector.broadcast %cst_25 : f32 to vector<16x648xf32>
    %46 = arith.maximumf %44, %45 : vector<16x648xf32>
    %47 = vector.broadcast %3 : vector<1x648xf32> to vector<16x648xf32>
    %48 = arith.mulf %46, %47 : vector<16x648xf32>
    %c0_26 = arith.constant 0 : index
    %c128_27 = arith.constant 128 : index
    %49 = vector.load %arg18[%c0_26, %c128_27] : memref<16x904xf32, #tpu.memory_space<vmem>>, vector<16x648xf32>
    tpu.vector_store %arg18[%c0_26, %c128_27], %48 {strides = array<i32>} : memref<16x904xf32, #tpu.memory_space<vmem>>, vector<16x648xf32>,
    %c0_28 = arith.constant 0 : index
    %c0_29 = arith.constant 0 : index
    %c0_30 = arith.constant 0 : index
    %50 = vector.load %arg8[%c0_28, %c0_29, %c0_30] : memref<1x144x16xf32, #tpu.memory_space<vmem>>, vector<1x144x16xf32>
    %51 = vector.shape_cast %50 : vector<1x144x16xf32> to vector<144x16xf32>
    %c0_31 = arith.constant 0 : index
    %c0_32 = arith.constant 0 : index
    %c0_33 = arith.constant 0 : index
    %52 = vector.load %arg9[%c0_31, %c0_32, %c0_33] : memref<1x16x1xf32, #tpu.memory_space<vmem>>, vector<1x16x1xf32>
    %53 = vector.shape_cast %52 : vector<1x16x1xf32> to vector<16x1xf32>
    %c0_34 = arith.constant 0 : index
    %c109_35 = arith.constant 109 : index
    %54 = vector.load %arg18[%c0_34, %c109_35] : memref<16x904xf32, #tpu.memory_space<vmem>>, vector<16x648xf32>
    %55 = vector.extract_strided_slice %51 {offsets = [0, 0], sizes = [16, 16], strides = [1, 1]} : vector<144x16xf32> to vector<16x16xf32>
    %cst_36 = arith.constant dense<0.000000e+00> : vector<16x648xf32>
    %56 = tpu.matmul %55, %54, %cst_36 {dimension_numbers = #tpu.dot_dimension_numbers<[1], [0], [0], [1], [0, 0, 1, 1], [], []>} : vector<16x16xf32>, vector<16x648xf32>, vector<16x648xf32> -> vector<16x648xf32>
    %c0_37 = arith.constant 0 : index
    %c110_38 = arith.constant 110 : index
    %57 = vector.load %arg18[%c0_37, %c110_38] : memref<16x904xf32, #tpu.memory_space<vmem>>, vector<16x648xf32>
    %58 = vector.extract_strided_slice %51 {offsets = [16, 0], sizes = [16, 16], strides = [1, 1]} : vector<144x16xf32> to vector<16x16xf32>
    %cst_39 = arith.constant dense<0.000000e+00> : vector<16x648xf32>
    %59 = tpu.matmul %58, %57, %cst_39 {dimension_numbers = #tpu.dot_dimension_numbers<[1], [0], [0], [1], [0, 0, 1, 1], [], []>} : vector<16x16xf32>, vector<16x648xf32>, vector<16x648xf32> -> vector<16x648xf32>
    %60 = arith.addf %56, %59 : vector<16x648xf32>
    %c0_40 = arith.constant 0 : index
    %c111_41 = arith.constant 111 : index
    %61 = vector.load %arg18[%c0_40, %c111_41] : memref<16x904xf32, #tpu.memory_space<vmem>>, vector<16x648xf32>
    %62 = vector.extract_strided_slice %51 {offsets = [32, 0], sizes = [16, 16], strides = [1, 1]} : vector<144x16xf32> to vector<16x16xf32>
    %cst_42 = arith.constant dense<0.000000e+00> : vector<16x648xf32>
    %63 = tpu.matmul %62, %61, %cst_42 {dimension_numbers = #tpu.dot_dimension_numbers<[1], [0], [0], [1], [0, 0, 1, 1], [], []>} : vector<16x16xf32>, vector<16x648xf32>, vector<16x648xf32> -> vector<16x648xf32>
    %64 = arith.addf %60, %63 : vector<16x648xf32>
    %c0_43 = arith.constant 0 : index
    %c127_44 = arith.constant 127 : index
    %65 = vector.load %arg18[%c0_43, %c127_44] : memref<16x904xf32, #tpu.memory_space<vmem>>, vector<16x648xf32>
    %66 = vector.extract_strided_slice %51 {offsets = [48, 0], sizes = [16, 16], strides = [1, 1]} : vector<144x16xf32> to vector<16x16xf32>
    %cst_45 = arith.constant dense<0.000000e+00> : vector<16x648xf32>
    %67 = tpu.matmul %66, %65, %cst_45 {dimension_numbers = #tpu.dot_dimension_numbers<[1], [0], [0], [1], [0, 0, 1, 1], [], []>} : vector<16x16xf32>, vector<16x648xf32>, vector<16x648xf32> -> vector<16x648xf32>
    %68 = arith.addf %64, %67 : vector<16x648xf32>
    %c0_46 = arith.constant 0 : index
    %c128_47 = arith.constant 128 : index
    %69 = vector.load %arg18[%c0_46, %c128_47] : memref<16x904xf32, #tpu.memory_space<vmem>>, vector<16x648xf32>
    %70 = vector.extract_strided_slice %51 {offsets = [64, 0], sizes = [16, 16], strides = [1, 1]} : vector<144x16xf32> to vector<16x16xf32>
    %cst_48 = arith.constant dense<0.000000e+00> : vector<16x648xf32>
    %71 = tpu.matmul %70, %69, %cst_48 {dimension_numbers = #tpu.dot_dimension_numbers<[1], [0], [0], [1], [0, 0, 1, 1], [], []>} : vector<16x16xf32>, vector<16x648xf32>, vector<16x648xf32> -> vector<16x648xf32>
    %72 = arith.addf %68, %71 : vector<16x648xf32>
    %c0_49 = arith.constant 0 : index
    %c129_50 = arith.constant 129 : index
    %73 = vector.load %arg18[%c0_49, %c129_50] : memref<16x904xf32, #tpu.memory_space<vmem>>, vector<16x648xf32>
    %74 = vector.extract_strided_slice %51 {offsets = [80, 0], sizes = [16, 16], strides = [1, 1]} : vector<144x16xf32> to vector<16x16xf32>
    %cst_51 = arith.constant dense<0.000000e+00> : vector<16x648xf32>
    %75 = tpu.matmul %74, %73, %cst_51 {dimension_numbers = #tpu.dot_dimension_numbers<[1], [0], [0], [1], [0, 0, 1, 1], [], []>} : vector<16x16xf32>, vector<16x648xf32>, vector<16x648xf32> -> vector<16x648xf32>
    %76 = arith.addf %72, %75 : vector<16x648xf32>
    %c0_52 = arith.constant 0 : index
    %c145_53 = arith.constant 145 : index
    %77 = vector.load %arg18[%c0_52, %c145_53] : memref<16x904xf32, #tpu.memory_space<vmem>>, vector<16x648xf32>
    %78 = vector.extract_strided_slice %51 {offsets = [96, 0], sizes = [16, 16], strides = [1, 1]} : vector<144x16xf32> to vector<16x16xf32>
    %cst_54 = arith.constant dense<0.000000e+00> : vector<16x648xf32>
    %79 = tpu.matmul %78, %77, %cst_54 {dimension_numbers = #tpu.dot_dimension_numbers<[1], [0], [0], [1], [0, 0, 1, 1], [], []>} : vector<16x16xf32>, vector<16x648xf32>, vector<16x648xf32> -> vector<16x648xf32>
    %80 = arith.addf %76, %79 : vector<16x648xf32>
    %c0_55 = arith.constant 0 : index
    %c146_56 = arith.constant 146 : index
    %81 = vector.load %arg18[%c0_55, %c146_56] : memref<16x904xf32, #tpu.memory_space<vmem>>, vector<16x648xf32>
    %82 = vector.extract_strided_slice %51 {offsets = [112, 0], sizes = [16, 16], strides = [1, 1]} : vector<144x16xf32> to vector<16x16xf32>
    %cst_57 = arith.constant dense<0.000000e+00> : vector<16x648xf32>
    %83 = tpu.matmul %82, %81, %cst_57 {dimension_numbers = #tpu.dot_dimension_numbers<[1], [0], [0], [1], [0, 0, 1, 1], [], []>} : vector<16x16xf32>, vector<16x648xf32>, vector<16x648xf32> -> vector<16x648xf32>
    %84 = arith.addf %80, %83 : vector<16x648xf32>
    %c0_58 = arith.constant 0 : index
    %c147_59 = arith.constant 147 : index
    %85 = vector.load %arg18[%c0_58, %c147_59] : memref<16x904xf32, #tpu.memory_space<vmem>>, vector<16x648xf32>
    %86 = vector.extract_strided_slice %51 {offsets = [128, 0], sizes = [16, 16], strides = [1, 1]} : vector<144x16xf32> to vector<16x16xf32>
    %cst_60 = arith.constant dense<0.000000e+00> : vector<16x648xf32>
    %87 = tpu.matmul %86, %85, %cst_60 {dimension_numbers = #tpu.dot_dimension_numbers<[1], [0], [0], [1], [0, 0, 1, 1], [], []>} : vector<16x16xf32>, vector<16x648xf32>, vector<16x648xf32> -> vector<16x648xf32>
    %88 = arith.addf %84, %87 : vector<16x648xf32>
    %89 = vector.broadcast %53 : vector<16x1xf32> to vector<16x648xf32>
    %90 = arith.addf %88, %89 : vector<16x648xf32>
    %c0_61 = arith.constant 0 : index
    %c0_62 = arith.constant 0 : index
    %91 = vector.load %arg5[%c0_61, %c0_62] : memref<648x2xf32, #tpu.memory_space<vmem>>, vector<648x2xf32>
    %cst_63 = arith.constant dense<0.000000e+00> : vector<16x2xf32>
    %92 = tpu.matmul %90, %91, %cst_63 {dimension_numbers = #tpu.dot_dimension_numbers<[1], [0], [0], [1], [0, 0, 1, 1], [], []>} : vector<16x648xf32>, vector<648x2xf32>, vector<16x2xf32> -> vector<16x2xf32>
    %cst_64 = arith.constant 3.906250e-03 : f32
    %93 = vector.broadcast %cst_64 : f32 to vector<16x2xf32>
    %94 = arith.mulf %92, %93 : vector<16x2xf32>
    %c0_65 = arith.constant 0 : index
    %c0_66 = arith.constant 0 : index
    %c0_67 = arith.constant 0 : index
    %95 = vector.load %arg10[%c0_65, %c0_66, %c0_67] : memref<1x4x16xf32, #tpu.memory_space<vmem>>, vector<1x4x16xf32>
    %96 = vector.shape_cast %95 : vector<1x4x16xf32> to vector<4x16xf32>
    %cst_68 = arith.constant dense<0.000000e+00> : vector<4x2xf32>
    %97 = tpu.matmul %96, %94, %cst_68 {dimension_numbers = #tpu.dot_dimension_numbers<[1], [0], [0], [1], [0, 0, 1, 1], [], []>} : vector<4x16xf32>, vector<16x2xf32>, vector<4x2xf32> -> vector<4x2xf32>
    %c0_69 = arith.constant 0 : index
    %c0_70 = arith.constant 0 : index
    %c0_71 = arith.constant 0 : index
    %98 = vector.load %arg11[%c0_69, %c0_70, %c0_71] : memref<1x4x1xf32, #tpu.memory_space<vmem>>, vector<1x4x1xf32>
    %99 = vector.shape_cast %98 : vector<1x4x1xf32> to vector<4x1xf32>
    %100 = vector.broadcast %99 : vector<4x1xf32> to vector<4x2xf32>
    %101 = arith.addf %97, %100 : vector<4x2xf32>
    %cst_72 = arith.constant 0.000000e+00 : f32
    %102 = vector.broadcast %cst_72 : f32 to vector<4x2xf32>
    %103 = arith.maximumf %101, %102 : vector<4x2xf32>
    %c0_73 = arith.constant 0 : index
    %c0_74 = arith.constant 0 : index
    %c0_75 = arith.constant 0 : index
    %104 = vector.load %arg12[%c0_73, %c0_74, %c0_75] : memref<1x16x4xf32, #tpu.memory_space<vmem>>, vector<1x16x4xf32>
    %105 = vector.shape_cast %104 : vector<1x16x4xf32> to vector<16x4xf32>
    %cst_76 = arith.constant dense<0.000000e+00> : vector<16x2xf32>
    %106 = tpu.matmul %105, %103, %cst_76 {dimension_numbers = #tpu.dot_dimension_numbers<[1], [0], [0], [1], [0, 0, 1, 1], [], []>} : vector<16x4xf32>, vector<4x2xf32>, vector<16x2xf32> -> vector<16x2xf32>
    %c0_77 = arith.constant 0 : index
    %c0_78 = arith.constant 0 : index
    %c0_79 = arith.constant 0 : index
    %107 = vector.load %arg13[%c0_77, %c0_78, %c0_79] : memref<1x16x1xf32, #tpu.memory_space<vmem>>, vector<1x16x1xf32>
    %108 = vector.shape_cast %107 : vector<1x16x1xf32> to vector<16x1xf32>
    %109 = vector.broadcast %108 : vector<16x1xf32> to vector<16x2xf32>
    %110 = arith.addf %106, %109 : vector<16x2xf32>
    %111 = arith.negf %110 : vector<16x2xf32>
    %112 = math.exp %111 : vector<16x2xf32>
    %cst_80 = arith.constant 1.000000e+00 : f32
    %113 = vector.broadcast %cst_80 : f32 to vector<16x2xf32>
    %114 = arith.addf %113, %112 : vector<16x2xf32>
    %115 = arith.divf %113, %114 : vector<16x2xf32>
    %c0_81 = arith.constant 0 : index
    %c0_82 = arith.constant 0 : index
    %116 = vector.load %arg4[%c0_81, %c0_82] : memref<2x648xf32, #tpu.memory_space<vmem>>, vector<2x648xf32>
    %cst_83 = arith.constant dense<0.000000e+00> : vector<16x648xf32>
    %117 = tpu.matmul %115, %116, %cst_83 {dimension_numbers = #tpu.dot_dimension_numbers<[1], [0], [0], [1], [0, 0, 1, 1], [], []>} : vector<16x2xf32>, vector<2x648xf32>, vector<16x648xf32> -> vector<16x648xf32>
    %c0_84 = arith.constant 0 : index
    %c128_85 = arith.constant 128 : index
    %118 = vector.load %arg17[%c0_84, %c128_85] : memref<16x904xf32, #tpu.memory_space<vmem>>, vector<16x648xf32>
    %119 = arith.mulf %90, %117 : vector<16x648xf32>
    %120 = arith.addf %119, %118 : vector<16x648xf32>
    %c0_86 = arith.constant 0 : index
    %c128_87 = arith.constant 128 : index
    %121 = vector.load %arg17[%c0_86, %c128_87] : memref<16x904xf32, #tpu.memory_space<vmem>>, vector<16x648xf32>
    tpu.vector_store %arg17[%c0_86, %c128_87], %120 {strides = array<i32>} : memref<16x904xf32, #tpu.memory_space<vmem>>, vector<16x648xf32>,
    %c1_i32 = arith.constant 1 : i32
    %122 = arith.cmpi eq, %arg1, %c1_i32 : i32
    %123 = arith.extui %122 : i1 to i32
    %c0_i32_88 = arith.constant 0 : i32
    %124 = arith.cmpi ne, %123, %c0_i32_88 : i32
    scf.if %124 {
      %c0_89 = arith.constant 0 : index
      %c0_90 = arith.constant 0 : index
      %125 = vector.load %arg14[%c0_89, %c0_90] : memref<144x16xf32, #tpu.memory_space<vmem>>, vector<144x16xf32>
      %c0_91 = arith.constant 0 : index
      %c0_92 = arith.constant 0 : index
      %126 = vector.load %arg15[%c0_91, %c0_92] : memref<16x1xf32, #tpu.memory_space<vmem>>, vector<16x1xf32>
      %c0_93 = arith.constant 0 : index
      %c109_94 = arith.constant 109 : index
      %127 = vector.load %arg17[%c0_93, %c109_94] : memref<16x904xf32, #tpu.memory_space<vmem>>, vector<16x648xf32>
      %128 = vector.extract_strided_slice %125 {offsets = [0, 0], sizes = [16, 16], strides = [1, 1]} : vector<144x16xf32> to vector<16x16xf32>
      %cst_95 = arith.constant dense<0.000000e+00> : vector<16x648xf32>
      %129 = tpu.matmul %128, %127, %cst_95 {dimension_numbers = #tpu.dot_dimension_numbers<[1], [0], [0], [1], [0, 0, 1, 1], [], []>} : vector<16x16xf32>, vector<16x648xf32>, vector<16x648xf32> -> vector<16x648xf32>
      %c0_96 = arith.constant 0 : index
      %c110_97 = arith.constant 110 : index
      %130 = vector.load %arg17[%c0_96, %c110_97] : memref<16x904xf32, #tpu.memory_space<vmem>>, vector<16x648xf32>
      %131 = vector.extract_strided_slice %125 {offsets = [16, 0], sizes = [16, 16], strides = [1, 1]} : vector<144x16xf32> to vector<16x16xf32>
      %cst_98 = arith.constant dense<0.000000e+00> : vector<16x648xf32>
      %132 = tpu.matmul %131, %130, %cst_98 {dimension_numbers = #tpu.dot_dimension_numbers<[1], [0], [0], [1], [0, 0, 1, 1], [], []>} : vector<16x16xf32>, vector<16x648xf32>, vector<16x648xf32> -> vector<16x648xf32>
      %133 = arith.addf %129, %132 : vector<16x648xf32>
      %c0_99 = arith.constant 0 : index
      %c111_100 = arith.constant 111 : index
      %134 = vector.load %arg17[%c0_99, %c111_100] : memref<16x904xf32, #tpu.memory_space<vmem>>, vector<16x648xf32>
      %135 = vector.extract_strided_slice %125 {offsets = [32, 0], sizes = [16, 16], strides = [1, 1]} : vector<144x16xf32> to vector<16x16xf32>
      %cst_101 = arith.constant dense<0.000000e+00> : vector<16x648xf32>
      %136 = tpu.matmul %135, %134, %cst_101 {dimension_numbers = #tpu.dot_dimension_numbers<[1], [0], [0], [1], [0, 0, 1, 1], [], []>} : vector<16x16xf32>, vector<16x648xf32>, vector<16x648xf32> -> vector<16x648xf32>
      %137 = arith.addf %133, %136 : vector<16x648xf32>
      %c0_102 = arith.constant 0 : index
      %c127_103 = arith.constant 127 : index
      %138 = vector.load %arg17[%c0_102, %c127_103] : memref<16x904xf32, #tpu.memory_space<vmem>>, vector<16x648xf32>
      %139 = vector.extract_strided_slice %125 {offsets = [48, 0], sizes = [16, 16], strides = [1, 1]} : vector<144x16xf32> to vector<16x16xf32>
      %cst_104 = arith.constant dense<0.000000e+00> : vector<16x648xf32>
      %140 = tpu.matmul %139, %138, %cst_104 {dimension_numbers = #tpu.dot_dimension_numbers<[1], [0], [0], [1], [0, 0, 1, 1], [], []>} : vector<16x16xf32>, vector<16x648xf32>, vector<16x648xf32> -> vector<16x648xf32>
      %141 = arith.addf %137, %140 : vector<16x648xf32>
      %c0_105 = arith.constant 0 : index
      %c128_106 = arith.constant 128 : index
      %142 = vector.load %arg17[%c0_105, %c128_106] : memref<16x904xf32, #tpu.memory_space<vmem>>, vector<16x648xf32>
      %143 = vector.extract_strided_slice %125 {offsets = [64, 0], sizes = [16, 16], strides = [1, 1]} : vector<144x16xf32> to vector<16x16xf32>
      %cst_107 = arith.constant dense<0.000000e+00> : vector<16x648xf32>
      %144 = tpu.matmul %143, %142, %cst_107 {dimension_numbers = #tpu.dot_dimension_numbers<[1], [0], [0], [1], [0, 0, 1, 1], [], []>} : vector<16x16xf32>, vector<16x648xf32>, vector<16x648xf32> -> vector<16x648xf32>
      %145 = arith.addf %141, %144 : vector<16x648xf32>
      %c0_108 = arith.constant 0 : index
      %c129_109 = arith.constant 129 : index
      %146 = vector.load %arg17[%c0_108, %c129_109] : memref<16x904xf32, #tpu.memory_space<vmem>>, vector<16x648xf32>
      %147 = vector.extract_strided_slice %125 {offsets = [80, 0], sizes = [16, 16], strides = [1, 1]} : vector<144x16xf32> to vector<16x16xf32>
      %cst_110 = arith.constant dense<0.000000e+00> : vector<16x648xf32>
      %148 = tpu.matmul %147, %146, %cst_110 {dimension_numbers = #tpu.dot_dimension_numbers<[1], [0], [0], [1], [0, 0, 1, 1], [], []>} : vector<16x16xf32>, vector<16x648xf32>, vector<16x648xf32> -> vector<16x648xf32>
      %149 = arith.addf %145, %148 : vector<16x648xf32>
      %c0_111 = arith.constant 0 : index
      %c145_112 = arith.constant 145 : index
      %150 = vector.load %arg17[%c0_111, %c145_112] : memref<16x904xf32, #tpu.memory_space<vmem>>, vector<16x648xf32>
      %151 = vector.extract_strided_slice %125 {offsets = [96, 0], sizes = [16, 16], strides = [1, 1]} : vector<144x16xf32> to vector<16x16xf32>
      %cst_113 = arith.constant dense<0.000000e+00> : vector<16x648xf32>
      %152 = tpu.matmul %151, %150, %cst_113 {dimension_numbers = #tpu.dot_dimension_numbers<[1], [0], [0], [1], [0, 0, 1, 1], [], []>} : vector<16x16xf32>, vector<16x648xf32>, vector<16x648xf32> -> vector<16x648xf32>
      %153 = arith.addf %149, %152 : vector<16x648xf32>
      %c0_114 = arith.constant 0 : index
      %c146_115 = arith.constant 146 : index
      %154 = vector.load %arg17[%c0_114, %c146_115] : memref<16x904xf32, #tpu.memory_space<vmem>>, vector<16x648xf32>
      %155 = vector.extract_strided_slice %125 {offsets = [112, 0], sizes = [16, 16], strides = [1, 1]} : vector<144x16xf32> to vector<16x16xf32>
      %cst_116 = arith.constant dense<0.000000e+00> : vector<16x648xf32>
      %156 = tpu.matmul %155, %154, %cst_116 {dimension_numbers = #tpu.dot_dimension_numbers<[1], [0], [0], [1], [0, 0, 1, 1], [], []>} : vector<16x16xf32>, vector<16x648xf32>, vector<16x648xf32> -> vector<16x648xf32>
      %157 = arith.addf %153, %156 : vector<16x648xf32>
      %c0_117 = arith.constant 0 : index
      %c147_118 = arith.constant 147 : index
      %158 = vector.load %arg17[%c0_117, %c147_118] : memref<16x904xf32, #tpu.memory_space<vmem>>, vector<16x648xf32>
      %159 = vector.extract_strided_slice %125 {offsets = [128, 0], sizes = [16, 16], strides = [1, 1]} : vector<144x16xf32> to vector<16x16xf32>
      %cst_119 = arith.constant dense<0.000000e+00> : vector<16x648xf32>
      %160 = tpu.matmul %159, %158, %cst_119 {dimension_numbers = #tpu.dot_dimension_numbers<[1], [0], [0], [1], [0, 0, 1, 1], [], []>} : vector<16x16xf32>, vector<16x648xf32>, vector<16x648xf32> -> vector<16x648xf32>
      %161 = arith.addf %157, %160 : vector<16x648xf32>
      %162 = vector.broadcast %126 : vector<16x1xf32> to vector<16x648xf32>
      %163 = arith.addf %161, %162 : vector<16x648xf32>
      %164 = vector.broadcast %3 : vector<1x648xf32> to vector<16x648xf32>
      %165 = arith.mulf %163, %164 : vector<16x648xf32>
      %c0_120 = arith.constant 0 : index
      %c0_121 = arith.constant 0 : index
      %c0_122 = arith.constant 0 : index
      %166 = vector.load %arg2[%c0_120, %c0_121, %c0_122] : memref<1x16x648xf32, #tpu.memory_space<vmem>>, vector<1x16x648xf32>
      %167 = vector.shape_cast %166 : vector<1x16x648xf32> to vector<16x648xf32>
      %168 = arith.addf %165, %167 : vector<16x648xf32>
      %c0_123 = arith.constant 0 : index
      %c0_124 = arith.constant 0 : index
      %c0_125 = arith.constant 0 : index
      %169 = vector.load %arg16[%c0_123, %c0_124, %c0_125] : memref<1x16x648xf32, #tpu.memory_space<vmem>>, vector<1x16x648xf32>
      %170 = vector.shape_cast %169 : vector<1x16x648xf32> to vector<16x648xf32>
      %171 = vector.shape_cast %168 : vector<16x648xf32> to vector<1x16x648xf32>
      tpu.vector_store %arg16[%c0_123, %c0_124, %c0_125], %171 {strides = array<i32>} : memref<1x16x648xf32, #tpu.memory_space<vmem>>, vector<1x16x648xf32>,
    } else {
    }
    return
  }
  func.func @transform_0(%arg0: i32, %arg1: i32) -> (i32, i32, i32) {
    %c0_i32 = arith.constant 0 : i32
    %c0_i32_0 = arith.constant 0 : i32
    %c0_i32_1 = arith.constant 0 : i32
    return %arg0, %c0_i32, %c0_i32_0 : i32, i32, i32
  }
  func.func @transform_1(%arg0: i32, %arg1: i32) -> (i32, i32) {
    %c0_i32 = arith.constant 0 : i32
    %c0_i32_0 = arith.constant 0 : i32
    %c0_i32_1 = arith.constant 0 : i32
    return %c0_i32, %c0_i32_0 : i32, i32
  }
  func.func @transform_2(%arg0: i32, %arg1: i32) -> (i32, i32) {
    %c0_i32 = arith.constant 0 : i32
    %c0_i32_0 = arith.constant 0 : i32
    %c0_i32_1 = arith.constant 0 : i32
    return %c0_i32, %c0_i32_0 : i32, i32
  }
  func.func @transform_3(%arg0: i32, %arg1: i32) -> (i32, i32) {
    %c0_i32 = arith.constant 0 : i32
    %c0_i32_0 = arith.constant 0 : i32
    %c0_i32_1 = arith.constant 0 : i32
    return %c0_i32, %c0_i32_0 : i32, i32
  }
  func.func @transform_4(%arg0: i32, %arg1: i32) -> (i32, i32, i32) {
    %c0_i32 = arith.constant 0 : i32
    %c0_i32_0 = arith.constant 0 : i32
    %c0_i32_1 = arith.constant 0 : i32
    return %arg1, %c0_i32, %c0_i32_0 : i32, i32, i32
  }
  func.func @transform_5(%arg0: i32, %arg1: i32) -> (i32, i32, i32) {
    %c0_i32 = arith.constant 0 : i32
    %c0_i32_0 = arith.constant 0 : i32
    %c0_i32_1 = arith.constant 0 : i32
    return %arg1, %c0_i32, %c0_i32_0 : i32, i32, i32
  }
  func.func @transform_6(%arg0: i32, %arg1: i32) -> (i32, i32, i32) {
    %c0_i32 = arith.constant 0 : i32
    %c0_i32_0 = arith.constant 0 : i32
    %c0_i32_1 = arith.constant 0 : i32
    return %arg1, %c0_i32, %c0_i32_0 : i32, i32, i32
  }
  func.func @transform_7(%arg0: i32, %arg1: i32) -> (i32, i32, i32) {
    %c0_i32 = arith.constant 0 : i32
    %c0_i32_0 = arith.constant 0 : i32
    %c0_i32_1 = arith.constant 0 : i32
    return %arg1, %c0_i32, %c0_i32_0 : i32, i32, i32
  }
  func.func @transform_8(%arg0: i32, %arg1: i32) -> (i32, i32, i32) {
    %c0_i32 = arith.constant 0 : i32
    %c0_i32_0 = arith.constant 0 : i32
    %c0_i32_1 = arith.constant 0 : i32
    return %arg1, %c0_i32, %c0_i32_0 : i32, i32, i32
  }
  func.func @transform_9(%arg0: i32, %arg1: i32) -> (i32, i32, i32) {
    %c0_i32 = arith.constant 0 : i32
    %c0_i32_0 = arith.constant 0 : i32
    %c0_i32_1 = arith.constant 0 : i32
    return %arg1, %c0_i32, %c0_i32_0 : i32, i32, i32
  }
  func.func @transform_10(%arg0: i32, %arg1: i32) -> (i32, i32, i32) {
    %c0_i32 = arith.constant 0 : i32
    %c0_i32_0 = arith.constant 0 : i32
    %c0_i32_1 = arith.constant 0 : i32
    return %arg1, %c0_i32, %c0_i32_0 : i32, i32, i32
  }
  func.func @transform_11(%arg0: i32, %arg1: i32) -> (i32, i32, i32) {
    %c0_i32 = arith.constant 0 : i32
    %c0_i32_0 = arith.constant 0 : i32
    %c0_i32_1 = arith.constant 0 : i32
    return %arg1, %c0_i32, %c0_i32_0 : i32, i32, i32
  }
  func.func @transform_12(%arg0: i32, %arg1: i32) -> (i32, i32) {
    %c0_i32 = arith.constant 0 : i32
    %c0_i32_0 = arith.constant 0 : i32
    %c0_i32_1 = arith.constant 0 : i32
    return %c0_i32, %c0_i32_0 : i32, i32
  }
  func.func @transform_13(%arg0: i32, %arg1: i32) -> (i32, i32) {
    %c0_i32 = arith.constant 0 : i32
    %c0_i32_0 = arith.constant 0 : i32
    %c0_i32_1 = arith.constant 0 : i32
    return %c0_i32, %c0_i32_0 : i32, i32
  }
  func.func @transform_14(%arg0: i32, %arg1: i32) -> (i32, i32, i32) {
    %c0_i32 = arith.constant 0 : i32
    %c0_i32_0 = arith.constant 0 : i32
    %c0_i32_1 = arith.constant 0 : i32
    return %arg0, %c0_i32, %c0_i32_0 : i32, i32, i32
  }
}

</mosaic_0001>

<bundles_post_ra>
// kernel: tpu_custom_call.1
= control target key start
LH: loop header
LB: loop body
LE: loop exit
PB: predicated region body
PF: predicated region fallthrough
CT: control target
= control target key end

     0   :  { %s15057_s0 = inlined_call_operand.hbm [shape: f32[1,16,648], index: 0, kind: input, shape index: {}]   ;;  %s15058_s1 = inlined_call_operand.hbm [shape: f32[1,648], index: 1, kind: input, shape index: {}]   ;;  %s15059_s2 = inlined_call_operand.hbm [shape: f32[2,648], index: 2, kind: input, shape index: {}]   ;;  %s15060_s3 = inlined_call_operand.hbm [shape: f32[648,2], index: 3, kind: input, shape index: {}]   ;;  %s15061_s4 = inlined_call_operand.hbm [shape: f32[2,144,16], index: 4, kind: input, shape index: {}]   ;;  %s15062_s5 = inlined_call_operand.hbm [shape: f32[2,16,1], index: 5, kind: input, shape index: {}]   ;;  %s15063_s6 = inlined_call_operand.hbm [shape: f32[2,144,16], index: 6, kind: input, shape index: {}]   ;;  %s15064_s7 = inlined_call_operand.hbm [shape: f32[2,16,1], index: 7, kind: input, shape index: {}]   ;;  %s15065_s8 = inlined_call_operand.hbm [shape: f32[2,4,16], index: 8, kind: input, shape index: {}]   ;;  %s15066_s9 = inlined_call_operand.hbm [shape: f32[2,4,1], index: 9, kind: input, shape index: {}]   ;;  %s15067_s10 = inlined_call_operand.hbm [shape: f32[2,16,4], index: 10, kind: input, shape index: {}]   ;;  %s15068_s11 = inlined_call_operand.hbm [shape: f32[2,16,1], index: 11, kind: input, shape index: {}]   ;;  %s15069_s12 = inlined_call_operand.hbm [shape: f32[144,16], index: 12, kind: input, shape index: {}]   ;;  %s15070_s13 = inlined_call_operand.hbm [shape: f32[16,1], index: 13, kind: input, shape index: {}]   ;;  %s15071_s14 = inlined_call_operand.hbm [shape: f32[1,16,648], index: 14, kind: output, shape index: {}]  }
   0x1   :  { %15105 = sst [smem:[#allocation39_spill]] %s15057_s0 }
   0x2   :  { %15106 = sst [smem:[#allocation40_spill]] %s15058_s1 }
   0x3   :  { %15107 = sst [smem:[#allocation41_spill]] %s15061_s4 }
   0x4   :  { %15108 = sst [smem:[#allocation42_spill]] %s15062_s5 }
   0x5   :  { %15109 = sst [smem:[#allocation43_spill]] %s15063_s6 }
   0x6   :  { %15110 = sst [smem:[#allocation44_spill]] %s15064_s7 }
   0x7   :  { %15111 = sst [smem:[#allocation45_spill]] %s15070_s13 }
   0x8   :  { %15112 = sst [smem:[#allocation46_spill]] %s15071_s14 }
   0x9   :  { %19 = vsyncpa [#allocation5], 0 }
   0xa   :  { %20 = vsyncpa [#allocation8], 0 }
   0xb   :  { %21 = vsyncpa [#allocation11], 0 }
   0xc   :  { %22 = vsyncpa [#allocation6], 0  ;;  %s12787_s29 = smov 0   ;;  %s12789_s30 = smov 0  }
   0xd   :  { %s12791_s15 = smov 0   ;;  %s12793_s16 = smov 0  }
   0xe   :  { %s12795_s17 = smov 0   ;;  %s12797_s18 = smov 0  }
   0xf LB: > { %15113 = sst [smem:[#allocation30_spill]] %s12649_s30  ;;  %s12818_s19 = sadd.s32 4294967295, %s12665_s18   ;;  %s12665_s18 = sphi %s12797_s18, %s28_s18   ;;  %s12661_s17 = sphi %s12795_s17, %s15178_s17   ;;  %s12657_s16 = sphi %s12793_s16, %s15177_s16   ;;  %s12653_s15 = sphi %s12791_s15, %s15175_s15   ;;  %s12649_s30 = sphi %s12789_s30, %s15174_s30   ;;  %s12645_s29 = sphi %s12787_s29, %s15173_s29  }
  0x10   : > { %15114 = sst [smem:[#allocation31_spill]] %s12653_s15  ;;  %p10185_p0 = scmp.ge.s32.totalorder %s12665_s18, 1 }
  0x11   : > { %15115 = sst [smem:[#allocation32_spill]] %s12657_s16  ;;  %p15073_p1 = scmp.eq.s32.totalorder %s12818_s19, 0 }
  0x12   : > { %15116 = sst [smem:[#allocation33_spill]] %s12665_s18  ;;  %p410_p2 = scmp.lt.s32.totalorder %s12665_s18, 3 }
  0x13   : > { %15117 = sst [smem:[#allocation34_spill]] %s12818_s19  ;;  %s12667_s21 = smov [#allocation4]  }
  0x14   : > { %p12823_p3 = pnand %p10185_p0, %p410_p2  ;;  %s425_s22 = sshll.u32 %s12667_s21, 4  ;;  %s426_s22 = int_to_ptr.vmem [resolvable:$true] %s425_s22 }
  0x15   : > { %s15121_s0 = sld [smem:[#allocation39_spill]] }
  0x16   : > { %s15118_s20 = scalar_select %p12823_p3, 1, 0 }
  0x17   : > { %p11265_p4 = pneg %p12823_p3 }
  0x18   : > { %15119 = sst [smem:[#allocation35_spill]] %s15118_s20 }
  0x19   : > { %p12831_p5 = pnand %p11265_p4, %p15073_p1 }
  0x1b   : > { %s15120_s23 = scalar_select %p12831_p5, 1, 0 }
  0x1c   : > { %s12157_s26 = scalar_lea.hbm %s15121_s0, 1536  ;;  %p12843_p7 = pneg %p12831_p5 }
  0x1d   : > { %p12158_p6 = scmp.ne.s32.totalorder %s15121_s0, %s12157_s26  ;;  %p12164_p10 = scmp.lt.u32.totalorder %s12157_s26, %s15121_s0 }
  0x1e   : > { %s15122_s21 = scalar_select %p12843_p7, 1, 0 }
  0x1f   : > { %p12160_p8 = pnand %p12843_p7, %p12158_p6 }
  0x21   : > { %p12161_p9 = pneg %p12160_p8 }
  0x23   : > { %p12166_p11 = pnand %p12164_p10, %p12161_p9 }
  0x25   : > { %12169 = shalt.err (!%p12166_p11)
}
  0x26   : > { %s12170_s24 = scalar_lea.vmem %s426_s22, 1536  ;;  %p12178_p2 = scmp.lt.s32.totalorder %s426_s22, %s426_s22 }
  0x27   : > { %p12171_p12 = scmp.ne.s32.totalorder %s426_s22, %s12170_s24  ;;  %p12179_p4 = scmp.lt.s32.totalorder %s12170_s24, %s12170_s24 }
  0x29   : > { %p12173_p13 = pnand %p12171_p12, %p12843_p7  ;;  %p12180_p1 = por %p12179_p4, %p12178_p2 }
  0x2b   : > { %p12174_p0 = pneg %p12173_p13 }
  0x2d   : > { %p12181_p3 = pnand %p12180_p1, %p12174_p0 }
  0x2f   : > { %12184 = shalt.err (!%p12181_p3)
}
  0x30   : > { %s12668_s25 = smov 768   ;;  %s12669_s14 = smov 48  }
  0x31   : > { %11268 = dma.hbm_to_vmem [thread:$0]  (!%p12831_p5), %s15121_s0, 1536, %s426_s22, [#allocation5], %s12668_s25, %s12668_s25, %s12669_s14  }
  0x32   : > { %s37_s27 = sadd.s32 1, %s12661_s17  ;;  %s136_s28 = sadd.s32 1, %s12653_s15 }
  0x33   : > { %p38_p1 = scmp.ge.s32.totalorder %s37_s27, 2  ;;  %p143_p3 = scmp.ne.s32.totalorder %s12653_s15, %s12649_s30 }
  0x34   : > { %p144_p6 = scmp.eq.s32.totalorder %s12665_s18, 0  ;;  %p149_p9 = scmp.ne.s32.totalorder %s12649_s30, %s12645_s29 }
  0x35   : > { %s15180_s27 = smov (%p38_p1, %s37_s27), 0  ;;  %p15124_p11 = scmp.eq.s32.totalorder %s12818_s19, 0 }
  0x36   : > { %15123 = sst [smem:[#allocation36_spill]] %s15180_s27  ;;  %p145_p8 = por %p144_p6, %p143_p3 }
  0x37   : > { %s133_s24 = ssub.s32 %s12661_s17, %s15180_s27  ;;  %p12872_p12 = por %p15124_p11, %p149_p9 }
  0x38   : > { %p134_p10 = scmp.eq.s32.totalorder %s133_s24, 0  ;;  %p11315_p13 = scmp.lt.s32.totalorder %s12665_s18, 2 }
  0x39   : > { %s15125_s20 = scalar_select %p12872_p12, 1, 0 }
  0x3a   : > { %s12878_s22 = scalar_select %p134_p10, %s12653_s15, %s136_s28  }
  0x3b   : > { %15126 = sst [smem:[#allocation37_spill]] %s15125_s20  ;;  %s500_s25 = sand.u32 1, %s12665_s18  }
  0x3c   : > { %15127 = sst [smem:[#allocation38_spill]] %s12878_s22  ;;  %s12882_s14 = sand.u32 1, %s12653_s15  }
  0x3d   : > { %s15082_s16 = smul.u32 144, %s12882_s14  ;;  %p12886_p0 = pnand %p11315_p13, %p145_p8 }
  0x3e   : > { %s15083_s26 = smul.u32 2304, %s12661_s17  ;;  %s12891_s24 = sshll.u32 %s12882_s14, 4 }
  0x3f   : > { %s15128_s29 = scalar_select %p12886_p0, 1, 0 }
  0x40   : > { %s15129_s4 = sld [smem:[#allocation41_spill]]  ;;  %s504_s22 = scalar_lea.vmem [#allocation12], %s15082_s16 }
  0x41   : > { %s511_s15 = sshll.u32 %s504_s22, 4  ;;  %s12904_s18 = scalar_lea.sflag [#allocation5], %s500_s25  ;;  %s12902_s15 = int_to_ptr.vmem [resolvable:$true] %s511_s15 }
  0x42   : > { %p12910_p4 = pneg %p12886_p0 }
  0x44   : > { %s15130_s30 = scalar_select %p12910_p4, 1, 0 }
  0x46   : > { %s12898_s28 = scalar_lea.hbm %s15129_s4, %s15083_s26  ;;  %s12190_s16 = scalar_lea.hbm %s15129_s4, 4608 }
  0x47   : > { %s12185_s20 = scalar_lea.hbm %s12898_s28, 2304  ;;  %p12191_p6 = scmp.lt.u32.totalorder %s12898_s28, %s15129_s4 }
  0x48   : > { %p12186_p2 = scmp.ne.s32.totalorder %s12898_s28, %s12185_s20  ;;  %p12192_p8 = scmp.lt.u32.totalorder %s12190_s16, %s12185_s20 }
  0x49   : > { %p12194_p10 = scmp.lt.u32.totalorder %s12185_s20, %s12898_s28 }
  0x4a   : > { %p12188_p1 = pnand %p12910_p4, %p12186_p2  ;;  %p12193_p9 = por %p12192_p8, %p12191_p6 }
  0x4c   : > { %p12189_p3 = pneg %p12188_p1  ;;  %p12195_p11 = por %p12194_p10, %p12193_p9 }
  0x4e   : > { %p12196_p13 = pnand %p12195_p11, %p12189_p3 }
  0x50   : > { %12199 = shalt.err (!%p12196_p13)
}
  0x51   : > { %s12200_s25 = scalar_lea.vmem %s12902_s15, 2304  ;;  %s12670_s0 = smov [#allocation12]  }
  0x52   : > { %p12201_p2 = scmp.ne.s32.totalorder %s12902_s15, %s12200_s25  ;;  %s12205_s27 = sshll.u32 %s12670_s0, 4  ;;  %s12206_s27 = int_to_ptr.vmem [resolvable:$false] %s12205_s27 }
  0x53   : > { %s12207_s26 = scalar_lea.vmem %s12206_s27, 4608  ;;  %p12208_p5 = scmp.lt.s32.totalorder %s12902_s15, %s12206_s27 }
  0x54   : > { %p12203_p1 = pnand %p12201_p2, %p12910_p4  ;;  %p12209_p7 = scmp.lt.s32.totalorder %s12207_s26, %s12200_s25 }
  0x56   : > { %p12204_p12 = pneg %p12203_p1  ;;  %p12210_p6 = por %p12209_p7, %p12208_p5 }
  0x58   : > { %p12211_p8 = pnand %p12210_p6, %p12204_p12 }
  0x5a   : > { %12214 = shalt.err (!%p12211_p8)
}
  0x5b   : > { %s15092_s20 = smov 128   ;;  %s15095_s16 = smov 8  }
  0x5c   : > { %11287 = dma.hbm_to_vmem [thread:$0]  (!%p12886_p0), %s12898_s28, 2304, %s12902_s15, %s12904_s18, %s15092_s20, %s15092_s20, %s15095_s16  }
  0x5d   : > { %s12938_s22 = sshll.u32 %s12661_s17, 8  ;;  %s15131_s5 = sld [smem:[#allocation42_spill]] }
  0x5e   : > { %s525_s26 = scalar_lea.vmem [#allocation13], %s12891_s24 }
  0x5f   : > { %s532_s4 = sshll.u32 %s525_s26, 4  ;;  %s12947_s4 = int_to_ptr.vmem [resolvable:$true] %s532_s4 }
  0x63   : > { %s12944_s27 = scalar_lea.hbm %s15131_s5, %s12938_s22  ;;  %s12220_s20 = scalar_lea.hbm %s15131_s5, 512 }
  0x64   : > { %s12215_s19 = scalar_lea.hbm %s12944_s27, 256  ;;  %p12221_p3 = scmp.lt.u32.totalorder %s12944_s27, %s15131_s5 }
  0x65   : > { %p12216_p5 = scmp.ne.s32.totalorder %s12944_s27, %s12215_s19  ;;  %p12222_p9 = scmp.lt.u32.totalorder %s12220_s20, %s12215_s19 }
  0x66   : > { %p12224_p11 = scmp.lt.u32.totalorder %s12215_s19, %s12944_s27 }
  0x67   : > { %p12218_p7 = pnand %p12216_p5, %p12910_p4  ;;  %p12223_p10 = por %p12222_p9, %p12221_p3 }
  0x69   : > { %p12219_p12 = pneg %p12218_p7  ;;  %p12225_p13 = por %p12224_p11, %p12223_p10 }
  0x6b   : > { %p12226_p2 = pnand %p12225_p13, %p12219_p12 }
  0x6d   : > { %12229 = shalt.err (!%p12226_p2)
}
  0x6e   : > { %s12230_s26 = scalar_lea.vmem %s12947_s4, 256  ;;  %s12673_s15 = smov [#allocation13]  }
  0x6f   : > { %p12231_p1 = scmp.ne.s32.totalorder %s12947_s4, %s12230_s26  ;;  %s12235_s28 = sshll.u32 %s12673_s15, 4  ;;  %s12236_s28 = int_to_ptr.vmem [resolvable:$false] %s12235_s28 }
  0x70   : > { %s12237_s25 = scalar_lea.vmem %s12236_s28, 512  ;;  %p12238_p5 = scmp.lt.s32.totalorder %s12947_s4, %s12236_s28 }
  0x71   : > { %p12233_p6 = pnand %p12231_p1, %p12910_p4  ;;  %p12239_p7 = scmp.lt.s32.totalorder %s12237_s25, %s12230_s26 }
  0x73   : > { %p12234_p8 = pneg %p12233_p6  ;;  %p12240_p3 = por %p12239_p7, %p12238_p5 }
  0x75   : > { %p12241_p9 = pnand %p12240_p3, %p12234_p8 }
  0x77   : > { %12244 = shalt.err (!%p12241_p9)
}
  0x78   : > { %s15132_s19 = smov 128   ;;  %s15133_s20 = smul.u32 2304, %s12661_s17 }
  0x79   : > { %11290 = dma.hbm_to_vmem [thread:$0]  (!%p12886_p0), %s12944_s27, 256, %s12947_s4, %s12904_s18, %s15132_s19, %s15132_s19, %s15095_s16  }
  0x7a   : > { %s15134_s6 = sld [smem:[#allocation43_spill]]  ;;  %s15135_s28 = smul.u32 144, %s12882_s14 }
  0x7c   : > { %s546_s25 = scalar_lea.vmem [#allocation14], %s15135_s28 }
  0x7d   : > { %s553_s5 = sshll.u32 %s546_s25, 4  ;;  %s12983_s5 = int_to_ptr.vmem [resolvable:$true] %s553_s5 }
  0x80   : > { %s12979_s26 = scalar_lea.hbm %s15134_s6, %s15133_s20  ;;  %s12250_s0 = scalar_lea.hbm %s15134_s6, 4608 }
  0x81   : > { %s12245_s13 = scalar_lea.hbm %s12979_s26, 2304  ;;  %p12251_p13 = scmp.lt.u32.totalorder %s12979_s26, %s15134_s6 }
  0x82   : > { %p12246_p12 = scmp.ne.s32.totalorder %s12979_s26, %s12245_s13  ;;  %p12252_p2 = scmp.lt.u32.totalorder %s12250_s0, %s12245_s13 }
  0x83   : > { %p12254_p6 = scmp.lt.u32.totalorder %s12245_s13, %s12979_s26 }
  0x84   : > { %p12248_p10 = pnand %p12246_p12, %p12910_p4  ;;  %p12253_p1 = por %p12252_p2, %p12251_p13 }
  0x86   : > { %p12249_p11 = pneg %p12248_p10  ;;  %p12255_p8 = por %p12254_p6, %p12253_p1 }
  0x88   : > { %p12256_p5 = pnand %p12255_p8, %p12249_p11 }
  0x8a   : > { %12259 = shalt.err (!%p12256_p5)
}
  0x8b   : > { %s12260_s28 = scalar_lea.vmem %s12983_s5, 2304  ;;  %s12674_s25 = smov [#allocation14]  }
  0x8c   : > { %p12261_p7 = scmp.ne.s32.totalorder %s12983_s5, %s12260_s28  ;;  %s12265_s4 = sshll.u32 %s12674_s25, 4  ;;  %s12266_s4 = int_to_ptr.vmem [resolvable:$false] %s12265_s4 }
  0x8d   : > { %s12267_s27 = scalar_lea.vmem %s12266_s4, 4608  ;;  %p12268_p12 = scmp.lt.s32.totalorder %s12983_s5, %s12266_s4 }
  0x8e   : > { %p12263_p3 = pnand %p12261_p7, %p12910_p4  ;;  %p12269_p10 = scmp.lt.s32.totalorder %s12267_s27, %s12260_s28 }
  0x90   : > { %p12264_p9 = pneg %p12263_p3  ;;  %p12270_p13 = por %p12269_p10, %p12268_p12 }
  0x92   : > { %p12271_p2 = pnand %p12270_p13, %p12264_p9 }
  0x94   : > { %12274 = shalt.err (!%p12271_p2)
}
  0x95   : > { %11293 = dma.hbm_to_vmem [thread:$0]  (!%p12886_p0), %s12979_s26, 2304, %s12983_s5, %s12904_s18, %s15132_s19, %s15132_s19, %s15095_s16  }
  0x96   : > { %s15136_s7 = sld [smem:[#allocation44_spill]]  ;;  %s567_s15 = scalar_lea.vmem [#allocation15], %s12891_s24 }
  0x97   : > { %s574_s28 = sshll.u32 %s567_s15, 4  ;;  %s15097_s25 = sshll.u32 %s12882_s14, 2  ;;  %s13017_s28 = int_to_ptr.vmem [resolvable:$true] %s574_s28 }
  0x9c   : > { %s13014_s20 = scalar_lea.hbm %s15136_s7, %s12938_s22  ;;  %s12280_s27 = scalar_lea.hbm %s15136_s7, 512 }
  0x9d   : > { %s12275_s4 = scalar_lea.hbm %s13014_s20, 256  ;;  %p12281_p8 = scmp.lt.u32.totalorder %s13014_s20, %s15136_s7 }
  0x9e   : > { %p12276_p11 = scmp.ne.s32.totalorder %s13014_s20, %s12275_s4  ;;  %p12282_p5 = scmp.lt.u32.totalorder %s12280_s27, %s12275_s4 }
  0x9f   : > { %p12284_p3 = scmp.lt.u32.totalorder %s12275_s4, %s13014_s20 }
  0xa0   : > { %p12278_p1 = pnand %p12276_p11, %p12910_p4  ;;  %p12283_p7 = por %p12282_p5, %p12281_p8 }
  0xa2   : > { %p12279_p6 = pneg %p12278_p1  ;;  %p12285_p9 = por %p12284_p3, %p12283_p7 }
  0xa4   : > { %p12286_p12 = pnand %p12285_p9, %p12279_p6 }
  0xa6   : > { %12289 = shalt.err (!%p12286_p12)
}
  0xa7   : > { %s12290_s15 = scalar_lea.vmem %s13017_s28, 256  ;;  %s12675_s5 = smov [#allocation15]  }
  0xa8   : > { %p12291_p10 = scmp.ne.s32.totalorder %s13017_s28, %s12290_s15  ;;  %s12295_s26 = sshll.u32 %s12675_s5, 4  ;;  %s12296_s26 = int_to_ptr.vmem [resolvable:$false] %s12295_s26 }
  0xa9   : > { %s12297_s13 = scalar_lea.vmem %s12296_s26, 512  ;;  %p12298_p11 = scmp.lt.s32.totalorder %s13017_s28, %s12296_s26 }
  0xaa   : > { %p12293_p13 = pnand %p12291_p10, %p12910_p4  ;;  %p12299_p1 = scmp.lt.s32.totalorder %s12297_s13, %s12290_s15 }
  0xac   : > { %p12294_p2 = pneg %p12293_p13  ;;  %p12300_p8 = por %p12299_p1, %p12298_p11 }
  0xae   : > { %p12301_p5 = pnand %p12300_p8, %p12294_p2 }
  0xb0   : > { %12304 = shalt.err (!%p12301_p5)
}
  0xb1   : > { %11296 = dma.hbm_to_vmem [thread:$0]  (!%p12886_p0), %s13014_s20, 256, %s13017_s28, %s12904_s18, %s15132_s19, %s15132_s19, %s15095_s16  }
  0xb2   : > { %s15098_s4 = sshll.u32 %s12661_s17, 6  ;;  %s588_s5 = scalar_lea.vmem [#allocation16], %s15097_s25 }
  0xb3   : > { %s13051_s15 = scalar_lea.hbm %s15065_s8, %s15098_s4  ;;  %s595_s26 = sshll.u32 %s588_s5, 4  ;;  %s596_s26 = int_to_ptr.vmem [resolvable:$true] %s595_s26 }
  0xb4   : > { %s12305_s13 = scalar_lea.hbm %s13051_s15, 64  ;;  %s12310_s16 = scalar_lea.hbm %s15065_s8, 128 }
  0xb5   : > { %p12306_p6 = scmp.ne.s32.totalorder %s13051_s15, %s12305_s13  ;;  %p12311_p9 = scmp.lt.u32.totalorder %s13051_s15, %s15065_s8 }
  0xb6   : > { %p12312_p12 = scmp.lt.u32.totalorder %s12310_s16, %s12305_s13  ;;  %p12314_p13 = scmp.lt.u32.totalorder %s12305_s13, %s13051_s15 }
  0xb7   : > { %p12308_p7 = pnand %p12306_p6, %p12910_p4 }
  0xb8   : > { %p12313_p10 = por %p12312_p12, %p12311_p9 }
  0xb9   : > { %p12309_p3 = pneg %p12308_p7 }
  0xba   : > { %p12315_p2 = por %p12314_p13, %p12313_p10 }
  0xbc   : > { %p12316_p11 = pnand %p12315_p2, %p12309_p3 }
  0xbe   : > { %12319 = shalt.err (!%p12316_p11)
}
  0xbf   : > { %s12320_s5 = scalar_lea.vmem %s596_s26, 64  ;;  %s12676_s25 = smov [#allocation16]  }
  0xc0   : > { %p12321_p1 = scmp.ne.s32.totalorder %s596_s26, %s12320_s5  ;;  %s12325_s4 = sshll.u32 %s12676_s25, 4  ;;  %s12326_s4 = int_to_ptr.vmem [resolvable:$false] %s12325_s4 }
  0xc1   : > { %s12327_s20 = scalar_lea.vmem %s12326_s4, 128  ;;  %p12328_p6 = scmp.lt.s32.totalorder %s596_s26, %s12326_s4 }
  0xc2   : > { %p12323_p8 = pnand %p12321_p1, %p12910_p4  ;;  %p12329_p7 = scmp.lt.s32.totalorder %s12327_s20, %s12320_s5 }
  0xc4   : > { %p12324_p5 = pneg %p12323_p8  ;;  %p12330_p0 = por %p12329_p7, %p12328_p6 }
  0xc6   : > { %p12331_p9 = pnand %p12330_p0, %p12324_p5 }
  0xc8   : > { %12334 = shalt.err (!%p12331_p9)
}
  0xc9   : > { %p15137_p12 = scmp.ne.s32.totalorder %s15128_s29, 0  ;;  %s12677_s16 = smov [#allocation7]  }
  0xca   : > { %s439_s13 = sshll.u32 %s12677_s16, 4  ;;  %s15138_s28 = sshll.u32 %s12661_s17, 6  ;;  %s440_s13 = int_to_ptr.vmem [resolvable:$true] %s439_s13 }
  0xcb   : > { %11299 = dma.hbm_to_vmem [thread:$0]  (!%p15137_p12), %s13051_s15, 64, %s596_s26, %s12904_s18  }
  0xcc   : > { %s13078_s0 = scalar_lea.hbm %s15066_s9, %s15138_s28  ;;  %s15139_s1 = sld [smem:[#allocation40_spill]] }
  0xcd   : > { %p15140_p3 = scmp.ne.s32.totalorder %s15122_s21, 0 }
  0xd2   : > { %s12335_s20 = scalar_lea.hbm %s15139_s1, 96 }
  0xd3   : > { %p12336_p0 = scmp.ne.s32.totalorder %s15139_s1, %s12335_s20  ;;  %p12342_p2 = scmp.lt.u32.totalorder %s12335_s20, %s15139_s1 }
  0xd5   : > { %p12338_p10 = pnand %p12336_p0, %p15140_p3 }
  0xd7   : > { %p12339_p13 = pneg %p12338_p10 }
  0xd9   : > { %p12344_p11 = pnand %p12342_p2, %p12339_p13 }
  0xdb   : > { %12347 = shalt.err (!%p12344_p11)
}
  0xdc   : > { %s12348_s16 = scalar_lea.vmem %s440_s13, 96  ;;  %p12356_p6 = scmp.lt.s32.totalorder %s440_s13, %s440_s13 }
  0xdd   : > { %p12349_p1 = scmp.ne.s32.totalorder %s440_s13, %s12348_s16  ;;  %p12357_p7 = scmp.lt.s32.totalorder %s12348_s16, %s12348_s16 }
  0xdf   : > { %p12351_p8 = pnand %p12349_p1, %p15140_p3  ;;  %p12358_p9 = por %p12357_p7, %p12356_p6 }
  0xe1   : > { %p12352_p5 = pneg %p12351_p8 }
  0xe3   : > { %p12359_p12 = pnand %p12358_p9, %p12352_p5 }
  0xe5   : > { %12362 = shalt.err (!%p12359_p12)
}
  0xe6   : > { %p15141_p0 = scmp.ne.s32.totalorder %s15120_s23, 0  ;;  %s15142_s28 = sshll.u32 %s12882_s14, 2 }
  0xe7   : > { %s606_s27 = scalar_lea.vmem [#allocation17], %s15142_s28  ;;  %s12678_s4 = smov [#allocation9]  }
  0xe8   : > { %11271 = dma.hbm_to_vmem [thread:$0]  (!%p15141_p0), %s15139_s1, 96, %s440_s13, [#allocation8]  }
  0xe9   : > { %s613_s25 = sshll.u32 %s606_s27, 4  ;;  %s450_s5 = sshll.u32 %s12678_s4, 4  ;;  %s13100_s25 = int_to_ptr.vmem [resolvable:$true] %s613_s25  ;;  %s451_s5 = int_to_ptr.vmem [resolvable:$true] %s450_s5 }
  0xea   : > { %s12363_s20 = scalar_lea.hbm %s13078_s0, 64  ;;  %s12368_s16 = scalar_lea.hbm %s15066_s9, 128 }
  0xeb   : > { %p12364_p12 = scmp.ne.s32.totalorder %s13078_s0, %s12363_s20  ;;  %p12369_p2 = scmp.lt.u32.totalorder %s13078_s0, %s15066_s9 }
  0xec   : > { %p12370_p11 = scmp.lt.u32.totalorder %s12368_s16, %s12363_s20  ;;  %p12372_p8 = scmp.lt.u32.totalorder %s12363_s20, %s13078_s0 }
  0xed   : > { %p12366_p10 = pnand %p12364_p12, %p12910_p4 }
  0xee   : > { %p12371_p1 = por %p12370_p11, %p12369_p2 }
  0xef   : > { %p12367_p13 = pneg %p12366_p10 }
  0xf0   : > { %p12373_p5 = por %p12372_p8, %p12371_p1 }
  0xf2   : > { %p12374_p6 = pnand %p12373_p5, %p12367_p13 }
  0xf4   : > { %12377 = shalt.err (!%p12374_p6)
}
  0xf5   : > { %s12378_s14 = scalar_lea.vmem %s13100_s25, 64  ;;  %s12679_s13 = smov [#allocation17]  }
  0xf6   : > { %p12379_p7 = scmp.ne.s32.totalorder %s13100_s25, %s12378_s14  ;;  %s12383_s28 = sshll.u32 %s12679_s13, 4  ;;  %s12384_s28 = int_to_ptr.vmem [resolvable:$false] %s12383_s28 }
  0xf7   : > { %s12385_s27 = scalar_lea.vmem %s12384_s28, 128  ;;  %p12386_p10 = scmp.lt.s32.totalorder %s13100_s25, %s12384_s28 }
  0xf8   : > { %p12381_p9 = pnand %p12379_p7, %p12910_p4  ;;  %p12387_p0 = scmp.lt.s32.totalorder %s12385_s27, %s12378_s14 }
  0xfa   : > { %p12382_p12 = pneg %p12381_p9  ;;  %p12388_p2 = por %p12387_p0, %p12386_p10 }
  0xfc   : > { %p12389_p11 = pnand %p12388_p2, %p12382_p12 }
  0xfe   : > { %12392 = shalt.err (!%p12389_p11)
}
  0xff   : > { %p15143_p13 = scmp.ne.s32.totalorder %s15128_s29, 0  ;;  %s12393_s15 = scalar_lea.hbm %s15059_s2, 192 }
 0x100   : > { %p12394_p1 = scmp.ne.s32.totalorder %s15059_s2, %s12393_s15  ;;  %p12400_p5 = scmp.lt.u32.totalorder %s12393_s15, %s15059_s2 }
 0x101   : > { %11302 = dma.hbm_to_vmem [thread:$0]  (!%p15143_p13), %s13078_s0, 64, %s13100_s25, %s12904_s18  }
 0x102   : > { %p12396_p0 = pnand %p12394_p1, %p15140_p3 }
 0x104   : > { %p12397_p8 = pneg %p12396_p0 }
 0x106   : > { %p12402_p6 = pnand %p12400_p5, %p12397_p8 }
 0x108   : > { %12405 = shalt.err (!%p12402_p6)
}
 0x109   : > { %s12406_s14 = scalar_lea.vmem %s451_s5, 192  ;;  %p12414_p10 = scmp.lt.s32.totalorder %s451_s5, %s451_s5 }
 0x10a   : > { %p12407_p7 = scmp.ne.s32.totalorder %s451_s5, %s12406_s14  ;;  %p12415_p2 = scmp.lt.s32.totalorder %s12406_s14, %s12406_s14 }
 0x10c   : > { %p12409_p9 = pnand %p12407_p7, %p15140_p3  ;;  %p12416_p11 = por %p12415_p2, %p12414_p10 }
 0x10e   : > { %p12410_p12 = pneg %p12409_p9 }
 0x110   : > { %p12417_p13 = pnand %p12416_p11, %p12410_p12 }
 0x112   : > { %12420 = shalt.err (!%p12417_p13)
}
 0x113   : > { %p15144_p1 = scmp.ne.s32.totalorder %s15120_s23, 0  ;;  %s12680_s13 = smov [#allocation10]  }
 0x114   : > { %s460_s28 = sshll.u32 %s12680_s13, 4  ;;  %s13146_s20 = scalar_lea.hbm %s15067_s10, %s12938_s22  ;;  %s461_s28 = int_to_ptr.vmem [resolvable:$true] %s460_s28 }
 0x115   : > { %11274 = dma.hbm_to_vmem [thread:$0]  (!%p15144_p1), %s15059_s2, 192, %s451_s5, [#allocation8]  }
 0x116   : > { %s12421_s16 = scalar_lea.hbm %s15060_s3, 10368 }
 0x117   : > { %p12422_p13 = scmp.ne.s32.totalorder %s15060_s3, %s12421_s16  ;;  %p12428_p5 = scmp.lt.u32.totalorder %s12421_s16, %s15060_s3 }
 0x119   : > { %p12424_p0 = pnand %p12422_p13, %p15140_p3 }
 0x11b   : > { %p12425_p8 = pneg %p12424_p0 }
 0x11d   : > { %p12430_p6 = pnand %p12428_p5, %p12425_p8 }
 0x11f   : > { %12433 = shalt.err (!%p12430_p6)
}
 0x120   : > { %s12434_s0 = scalar_lea.vmem %s461_s28, 10368  ;;  %p12442_p10 = scmp.lt.s32.totalorder %s461_s28, %s461_s28 }
 0x121   : > { %p12435_p7 = scmp.ne.s32.totalorder %s461_s28, %s12434_s0  ;;  %p12443_p2 = scmp.lt.s32.totalorder %s12434_s0, %s12434_s0 }
 0x123   : > { %p12437_p9 = pnand %p12435_p7, %p15140_p3  ;;  %p12444_p11 = por %p12443_p2, %p12442_p10 }
 0x125   : > { %p12438_p12 = pneg %p12437_p9 }
 0x127   : > { %p12445_p4 = pnand %p12444_p11, %p12438_p12 }
 0x129   : > { %12448 = shalt.err (!%p12445_p4)
}
 0x12a   : > { %s15145_s25 = smov 8   ;;  %s624_s4 = scalar_lea.vmem [#allocation18], %s12891_s24 }
 0x12b   : > { %11277 = dma.hbm_to_vmem [thread:$0]  (!%p15144_p1), %s15060_s3, 10368, %s461_s28, [#allocation11], %s15132_s19, %s15132_s19, %s15145_s25  }
 0x12c   : > { %s631_s15 = sshll.u32 %s624_s4, 4  ;;  %s12681_s26 = smov [#allocation20]   ;;  %s13170_s15 = int_to_ptr.vmem [resolvable:$true] %s631_s15 }
 0x12d   : > { %s13172_s16 = sshll.u32 %s12681_s26, 4  ;;  %s12449_s6 = scalar_lea.hbm %s13146_s20, 256  ;;  %s474_s16 = int_to_ptr.vmem [resolvable:$true] %s13172_s16 }
 0x12e   : > { %p12450_p4 = scmp.ne.s32.totalorder %s13146_s20, %s12449_s6  ;;  %p15146_p13 = scmp.ne.s32.totalorder %s15130_s30, 0 }
 0x12f   : > { %s12454_s14 = scalar_lea.hbm %s15067_s10, 512  ;;  %p12455_p5 = scmp.lt.u32.totalorder %s13146_s20, %s15067_s10 }
 0x130   : > { %p12452_p0 = pnand %p12450_p4, %p15146_p13  ;;  %p12456_p6 = scmp.lt.u32.totalorder %s12454_s14, %s12449_s6 }
 0x131   : > { %p12458_p9 = scmp.lt.u32.totalorder %s12449_s6, %s13146_s20 }
 0x132   : > { %p12453_p8 = pneg %p12452_p0  ;;  %p12457_p7 = por %p12456_p6, %p12455_p5 }
 0x134   : > { %p12459_p12 = por %p12458_p9, %p12457_p7 }
 0x136   : > { %p12460_p10 = pnand %p12459_p12, %p12453_p8 }
 0x138   : > { %12463 = shalt.err (!%p12460_p10)
}
 0x139   : > { %s12464_s28 = scalar_lea.vmem %s13170_s15, 256  ;;  %s12682_s27 = smov [#allocation18]  }
 0x13a   : > { %p12465_p2 = scmp.ne.s32.totalorder %s13170_s15, %s12464_s28  ;;  %s12469_s4 = sshll.u32 %s12682_s27, 4  ;;  %s12470_s4 = int_to_ptr.vmem [resolvable:$false] %s12469_s4 }
 0x13b   : > { %s12471_s26 = scalar_lea.vmem %s12470_s4, 512  ;;  %p12472_p0 = scmp.lt.s32.totalorder %s13170_s15, %s12470_s4 }
 0x13c   : > { %p12467_p11 = pnand %p12465_p2, %p15146_p13  ;;  %p12473_p1 = scmp.lt.s32.totalorder %s12471_s26, %s12464_s28 }
 0x13e   : > { %p12468_p4 = pneg %p12467_p11  ;;  %p12474_p5 = por %p12473_p1, %p12472_p0 }
 0x140   : > { %p12475_p6 = pnand %p12474_p5, %p12468_p4 }
 0x142   : > { %12478 = shalt.err (!%p12475_p6)
}
 0x143   : > { %p15147_p8 = scmp.ne.s32.totalorder %s15128_s29, 0  ;;  %s12479_s5 = scalar_lea.hbm %s15069_s12, 2304 }
 0x144   : > { %p12480_p1 = scmp.ne.s32.totalorder %s15069_s12, %s12479_s5  ;;  %p12486_p12 = scmp.lt.u32.totalorder %s12479_s5, %s15069_s12 }
 0x145   : > { %11305 = dma.hbm_to_vmem [thread:$0]  (!%p15147_p8), %s13146_s20, 256, %s13170_s15, %s12904_s18, %s15132_s19, %s15132_s19, %s15145_s25  }
 0x146   : > { %p12482_p7 = pnand %p12480_p1, %p15140_p3 }
 0x148   : > { %p12483_p9 = pneg %p12482_p7 }
 0x14a   : > { %p12488_p10 = pnand %p12486_p12, %p12483_p9 }
 0x14c   : > { %12491 = shalt.err (!%p12488_p10)
}
 0x14d   : > { %s12492_s27 = scalar_lea.vmem %s474_s16, 2304  ;;  %p12500_p0 = scmp.lt.s32.totalorder %s474_s16, %s474_s16 }
 0x14e   : > { %p12493_p2 = scmp.ne.s32.totalorder %s474_s16, %s12492_s27  ;;  %p12501_p5 = scmp.lt.s32.totalorder %s12492_s27, %s12492_s27 }
 0x150   : > { %p12495_p11 = pnand %p12493_p2, %p15140_p3  ;;  %p12502_p6 = por %p12501_p5, %p12500_p0 }
 0x152   : > { %p12496_p4 = pneg %p12495_p11 }
 0x154   : > { %p12503_p8 = pnand %p12502_p6, %p12496_p4 }
 0x156   : > { %12506 = shalt.err (!%p12503_p8)
}
 0x157   : > { %p15148_p1 = scmp.ne.s32.totalorder %s15120_s23, 0  ;;  %s12683_s4 = smov [#allocation21]  }
 0x158   : > { %s486_s26 = sshll.u32 %s12683_s4, 4  ;;  %s13225_s5 = scalar_lea.hbm %s15068_s11, %s12938_s22  ;;  %s487_s26 = int_to_ptr.vmem [resolvable:$true] %s486_s26 }
 0x159   : > { %11280 = dma.hbm_to_vmem [thread:$0]  (!%p15148_p1), %s15069_s12, 2304, %s474_s16, [#allocation8], %s15132_s19, %s15132_s19, %s15145_s25  }
 0x15a   : > { %s15149_s13 = sld [smem:[#allocation45_spill]] }
 0x160   : > { %s12507_s28 = scalar_lea.hbm %s15149_s13, 256 }
 0x161   : > { %p12508_p8 = scmp.ne.s32.totalorder %s15149_s13, %s12507_s28  ;;  %p12514_p12 = scmp.lt.u32.totalorder %s12507_s28, %s15149_s13 }
 0x163   : > { %p12510_p7 = pnand %p12508_p8, %p15140_p3 }
 0x165   : > { %p12511_p9 = pneg %p12510_p7 }
 0x167   : > { %p12516_p10 = pnand %p12514_p12, %p12511_p9 }
 0x169   : > { %12519 = shalt.err (!%p12516_p10)
}
 0x16a   : > { %s12520_s15 = scalar_lea.vmem %s487_s26, 256  ;;  %p12528_p0 = scmp.lt.s32.totalorder %s487_s26, %s487_s26 }
 0x16b   : > { %p12521_p2 = scmp.ne.s32.totalorder %s487_s26, %s12520_s15  ;;  %p12529_p5 = scmp.lt.s32.totalorder %s12520_s15, %s12520_s15 }
 0x16d   : > { %p12523_p11 = pnand %p12521_p2, %p15140_p3  ;;  %p12530_p6 = por %p12529_p5, %p12528_p0 }
 0x16f   : > { %p12524_p4 = pneg %p12523_p11 }
 0x171   : > { %p12531_p13 = pnand %p12530_p6, %p12524_p4 }
 0x173   : > { %12534 = shalt.err (!%p12531_p13)
}
 0x174   : > { %11283 = dma.hbm_to_vmem [thread:$0]  (!%p15148_p1), %s15149_s13, 256, %s487_s26, [#allocation11], %s15132_s19, %s15132_s19, %s15145_s25  }
 0x175   : > { %s645_s21 = scalar_lea.vmem [#allocation19], %s12891_s24  ;;  %s12535_s6 = scalar_lea.hbm %s13225_s5, 256 }
 0x176   : > { %s652_s4 = sshll.u32 %s645_s21, 4  ;;  %p12536_p3 = scmp.ne.s32.totalorder %s13225_s5, %s12535_s6  ;;  %s13249_s4 = int_to_ptr.vmem [resolvable:$true] %s652_s4 }
 0x177   : > { %p15150_p13 = scmp.ne.s32.totalorder %s15130_s30, 0  ;;  %s12540_s14 = scalar_lea.hbm %s15068_s11, 512 }
 0x178   : > { %p12541_p9 = scmp.lt.u32.totalorder %s13225_s5, %s15068_s11  ;;  %p12542_p12 = scmp.lt.u32.totalorder %s12540_s14, %s12535_s6 }
 0x179   : > { %p12538_p8 = pnand %p12536_p3, %p15150_p13  ;;  %p12544_p1 = scmp.lt.u32.totalorder %s12535_s6, %s13225_s5 }
 0x17a   : > { %p12543_p10 = por %p12542_p12, %p12541_p9 }
 0x17b   : > { %p12539_p7 = pneg %p12538_p8 }
 0x17c   : > { %p12545_p2 = por %p12544_p1, %p12543_p10 }
 0x17e   : > { %p12546_p11 = pnand %p12545_p2, %p12539_p7 }
 0x180   : > { %12549 = shalt.err (!%p12546_p11)
}
 0x181   : > { %s12550_s24 = scalar_lea.vmem %s13249_s4, 256  ;;  %s12684_s26 = smov [#allocation19]  }
 0x182   : > { %p12551_p4 = scmp.ne.s32.totalorder %s13249_s4, %s12550_s24  ;;  %s12555_s27 = sshll.u32 %s12684_s26, 4  ;;  %s12556_s27 = int_to_ptr.vmem [resolvable:$false] %s12555_s27 }
 0x183   : > { %s12557_s16 = scalar_lea.vmem %s12556_s27, 512  ;;  %p12558_p6 = scmp.lt.s32.totalorder %s13249_s4, %s12556_s27 }
 0x184   : > { %p12553_p0 = pnand %p12551_p4, %p15150_p13  ;;  %p12559_p3 = scmp.lt.s32.totalorder %s12557_s16, %s12550_s24 }
 0x186   : > { %p12554_p5 = pneg %p12553_p0  ;;  %p12560_p8 = por %p12559_p3, %p12558_p6 }
 0x188   : > { %p12561_p9 = pnand %p12560_p8, %p12554_p5 }
 0x18a   : > { %12564 = shalt.err (!%p12561_p9)
}
 0x18b   : > { %p15151_p7 = scmp.ne.s32.totalorder %s15128_s29, 0  ;;  %s15152_s30 = sld [smem:[#allocation35_spill]] }
 0x18d   : > { %11308 = dma.hbm_to_vmem [thread:$0]  (!%p15151_p7), %s13225_s5, 256, %s13249_s4, %s12904_s18, %s15132_s19, %s15132_s19, %s15145_s25  }
 0x191   : > { %p15153_p13 = scmp.ne.s32.totalorder %s15152_s30, 0 }
 0x192   : > { %s15154_s20 = sld [smem:[#allocation34_spill]] (!%p15153_p13) }
 0x193   : > { %664 = sbr.rel (%p15153_p13) target bundleno = 2965 (0xb95), region = 76 }
 0x198   : > { %p15155_p12 = scmp.eq.s32.totalorder (!%p15153_p13), %s15154_s20, 0 }
 0x19a   : > { %12616 = dma.done.wait (%p15155_p12), [#allocation5], 1536   ;;  %p15156_p10 = pmov %p15155_p12 }
 0x19c   : > { %12618 = vsyncadd (%p15156_p10), [#allocation5], 4294965760  ;;  %p15157_p1 = pmov %p15156_p10 }
 0x19e   : > { %12620 = dma.done.wait (%p15157_p1), [#allocation8], 288   ;;  %p15158_p2 = pmov %p15157_p1 }
 0x19f   : > { %p15159_p11 = pmov %p15157_p1 }
 0x1a0   : > { %12622 = vsyncadd (%p15158_p2), [#allocation8], 4294967008 }
 0x1a1   : > { %12624 = dma.done.wait (%p15159_p11), [#allocation11], 10368   ;;  %p15160_p4 = pmov %p15157_p1 }
 0x1a2   : > { %s15161_s18 = sld [smem:[#allocation30_spill]]  ;;  %s682_s19 = sand.u32 1, %s15154_s20  }
 0x1a3   : > { %12626 = vsyncadd (%p15160_p4), [#allocation11], 4294956928  ;;  %s15162_s29 = sld [smem:[#allocation37_spill]]  ;;  %s683_s15 = scalar_lea.sflag [#allocation5], %s682_s19 }
 0x1a8   : > { %s684_s25 = sand.u32 1, %s15161_s18  }
 0x1a9   : > { %s11220_s5 = smul.u32 144, %s684_s25  ;;  %p15163_p0 = scmp.ne.s32.totalorder %s15162_s29, 0 }
 0x1ab   : > { %s13292_s1 = scalar_lea.vmem [#allocation12], %s11220_s5 }
 0x1ac   : > { %12628 = dma.done.wait (%p15163_p0), %s683_s15, 5760  }
 0x1ad   : > { %12630 = vsyncadd (%p15163_p0), %s683_s15, 4294961536  ;;  %s13298_s22 = sshll.u32 %s684_s25, 4  ;;  %s10218_s21 = sshll.u32 %s684_s25, 2 }
 0x1ae   : > { %s695_s4 = scalar_lea.vmem [#allocation13], %s13298_s22  ;;  %s13301_s6 = scalar_lea.vmem [#allocation14], %s11220_s5 }
 0x1af   : > { %s713_s23 = scalar_lea.vmem [#allocation15], %s13298_s22  ;;  %s13304_s7 = scalar_lea.vmem [#allocation16], %s10218_s21 }
 0x1b0   : > { %s13306_s14 = scalar_lea.vmem [#allocation17], %s10218_s21  ;;  %s740_s0 = scalar_lea.vmem [#allocation18], %s13298_s22 }
 0x1b1   : > { %s749_s28 = scalar_lea.vmem [#allocation19], %s13298_s22  ;;  %p15164_p5 = pmov %p15157_p1 }
 0x1b2   : > { %p15165_p6 = pmov %p15157_p1 }
 0x1b3   : > { %12632 = dma.done.wait (%p15164_p5), [#allocation8], 2304  }
 0x1b4   : > { %12634 = vsyncadd (%p15165_p6), [#allocation8], 4294964992  ;;  %p15166_p3 = pmov %p15157_p1 }
 0x1b5   : > { %p15167_p8 = pmov %p15157_p1 }
 0x1b6   : > { %12636 = dma.done.wait (%p15166_p3), [#allocation11], 256  }
 0x1b7   : > { %12638 = vsyncadd (%p15167_p8), [#allocation11], 4294967040  ;;  %s15168_s24 = sld [smem:[#allocation32_spill]] }
 0x1bd   : > { %p10224_p9 = scmp.ne.s32.totalorder %s15168_s24, 0 }
 0x1be   : > { %vm843_vm0 = vcmask (!%p10224_p9), 64512   ;;  %v869_v0 = vld [vmem:[#allocation4] sm:$0xff] (!%p10224_p9)  ;;  %v870_v1 = vld [vmem:[#allocation4 + $0x8] sm:$0xff] (!%p10224_p9)  ;;  %v871_v2 = vld [vmem:[#allocation4 + $0x10] sm:$0xff] (!%p10224_p9)  ;;  %v12685_v3 = vmov (!%p10224_p9), 0.0  }
 0x1bf   : > { %835 = sbr.rel (%p10224_p9) target bundleno = 457 (0x1c9), region = 136  ;;  %836 = vst [vmem:[#allocation2] sm:$0xff] (!%p10224_p9), %v12685_v3  ;;  %842 = vst [vmem:[#allocation2 + $0x30] sm:$0xff] (!%p10224_p9), %v12685_v3  ;;  %v872_v4 = vld [vmem:[#allocation4 + $0x18] sm:$0xff] (!%p10224_p9)  ;;  %v873_v5 = vld [vmem:[#allocation4 + $0x20] sm:$0xff] (!%p10224_p9) }
 0x1c0   : > { %845 = vst [vmem:[#allocation2 + $0x40] sm:$0xff] (!%p10224_p9), %v12685_v3  ;;  %851 = vst [vmem:[#allocation2 + $0x70] sm:$0xff] (!%p10224_p9), %v12685_v3  ;;  %v874_v6 = vld [vmem:[#allocation4 + $0x28] sm:$0xff] (!%p10224_p9)  ;;  %v875_v7 = vld [vmem:[#allocation4 + $0x30] sm:$0xff] (!%p10224_p9) }
 0x1c1   : > { %853 = vst [vmem:[#allocation3] sm:$0xff] (!%p10224_p9), %v12685_v3  ;;  %859 = vst [vmem:[#allocation3 + $0x30] sm:$0xff] (!%p10224_p9), %v12685_v3  ;;  %v876_v8 = vld [vmem:[#allocation4 + $0x38] sm:$0xff] (!%p10224_p9)  ;;  %v877_v9 = vld [vmem:[#allocation4 + $0x40] sm:$0xff] (!%p10224_p9) }
 0x1c2   : > { %861 = vst [vmem:[#allocation3 + $0x40] sm:$0xff] (!%p10224_p9), %v12685_v3  ;;  %867 = vst [vmem:[#allocation3 + $0x70] sm:$0xff] (!%p10224_p9), %v12685_v3  ;;  %v878_v10 = vld [vmem:[#allocation4 + $0x48] sm:$0xff] (!%p10224_p9)  ;;  %v879_v11 = vld [vmem:[#allocation4 + $0x50] sm:$0xff] (!%p10224_p9) }
 0x1c3   : > { %881 = vst [vmem:[#allocation2 + $0x8] sm:$0xff] (!%p10224_p9), %v869_v0  ;;  %882 = vst [vmem:[#allocation2 + $0x10] sm:$0xff] (!%p10224_p9), %v870_v1  ;;  %v880_v12 = vld [vmem:[#allocation4 + $0x58] sm:$0xff] (!%p10224_p9) }
 0x1c4   : > { %883 = vst [vmem:[#allocation2 + $0x18] sm:$0xff] (!%p10224_p9), %v871_v2  ;;  %884 = vst [vmem:[#allocation2 + $0x20] sm:$0xff] (!%p10224_p9), %v872_v4 }
 0x1c5   : > { %885 = vst [vmem:[#allocation2 + $0x28] sm:$0xff] (!%p10224_p9), %v873_v5  ;;  %886 = vst.msk [vmem:[#allocation2 + $0x30] sm:$0xff] (!%p10224_p9), %vm843_vm0, %v874_v6 }
 0x1c6   : > { %887 = vst [vmem:[#allocation2 + $0x48] sm:$0xff] %v875_v7  ;;  %888 = vst [vmem:[#allocation2 + $0x50] sm:$0xff] %v876_v8 }
 0x1c7   : > { %889 = vst [vmem:[#allocation2 + $0x58] sm:$0xff] %v877_v9  ;;  %890 = vst [vmem:[#allocation2 + $0x60] sm:$0xff] %v878_v10 }
 0x1c8   : > { %891 = vst [vmem:[#allocation2 + $0x68] sm:$0xff] %v879_v11  ;;  %892 = vst.msk [vmem:[#allocation2 + $0x70] sm:$0xff] %vm843_vm0, %v880_v12 }
 0x1c9 PF: > { %v914_v15 = vld [vmem:[#allocation2] sm:$0xff]  ;;  %s12686_s26 = smov 18   ;;  %v12687_v29 = vmov 0.0   ;;  %s12688_s27 = smov 19   ;;  %vm962_vm1 = vcmask 146432   ;;  %vm985_vm2 = vcmask 130048  }
 0x1ca   : > { %v920_v17 = vld [vmem:[#allocation2 + $0x40] sm:$0xff]  ;;  %1056 = vmatprep.mubr.f32.mxu0 %v12687_v29  ;;  %1417 = vmatprep.mubr.f32.mxu1 %v12687_v29  ;;  %s12689_s16 = smov 17   ;;  %s12690_s30 = smov 1   ;;  %vm1247_vm3 = vcmask 154624   ;;  %vm1531_vm4 = vcmask 138240   ;;  %vm1859_vm5 = vcmask 7168  }
 0x1cb   : > { %v11419_v20 = vpack.i.bf16 %v920_v17, %v914_v15  ;;  %s12691_s20 = smov 127   ;;  %s12692_s18 = smov 111   ;;  %v896_v7 = vld [vmem:[%s13292_s1 + $0x10] sm:$0xff]  ;;  %vm2406_vm6 = vcmask 1039360   ;;  %vm2702_vm7 = vcmask 908288   ;;  %vm2998_vm8 = vcmask 900096  }
 0x1cc   : > { %s12693_s29 = smov 110   ;;  %s12694_s19 = smov 109   ;;  %vm3294_vm9 = vcmask 891904   ;;  %vm3648_vm10 = vcmask 64512   ;;  %vm12697_vm11 = vmmov 0   ;;  %vm6750_vm12 = vcmask 31744  }
 0x1cd   : > { %v13321_v13 = vld [vmem:[#allocation2 + $0x8] sm:$0xff]  ;;  %v13323_v14 = vld [vmem:[#allocation2 + $0x10] sm:$0xff]  ;;  %11420 = vrot.lane.b32.xlu1 %v11419_v20, %s12686_s26  ;;  %vm6757_vm13 = vcmask 1043456   ;;  %vm6884_vm14 = vcmask 1041408   ;;  %vm6877_vm15 = vcmask 15360   ;;  %s15169_s25 = sld [smem:[#allocation32_spill]] }
 0x1ce   : > { %v11409_v16 = vpack.i.bf16 %v13323_v14, %v13321_v13  ;;  %v13331_v21 = vld [vmem:[#allocation2 + $0x18] sm:$0xff]  ;;  %v13333_v22 = vld [vmem:[#allocation2 + $0x20] sm:$0xff] }
 0x1cf   : > { %v11424_v24 = vpack.i.bf16 %v13333_v22, %v13331_v21  ;;  %v13341_v25 = vld [vmem:[#allocation2 + $0x58] sm:$0xff]  ;;  %v13343_v26 = vld [vmem:[#allocation2 + $0x60] sm:$0xff]  ;;  %v13345_v27 = vld [vmem:[#allocation2 + $0x28] sm:$0xff]  ;;  %v11524_v40 = vpack.i.bf16 %v13331_v21, %v13323_v14 }
 0x1d0   : > { %v13327_v18 = vld [vmem:[#allocation2 + $0x48] sm:$0xff]  ;;  %v13329_v19 = vld [vmem:[#allocation2 + $0x50] sm:$0xff]  ;;  %11410 = vrot.lane.b32.xlu0 %v11409_v16, %s12686_s26  ;;  %v11429_v30 = vpack.i.bf16 %v13343_v26, %v13341_v25  ;;  %v11454_v32 = vpack.i.bf16 %v13345_v27, %v13333_v22  ;;  %v11514_v38 = vpack.i.bf16 %v13343_v26, %v13333_v22  ;;  %v11519_v39 = vpack.i.bf16 %v13341_v25, %v13331_v21 }
 0x1d1   : > { %v11414_v23 = vpack.i.bf16 %v13329_v19, %v13327_v18  ;;  %v13347_v28 = vld [vmem:[#allocation2 + $0x68] sm:$0xff]  ;;  %11425 = vrot.lane.b32.xlu1 %v11424_v24, %s12686_s26  ;;  %v13373_v34 = vld [vmem:[#allocation2 + $0x30] sm:$0xff]  ;;  %v11529_v41 = vpack.i.bf16 %v13341_v25, %v13329_v19  ;;  %v11534_v42 = vpack.i.bf16 %v13327_v18, %v13321_v13 }
 0x1d2   : > { %v11434_v31 = vpack.i.bf16 %v13347_v28, %v13345_v27  ;;  %v11459_v33 = vpack.i.bf16 %v13347_v28, %v13343_v26  ;;  %v11504_v35 = vpack.i.bf16 %v13373_v34, %v13345_v27  ;;  %v13379_v36 = vld [vmem:[#allocation2 + $0x70] sm:$0xff] }
 0x1d3   : > { %v11509_v37 = vpack.i.bf16 %v13379_v36, %v13347_v28  ;;  %v11649_v43 = vpack.i.bf16 %v13379_v36, %v13373_v34  ;;  %v897_v24 = vld [vmem:[%s13292_s1 + $0x18] sm:$0xff]  ;;  %p10354_p7 = scmp.ne.s32.totalorder %s15169_s25, 1 }
 0x1d4   : > { %11415 = vrot.lane.b32.xlu0 %v11414_v23, %s12686_s26  ;;  %s12699_s5 = smov (!%p10354_p7), 17   ;;  %s12701_s15 = smov (!%p10354_p7), 18  }
 0x1d5   : > { %11435 = vrot.lane.b32.xlu1 %v11434_v31, %s12686_s26  ;;  %s12703_s22 = smov (!%p10354_p7), 19   ;;  %s12704_s21 = smov (!%p10354_p7), 127  }
 0x1d8   : > { %11430 = vrot.lane.b32.xlu0 %v11429_v30, %s12686_s26 }
 0x1d9   : > { %11445 = vrot.lane.b32.xlu1 %v11414_v23, %s12688_s27 }
 0x1dc   : > { %11440 = vrot.lane.b32.xlu0 %v11409_v16, %s12688_s27 }
 0x1dd   : > { %11455 = vrot.lane.b32.xlu1 %v11454_v32, %s12688_s27 }
 0x1e0   : > { %11450 = vrot.lane.b32.xlu0 %v11419_v20, %s12688_s27 }
 0x1e1   : > { %11465 = vrot.lane.b32.xlu1 %v11409_v16, %s12689_s16 }
 0x1e4   : > { %11460 = vrot.lane.b32.xlu0 %v11459_v33, %s12688_s27 }
 0x1e5   : > { %11475 = vrot.lane.b32.xlu1 %v11419_v20, %s12689_s16 }
 0x1e8   : > { %11470 = vrot.lane.b32.xlu0 %v11414_v23, %s12689_s16 }
 0x1e9   : > { %11485 = vrot.lane.b32.xlu1 %v11459_v33, %s12689_s16 }
 0x1ec   : > { %11480 = vrot.lane.b32.xlu0 %v11454_v32, %s12689_s16 }
 0x1ed   : > { %11495 = vrot.lane.b32.xlu1 %v11414_v23, %s12690_s30 }
 0x1f0   : > { %11490 = vrot.lane.b32.xlu0 %v11409_v16, %s12690_s30 }
 0x1f1   : > { %11505 = vrot.lane.b32.xlu1 %v11504_v35, %s12690_s30 }
 0x1f4   : > { %11500 = vrot.lane.b32.xlu0 %v11419_v20, %s12690_s30 }
 0x1f5   : > { %11515 = vrot.lane.b32.xlu1 %v11514_v38, %s12690_s30 }
 0x1f8   : > { %11510 = vrot.lane.b32.xlu0 %v11509_v37, %s12690_s30 }
 0x1f9   : > { %11525 = vrot.lane.b32.xlu1 %v11524_v40, %s12691_s20 }
 0x1fc   : > { %11520 = vrot.lane.b32.xlu0 %v11519_v39, %s12688_s27 }
 0x1fd   : > { %11535 = vrot.lane.b32.xlu1 %v11534_v42, %s12691_s20 }
 0x200   : > { %11530 = vrot.lane.b32.xlu0 %v11529_v41, %s12691_s20 }
 0x201   : > { %11545 = vrot.lane.b32.xlu1 %v11504_v35, %s12691_s20 }
 0x204   : > { %11540 = vrot.lane.b32.xlu0 %v11519_v39, %s12689_s16 }
 0x205   : > { %11555 = vrot.lane.b32.xlu1 %v11519_v39, %s12690_s30 }
 0x208   : > { %11550 = vrot.lane.b32.xlu0 %v11509_v37, %s12691_s20 }
 0x209   : > { %11565 = vrot.lane.b32.xlu1 %v11529_v41, %s12692_s18 }
 0x20c   : > { %11560 = vrot.lane.b32.xlu0 %v11524_v40, %s12692_s18 }
 0x20d   : > { %11575 = vrot.lane.b32.xlu1 %v11504_v35, %s12692_s18 }
 0x210   : > { %11570 = vrot.lane.b32.xlu0 %v11534_v42, %s12692_s18 }
 0x211   : > { %11585 = vrot.lane.b32.xlu1 %v11514_v38, %s12691_s20 }
 0x214   : > { %11580 = vrot.lane.b32.xlu0 %v11509_v37, %s12692_s18 }
 0x215   : > { %11595 = vrot.lane.b32.xlu1 %v11529_v41, %s12693_s29 }
 0x218   : > { %11590 = vrot.lane.b32.xlu0 %v11524_v40, %s12693_s29 }
 0x219   : > { %11605 = vrot.lane.b32.xlu1 %v11514_v38, %s12692_s18 }
 0x21c   : > { %11600 = vrot.lane.b32.xlu0 %v11534_v42, %s12693_s29 }
 0x21d   : > { %11615 = vrot.lane.b32.xlu1 %v11509_v37, %s12693_s29 }
 0x220   : > { %11610 = vrot.lane.b32.xlu0 %v11504_v35, %s12693_s29 }
 0x221   : > { %11625 = vrot.lane.b32.xlu1 %v11524_v40, %s12694_s19 }
 0x224   : > { %11620 = vrot.lane.b32.xlu0 %v11514_v38, %s12693_s29 }
 0x225   : > { %11635 = vrot.lane.b32.xlu1 %v11534_v42, %s12694_s19 }
 0x228   : > { %11630 = vrot.lane.b32.xlu0 %v11529_v41, %s12694_s19 }
 0x229   : > { %11645 = vrot.lane.b32.xlu1 %v11459_v33, %s12694_s19 }
 0x22c   : > { %11640 = vrot.lane.b32.xlu0 %v11454_v32, %s12694_s19 }
 0x230   : > { %11650 = vrot.lane.b32.xlu0 %v11649_v43, %s12694_s19 }
 0x23f   : > { %v11421_v45 = vpop.permute.xlu1 %11420 }
 0x240   : > { %v11423_v48 = vunpack.i.h.bf16 %v11421_v45  ;;  %v11422_v49 = vunpack.i.l.bf16 %v11421_v45 }
 0x242   : > { %v11411_v44 = vpop.permute.xlu0 %11410 }
 0x243   : > { %v11413_v46 = vunpack.i.h.bf16 %v11411_v44  ;;  %v11412_v47 = vunpack.i.l.bf16 %v11411_v44  ;;  %v11426_v53 = vpop.permute.xlu1 %11425 }
 0x244   : > { %v11428_v54 = vunpack.i.h.bf16 %v11426_v53  ;;  %v11427_v55 = vunpack.i.l.bf16 %v11426_v53 }
 0x245   : > { %v964_v56 = vsel %vm962_vm1, %v11412_v47, %v11413_v46  ;;  %v963_v58 = vsel %vm962_vm1, %v11422_v49, %v11412_v47 }
 0x246   : > { %v11416_v50 = vpop.permute.xlu0 %11415  ;;  %v966_v2 = vsel %vm962_vm1, %v11427_v55, %v11428_v54  ;;  %v965_v3 = vsel %vm962_vm1, %v11413_v46, %v11427_v55 }
 0x247   : > { %v11418_v51 = vunpack.i.h.bf16 %v11416_v50  ;;  %v11417_v52 = vunpack.i.l.bf16 %v11416_v50  ;;  %v11436_v1 = vpop.permute.xlu1 %11435 }
 0x248   : > { %v11438_v5 = vunpack.i.h.bf16 %v11436_v1  ;;  %v11437_v6 = vunpack.i.l.bf16 %v11436_v1 }
 0x249   : > { %v969_v57 = vsel %vm962_vm1, %v11417_v52, %v11418_v51  ;;  %v968_v59 = vsel %vm962_vm1, %v11423_v48, %v11417_v52 }
 0x24a   : > { %v11431_v60 = vpop.permute.xlu0 %11430  ;;  %v10511_v61 = vpack.c.bf16 %v969_v57, %v964_v56  ;;  %v10513_v62 = vpack.c.bf16 %v968_v59, %v963_v58  ;;  %v10519_v17 = vpack.c.bf16 %v11438_v5, %v11437_v6  ;;  %v967_v37 = vsel %vm962_vm1, %v11428_v54, %v11437_v6 }
 0x24b   : > { %v11433_v63 = vunpack.i.h.bf16 %v11431_v60  ;;  %v11432_v0 = vunpack.i.l.bf16 %v11431_v60  ;;  %v13439_v16 = vpop.permute.xlu1 %11445  ;;  %v12695_v6 = vmov 0  }
 0x24c   : > { %10512 = vmatprep.subr.bf16.mxu0 %v10511_v61  ;;  %v11448_v20 = vunpack.i.h.bf16 %v13439_v16  ;;  %v11447_v23 = vunpack.i.l.bf16 %v13439_v16  ;;  %11654 = vset.pattern.permute.xlu1 %v12695_v6 }
 0x24d   : > { %v970_v4 = vsel %vm962_vm1, %v11418_v51, %v11432_v0  ;;  %10514 = vmatpush1.bf16.msra.mxu0 %v10513_v62  ;;  %v971_v8 = vsel %vm962_vm1, %v11432_v0, %v11433_v63  ;;  %v972_v35 = vsel %vm962_vm1, %v11433_v63, %v11438_v5  ;;  %v13507_v5 = vld [vmem:[%s13292_s1] sm:$0xff]  ;;  %11655 = vset.pattern.permute.xlu0 %v12695_v6 }
 0x24e   : > { %v13435_v9 = vpop.permute.xlu0 %11440  ;;  %v10515_v10 = vpack.c.bf16 %v971_v8, %v966_v2  ;;  %v10517_v11 = vpack.c.bf16 %v970_v4, %v965_v3  ;;  %v1254_v33 = vsel %vm1247_vm3, %v11447_v23, %v11448_v20  ;;  %v10521_v43 = vpack.c.bf16 %v972_v35, %v967_v37  ;;  %v912_v2 = vld [vmem:[%s695_s4] sm:$0xff]  ;;  %v913_v3 = vld [vmem:[%s695_s4 + $0x8] sm:$0xff]  ;;  %s12705_s4 = smov (!%p10354_p7), 111  }
 0x24f   : > { %v11443_v12 = vunpack.i.h.bf16 %v13435_v9  ;;  %v11442_v15 = vunpack.i.l.bf16 %v13435_v9  ;;  %v13446_v31 = vpop.permute.xlu1 %11455  ;;  %3568 = vperm.xlu1 %11654, %v912_v2   ;;  %3573 = vperm.xlu0 %11655, %v913_v3  }
 0x250   : > { %10225 = vmatmul.mubr.msk.f32.vlgmr.msra.gmra.mrb[0].mxu0 %vm985_vm2, %v896_v7  ;;  %10516 = vmatprep.subr.bf16.mxu0 %v10515_v10  ;;  %v11458_v46 = vunpack.i.h.bf16 %v13446_v31  ;;  %v11457_v51 = vunpack.i.l.bf16 %v13446_v31 }
 0x251   : > { %10518 = vmatpush1.bf16.msra.mxu0 %v10517_v11  ;;  %1062 = vmatprep.mubr.f32.mxu0 %v12687_v29  ;;  %v1249_v32 = vsel %vm1247_vm3, %v11442_v15, %v11443_v12 }
 0x252   : > { %v11451_v30 = vpop.permute.xlu0 %11450  ;;  %10520 = vmatprep.subr.bf16.mxu0 %v10519_v17  ;;  %v10523_v41 = vpack.c.bf16 %v1254_v33, %v1249_v32  ;;  %v1252_v60 = vsel %vm1247_vm3, %v11457_v51, %v11458_v46  ;;  %v13517_v17 = vld [vmem:[%s13292_s1 + $0x8] sm:$0xff] }
 0x253   : > { %v11453_v38 = vunpack.i.h.bf16 %v11451_v30  ;;  %v11452_v39 = vunpack.i.l.bf16 %v11451_v30  ;;  %v13460_v42 = vpop.permute.xlu1 %11465 }
 0x254   : > { %10226 = vmatmul.mubr.msk.f32.gmra.mrb[2].mxu0 %vm985_vm2, %v897_v24  ;;  %v11468_v55 = vunpack.i.h.bf16 %v13460_v42  ;;  %v11467_v56 = vunpack.i.l.bf16 %v13460_v42 }
 0x255   : > { %1133 = vmatprep.mubr.f32.mxu0 %v12687_v29  ;;  %v1248_v44 = vsel %vm1247_vm3, %v11452_v39, %v11442_v15  ;;  %v1253_v45 = vsel %vm1247_vm3, %v11453_v38, %v11447_v23 }
 0x256   : > { %v13458_v40 = vpop.permute.xlu0 %11460  ;;  %v10525_v50 = vpack.c.bf16 %v1253_v45, %v1248_v44  ;;  %v1533_v0 = vsel %vm1531_vm4, %v11467_v56, %v11468_v55 }
 0x257   : > { %v11463_v47 = vunpack.i.h.bf16 %v13458_v40  ;;  %v11476_v49 = vpop.permute.xlu1 %11475  ;;  %v11462_v52 = vunpack.i.l.bf16 %v13458_v40 }
 0x258   : > { %10227 = vmatmul.mubr.msk.f32.vlgmr.msra.gmra.mrb[4].mxu0 %vm985_vm2, %v896_v7  ;;  %v11477_v8 = vunpack.i.l.bf16 %v11476_v49 }
 0x259   : > { %10522 = vmatpush1.bf16.msra.mxu0 %v10521_v43  ;;  %1139 = vmatprep.mubr.f32.mxu0 %v12687_v29  ;;  %v10531_v53 = vpack.c.bf16 %v11463_v47, %v11458_v46  ;;  %v1257_v61 = vsel %vm1247_vm3, %v11462_v52, %v11463_v47 }
 0x25a   : > { %v13468_v48 = vpop.permute.xlu0 %11470  ;;  %10524 = vmatprep.subr.bf16.mxu0 %v10523_v41  ;;  %v10533_v4 = vpack.c.bf16 %v1257_v61, %v1252_v60 }
 0x25b   : > { %v11473_v57 = vunpack.i.h.bf16 %v13468_v48  ;;  %v11472_v58 = vunpack.i.l.bf16 %v13468_v48  ;;  %v13480_v59 = vpop.permute.xlu1 %11485 }
 0x25c   : > { %10228 = vmatmul.mubr.msk.f32.gmra.mrb[6].mxu0 %vm985_vm2, %v897_v24  ;;  %v11488_v32 = vunpack.i.h.bf16 %v13480_v59  ;;  %v11487_v43 = vunpack.i.l.bf16 %v13480_v59 }
 0x25d   : > { %1210 = vmatprep.mubr.f32.mxu0 %v12687_v29  ;;  %v1538_v1 = vsel %vm1531_vm4, %v11472_v58, %v11473_v57 }
 0x25e   : > { %v13474_v54 = vpop.permute.xlu0 %11480  ;;  %v10535_v11 = vpack.c.bf16 %v1538_v1, %v1533_v0 }
 0x25f   : > { %v13492_v63 = vpop.permute.xlu1 %11495  ;;  %v11483_v30 = vunpack.i.h.bf16 %v13474_v54  ;;  %v11482_v41 = vunpack.i.l.bf16 %v13474_v54 }
 0x260   : > { %10229 = vmatmul.mubr.msk.f32.vlgmr.msra.gmra.mrb[8].mxu0 %vm985_vm2, %v896_v7  ;;  %v11478_v7 = vunpack.i.h.bf16 %v11476_v49 }
 0x261   : > { %10526 = vmatpush1.bf16.msra.mxu0 %v10525_v50  ;;  %1216 = vmatprep.mubr.f32.mxu0 %v12687_v29  ;;  %v10543_v38 = vpack.c.bf16 %v11488_v32, %v11483_v30  ;;  %v11498_v50 = vunpack.i.h.bf16 %v13492_v63  ;;  %v1536_v31 = vsel %vm1531_vm4, %v11482_v41, %v11483_v30 }
 0x262   : > { %v13490_v62 = vpop.permute.xlu0 %11490  ;;  %10532 = vmatprep.subr.bf16.mxu0 %v10531_v53  ;;  %v1537_v23 = vsel %vm1531_vm4, %v11478_v7, %v11472_v58  ;;  %v11497_v53 = vunpack.i.l.bf16 %v13492_v63 }
 0x263   : > { %v13511_v15 = vpop.permute.xlu1 %11505  ;;  %v11493_v47 = vunpack.i.h.bf16 %v13490_v62  ;;  %v11492_v49 = vunpack.i.l.bf16 %v13490_v62 }
 0x264   : > { %10230 = vmatmul.mubr.msk.f32.gmra.mrb[10].mxu0 %vm985_vm2, %v897_v24  ;;  %v1532_v24 = vsel %vm1531_vm4, %v11477_v8, %v11467_v56  ;;  %v1867_v16 = vsel %vm1859_vm5, %v11497_v53, %v11498_v50 }
 0x265   : > { %1340 = vmatprep.mubr.f32.mxu0 %v12687_v29  ;;  %v10537_v37 = vpack.c.bf16 %v1537_v23, %v1532_v24  ;;  %v11507_v23 = vunpack.i.l.bf16 %v13511_v15 }
 0x266   : > { %v13509_v10 = vpop.permute.xlu0 %11500 }
 0x267   : > { %v13525_v35 = vpop.permute.xlu1 %11515  ;;  %v11502_v9 = vunpack.i.l.bf16 %v13509_v10  ;;  %v11503_v1 = vunpack.i.h.bf16 %v13509_v10 }
 0x268   : > { %10231 = vmatmul.mubr.msk.f32.vlgmr.msra.gmra.mrb[0].mxu0 %vm985_vm2, %v13507_v5  ;;  %v11518_v48 = vunpack.i.h.bf16 %v13525_v35 }
 0x269   : > { %1346 = vmatprep.mubr.f32.mxu0 %v12687_v29  ;;  %10534 = vmatpush1.bf16.msra.mxu0 %v10533_v4  ;;  %v1860_v8 = vsel %vm1859_vm5, %v11502_v9, %v11492_v49  ;;  %v900_v9 = vld [vmem:[%s13292_s1 + $0x30] sm:$0xff] }
 0x26a   : > { %v13523_v33 = vpop.permute.xlu0 %11510  ;;  %10536 = vmatprep.subr.bf16.mxu0 %v10535_v11  ;;  %v11508_v11 = vunpack.i.h.bf16 %v13511_v15  ;;  %v899_v15 = vld [vmem:[%s13292_s1 + $0x28] sm:$0xff] }
 0x26b   : > { %v13532_v46 = vpop.permute.xlu1 %11525  ;;  %v11513_v24 = vunpack.i.h.bf16 %v13523_v33  ;;  %v11512_v10 = vunpack.i.l.bf16 %v13523_v33 }
 0x26c   : > { %10232 = vmatmul.mubr.msk.f32.gmra.mrb[2].mxu0 %vm985_vm2, %v13517_v17 }
 0x26d   : > { %1494 = vmatprep.mubr.f32.mxu0 %v12687_v29  ;;  %v1870_v63 = vsel %vm1859_vm5, %v11518_v48, %v11512_v10 }
 0x26e   : > { %v11521_v39 = vpop.permute.xlu0 %11520 }
 0x26f   : > { %v11523_v44 = vunpack.i.h.bf16 %v11521_v39  ;;  %v11522_v45 = vunpack.i.l.bf16 %v11521_v39  ;;  %v13557_v40 = vpop.permute.xlu1 %11535 }
 0x270   : > { %10235 = vmatmul.mubr.msk.f32.vlgmr.msra.gmra.mrb[8].mxu0 %vm985_vm2, %v13507_v5 }
 0x271   : > { %10538 = vmatpush1.bf16.msra.mxu0 %v10537_v37  ;;  %1500 = vmatprep.mubr.f32.mxu0 %v12687_v29  ;;  %v1251_v54 = vsel %vm1247_vm3, %v11522_v45, %v11457_v51  ;;  %v1256_v56 = vsel %vm1247_vm3, %v11523_v44, %v11462_v52  ;;  %v1250_v58 = vsel %vm1247_vm3, %v11443_v12, %v11522_v45 }
 0x272   : > { %v13550_v59 = vpop.permute.xlu0 %11530  ;;  %v10527_v60 = vpack.c.bf16 %v1256_v56, %v1251_v54  ;;  %v1255_v61 = vsel %vm1247_vm3, %v11448_v20, %v11523_v44  ;;  %10544 = vmatprep.subr.bf16.mxu0 %v10543_v38  ;;  %v1541_v51 = vsel %vm1531_vm4, %v11487_v43, %v11488_v32  ;;  %v1861_v12 = vsel %vm1859_vm5, %v11492_v49, %v11493_v47  ;;  %v898_v20 = vld [vmem:[%s13292_s1 + $0x20] sm:$0xff] }
 0x273   : > { %v10529_v52 = vpack.c.bf16 %v1255_v61, %v1250_v58  ;;  %v10545_v0 = vpack.c.bf16 %v1541_v51, %v1536_v31  ;;  %v13571_v6 = vpop.permute.xlu1 %11545  ;;  %v10547_v7 = vpack.c.bf16 %v1867_v16, %v1861_v12  ;;  %v11517_v38 = vunpack.i.l.bf16 %v13525_v35 }
 0x274   : > { %10528 = vmatprep.subr.bf16.mxu1 %v10527_v60  ;;  %10236 = vmatmul.mubr.msk.f32.gmra.mrb[10].mxu0 %vm985_vm2, %v13517_v17  ;;  %v1871_v49 = vsel %vm1859_vm5, %v11512_v10, %v11513_v24  ;;  %v10563_v31 = vpack.c.bf16 %v13343_v26, %v13333_v22  ;;  %v11528_v26 = vunpack.i.h.bf16 %v13532_v46  ;;  %v11547_v12 = vunpack.i.l.bf16 %v13571_v6  ;;  %v13666_v10 = vld [vmem:[%s13292_s1 + $0x40] sm:$0xff] }
 0x275   : > { %10530 = vmatpush1.bf16.msra.mxu1 %v10529_v52  ;;  %1624 = vmatprep.mubr.f32.mxu0 %v12687_v29  ;;  %v10565_v16 = vpack.c.bf16 %v13341_v25, %v13331_v21  ;;  %v11527_v24 = vunpack.i.l.bf16 %v13532_v46 }
 0x276   : > { %v11541_v2 = vpop.permute.xlu0 %11540 }
 0x277   : > { %v11543_v3 = vunpack.i.h.bf16 %v11541_v2  ;;  %v11542_v4 = vunpack.i.l.bf16 %v11541_v2 }
 0x278   : > { %10233 = vmatmul.mubr.msk.f32.vlgmr.msra.gmra.mrb[0].mxu1 %vm985_vm2, %v13507_v5  ;;  %10237 = vmatmul.mubr.msk.f32.vlgmr.msra.gmra.mrb[0].mxu0 %vm985_vm2, %v898_v20  ;;  %v1866_v5 = vsel %vm1859_vm5, %v11503_v1, %v11497_v53  ;;  %v11533_v1 = vunpack.i.h.bf16 %v13550_v59 }
 0x279   : > { %v1534_v30 = vsel %vm1531_vm4, %v11468_v55, %v11542_v4  ;;  %v1539_v32 = vsel %vm1531_vm4, %v11473_v57, %v11543_v3  ;;  %1423 = vmatprep.mubr.f32.mxu1 %v12687_v29  ;;  %1630 = vmatprep.mubr.f32.mxu0 %v12687_v29  ;;  %v1535_v37 = vsel %vm1531_vm4, %v11542_v4, %v11482_v41  ;;  %v11556_v57 = vpop.permute.xlu1 %11555 }
 0x27a   : > { %v10541_v33 = vpack.c.bf16 %v1539_v32, %v1534_v30  ;;  %v1540_v42 = vsel %vm1531_vm4, %v11543_v3, %v11487_v43  ;;  %10546 = vmatpush1.bf16.msra.mxu0 %v10545_v0  ;;  %v13594_v55 = vpop.permute.xlu0 %11550  ;;  %v11558_v44 = vunpack.i.h.bf16 %v11556_v57  ;;  %v11557_v45 = vunpack.i.l.bf16 %v11556_v57 }
 0x27b   : > { %v10539_v39 = vpack.c.bf16 %v1540_v42, %v1535_v37  ;;  %10548 = vmatprep.subr.bf16.mxu0 %v10547_v7  ;;  %v10549_v41 = vpack.c.bf16 %v1866_v5, %v1860_v8  ;;  %v1865_v43 = vsel %vm1859_vm5, %v11507_v23, %v11508_v11  ;;  %v10559_v0 = vpack.c.bf16 %v13329_v19, %v13323_v14  ;;  %v901_v7 = vld [vmem:[%s13292_s1 + $0x38] sm:$0xff] }
 0x27c   : > { %10234 = vmatmul.mubr.msk.f32.gmra.mrb[2].mxu1 %vm985_vm2, %v13517_v17  ;;  %10238 = vmatmul.mubr.msk.f32.gmra.mrb[2].mxu0 %vm985_vm2, %v899_v15  ;;  %v1862_v35 = vsel %vm1859_vm5, %v11493_v47, %v11557_v45  ;;  %v1868_v53 = vsel %vm1859_vm5, %v11498_v50, %v11558_v44  ;;  %v1863_v17 = vsel %vm1859_vm5, %v11557_v45, %v11517_v38  ;;  %v11552_v2 = vunpack.i.l.bf16 %v13594_v55 }
 0x27d   : > { %10540 = vmatprep.subr.bf16.mxu1 %v10539_v39  ;;  %1701 = vmatprep.mubr.f32.mxu1 %v12687_v29  ;;  %v10553_v56 = vpack.c.bf16 %v1868_v53, %v1862_v35  ;;  %v1869_v58 = vsel %vm1859_vm5, %v11558_v44, %v11518_v48  ;;  %v13614_v60 = vpop.permute.xlu1 %11565  ;;  %v10555_v47 = vpack.c.bf16 %v1871_v49, %v1865_v43  ;;  %v11532_v37 = vunpack.i.l.bf16 %v13550_v59 }
 0x27e   : > { %10542 = vmatpush1.bf16.msra.mxu1 %v10541_v33  ;;  %1778 = vmatprep.mubr.f32.mxu0 %v12687_v29  ;;  %v13611_v54 = vpop.permute.xlu0 %11560  ;;  %v10551_v62 = vpack.c.bf16 %v1869_v58, %v1863_v17  ;;  %v1864_v50 = vsel %vm1859_vm5, %v11517_v38, %v11507_v23  ;;  %v10561_v30 = vpack.c.bf16 %v13327_v18, %v13321_v13  ;;  %v11568_v42 = vunpack.i.h.bf16 %v13614_v60 }
 0x27f   : > { %v10557_v52 = vpack.c.bf16 %v1870_v63, %v1864_v50  ;;  %v11563_v5 = vunpack.i.h.bf16 %v13611_v54  ;;  %v2408_v39 = vsel %vm2406_vm6, %v11527_v24, %v11528_v26  ;;  %v2413_v43 = vsel %vm2406_vm6, %v11532_v37, %v11533_v1 }
 0x280   : > { %10241 = vmatmul.mubr.msk.f32.vlgmr.msra.gmra.mrb[8].mxu0 %vm985_vm2, %v898_v20  ;;  %10552 = vmatprep.subr.bf16.mxu1 %v10551_v62  ;;  %v11538_v49 = vunpack.i.h.bf16 %v13557_v40  ;;  %v11537_v17 = vunpack.i.l.bf16 %v13557_v40  ;;  %v10569_v62 = vpack.c.bf16 %v13347_v28, %v13345_v27 }
 0x281   : > { %10239 = vmatmul.mubr.msk.f32.vlgmr.msra.gmra.mrb[0].mxu1 %vm985_vm2, %v898_v20  ;;  %10550 = vmatpush1.bf16.msra.mxu0 %v10549_v41  ;;  %v13626_v51 = vpop.permute.xlu1 %11575 }
 0x282   : > { %1707 = vmatprep.mubr.f32.mxu1 %v12687_v29  ;;  %v13621_v61 = vpop.permute.xlu0 %11570  ;;  %10554 = vmatpush1.bf16.msra.mxu1 %v10553_v56  ;;  %v11577_v46 = vunpack.i.l.bf16 %v13626_v51  ;;  %v13714_v56 = vld [vmem:[%s13292_s1 + $0x50] sm:$0xff]  ;;  %v2407_v28 = vsel %vm2406_vm6, %v11537_v17, %v11527_v24  ;;  %v11562_v24 = vunpack.i.l.bf16 %v13611_v54 }
 0x283   : > { %1784 = vmatprep.mubr.f32.mxu0 %v12687_v29  ;;  %10556 = vmatprep.subr.bf16.mxu0 %v10555_v47  ;;  %v13815_v54 = vld [vmem:[%s13292_s1 + $0x70] sm:$0xff] }
 0x284   : > { %10242 = vmatmul.mubr.msk.f32.gmra.mrb[10].mxu0 %vm985_vm2, %v899_v15  ;;  %10564 = vmatprep.subr.bf16.mxu1 %v10563_v31 }
 0x285   : > { %10240 = vmatmul.mubr.msk.f32.gmra.mrb[2].mxu1 %vm985_vm2, %v899_v15  ;;  %1954 = vmatprep.mubr.f32.mxu0 %v12687_v29  ;;  %v11586_v20 = vpop.permute.xlu1 %11585  ;;  %v10567_v15 = vpack.c.bf16 %v13379_v36, %v13373_v34  ;;  %v13685_v34 = vld [vmem:[%s13292_s1 + $0x48] sm:$0xff] }
 0x286   : > { %2031 = vmatprep.mubr.f32.mxu1 %v12687_v29  ;;  %v13633_v22 = vpop.permute.xlu0 %11580  ;;  %v11588_v3 = vunpack.i.h.bf16 %v11586_v20  ;;  %v11587_v4 = vunpack.i.l.bf16 %v11586_v20  ;;  %v11548_v20 = vunpack.i.h.bf16 %v13571_v6 }
 0x287   : > { %v11582_v48 = vunpack.i.l.bf16 %v13633_v22 }
 0x288   : > { %10243 = vmatmul.mubr.msk.f32.vlgmr.msra.gmra.mrb[0].mxu0 %vm985_vm2, %v900_v9  ;;  %v2410_v19 = vsel %vm2406_vm6, %v11587_v4, %v11547_v12  ;;  %v2414_v25 = vsel %vm2406_vm6, %v11533_v1, %v11588_v3  ;;  %v2409_v8 = vsel %vm2406_vm6, %v11528_v26, %v11587_v4  ;;  %v2415_v11 = vsel %vm2406_vm6, %v11588_v3, %v11552_v2  ;;  %v13737_v1 = vld [vmem:[%s13292_s1 + $0x58] sm:$0xff] }
 0x289   : > { %10245 = vmatmul.mubr.msk.f32.vlgmr.msra.gmra.mrb[0].mxu1 %vm985_vm2, %v900_v9  ;;  %10558 = vmatpush1.bf16.msra.mxu0 %v10557_v52  ;;  %v13650_v14 = vpop.permute.xlu1 %11595  ;;  %v10575_v23 = vpack.c.bf16 %v2415_v11, %v2410_v19  ;;  %v10577_v38 = vpack.c.bf16 %v2414_v25, %v2409_v8 }
 0x28a   : > { %1960 = vmatprep.mubr.f32.mxu0 %v12687_v29  ;;  %2037 = vmatprep.mubr.f32.mxu1 %v12687_v29  ;;  %v13648_v21 = vpop.permute.xlu0 %11590  ;;  %v11598_v26 = vunpack.i.h.bf16 %v13650_v14 }
 0x28b   : > { %10566 = vmatpush1.bf16.msra.mxu1 %v10565_v16  ;;  %10560 = vmatprep.subr.bf16.mxu0 %v10559_v0  ;;  %v11593_v40 = vunpack.i.h.bf16 %v13648_v21  ;;  %v2412_v16 = vsel %vm2406_vm6, %v11538_v49, %v11532_v37  ;;  %v11553_v0 = vunpack.i.h.bf16 %v13594_v55  ;;  %v11567_v37 = vunpack.i.l.bf16 %v13614_v60 }
 0x28c   : > { %10244 = vmatmul.mubr.msk.f32.gmra.mrb[2].mxu0 %vm985_vm2, %v901_v7  ;;  %10576 = vmatprep.subr.bf16.mxu1 %v10575_v23  ;;  %v10573_v11 = vpack.c.bf16 %v2412_v16, %v2407_v28  ;;  %v2411_v49 = vsel %vm2406_vm6, %v11547_v12, %v11548_v20  ;;  %v2704_v55 = vsel %vm2702_vm7, %v11562_v24, %v11563_v5  ;;  %v13837_v16 = vld [vmem:[%s13292_s1 + $0x80] sm:$0xff]  ;;  %v11592_v28 = vunpack.i.l.bf16 %v13648_v21 }
 0x28d   : > { %10246 = vmatmul.mubr.msk.f32.gmra.mrb[2].mxu1 %vm985_vm2, %v901_v7  ;;  %2108 = vmatprep.mubr.f32.mxu0 %v12687_v29  ;;  %v11606_v33 = vpop.permute.xlu1 %11605  ;;  %v10579_v23 = vpack.c.bf16 %v11553_v0, %v11548_v20  ;;  %v2709_v12 = vsel %vm2702_vm7, %v11567_v37, %v11568_v42  ;;  %v11597_v20 = vunpack.i.l.bf16 %v13650_v14 }
 0x28e   : > { %2280 = vmatprep.mubr.f32.mxu1 %v12687_v29  ;;  %v13670_v32 = vpop.permute.xlu0 %11600  ;;  %v11608_v13 = vunpack.i.h.bf16 %v11606_v33  ;;  %v11607_v18 = vunpack.i.l.bf16 %v11606_v33  ;;  %v10583_v60 = vpack.c.bf16 %v2709_v12, %v2704_v55 }
 0x290   : > { %10247 = vmatmul.mubr.msk.f32.vlgmr.msra.gmra.mrb[8].mxu0 %vm985_vm2, %v900_v9  ;;  %v2706_v57 = vsel %vm2702_vm7, %v11607_v18, %v11577_v46  ;;  %v2705_v44 = vsel %vm2702_vm7, %v11563_v5, %v11607_v18  ;;  %v2710_v45 = vsel %vm2702_vm7, %v11568_v42, %v11608_v13  ;;  %v2711_v41 = vsel %vm2702_vm7, %v11608_v13, %v11582_v48 }
 0x291   : > { %10251 = vmatmul.mubr.msk.f32.vlgmr.msra.gmra.mrb[0].mxu1 %vm985_vm2, %v13666_v10  ;;  %2114 = vmatprep.mubr.f32.mxu0 %v12687_v29  ;;  %v13689_v59 = vpop.permute.xlu1 %11615  ;;  %v10587_v53 = vpack.c.bf16 %v2711_v41, %v2706_v57  ;;  %v10589_v63 = vpack.c.bf16 %v2710_v45, %v2705_v44  ;;  %v10571_v9 = vpack.c.bf16 %v2413_v43, %v2408_v39  ;;  %v13783_v43 = vld [vmem:[%s13292_s1 + $0x68] sm:$0xff] }
 0x292   : > { %2286 = vmatprep.mubr.f32.mxu1 %v12687_v29  ;;  %10562 = vmatpush1.bf16.msra.mxu0 %v10561_v30  ;;  %v13687_v36 = vpop.permute.xlu0 %11610  ;;  %v11617_v58 = vunpack.i.l.bf16 %v13689_v59  ;;  %v13760_v30 = vld [vmem:[%s13292_s1 + $0x60] sm:$0xff] }
 0x293   : > { %10578 = vmatpush1.bf16.msra.mxu1 %v10577_v38  ;;  %10568 = vmatprep.subr.bf16.mxu0 %v10567_v15  ;;  %v11612_v35 = vunpack.i.l.bf16 %v13687_v36 }
 0x294   : > { %10248 = vmatmul.mubr.msk.f32.gmra.mrb[10].mxu0 %vm985_vm2, %v901_v7  ;;  %10588 = vmatprep.subr.bf16.mxu1 %v10587_v53  ;;  %v2416_v53 = vsel %vm2406_vm6, %v11552_v2, %v11553_v0 }
 0x295   : > { %10252 = vmatmul.mubr.msk.f32.gmra.mrb[2].mxu1 %vm985_vm2, %v13685_v34  ;;  %2203 = vmatprep.mubr.f32.mxu0 %v12687_v29  ;;  %v13719_v52 = vpop.permute.xlu1 %11625  ;;  %v10581_v2 = vpack.c.bf16 %v2416_v53, %v2411_v49 }
 0x296   : > { %2576 = vmatprep.mubr.f32.mxu1 %v12687_v29  ;;  %v11621_v47 = vpop.permute.xlu0 %11620  ;;  %v11628_v57 = vunpack.i.h.bf16 %v13719_v52 }
 0x297   : > { %v11623_v50 = vunpack.i.h.bf16 %v11621_v47  ;;  %v11622_v31 = vunpack.i.l.bf16 %v11621_v47  ;;  %v11572_v47 = vunpack.i.l.bf16 %v13621_v61 }
 0x298   : > { %10249 = vmatmul.mubr.msk.f32.vlgmr.msra.gmra.mrb[0].mxu0 %vm985_vm2, %v13666_v10 }
 0x299   : > { %10257 = vmatmul.mubr.msk.f32.vlgmr.msra.gmra.mrb[0].mxu1 %vm985_vm2, %v13714_v56  ;;  %2209 = vmatprep.mubr.f32.mxu0 %v12687_v29  ;;  %v3002_v27 = vsel %vm2998_vm8, %v11622_v31, %v11612_v35  ;;  %v3007_v4 = vsel %vm2998_vm8, %v11623_v50, %v11617_v58  ;;  %v13744_v7 = vpop.permute.xlu1 %11635  ;;  %v3001_v25 = vsel %vm2998_vm8, %v11593_v40, %v11622_v31  ;;  %v11583_v31 = vunpack.i.h.bf16 %v13633_v22 }
 0x29a   : > { %2582 = vmatprep.mubr.f32.mxu1 %v12687_v29  ;;  %10570 = vmatpush1.bf16.msra.mxu0 %v10569_v62  ;;  %v13739_v3 = vpop.permute.xlu0 %11630  ;;  %v10599_v19 = vpack.c.bf16 %v3007_v4, %v3002_v27  ;;  %v3006_v8 = vsel %vm2998_vm8, %v11598_v26, %v11623_v50  ;;  %v2703_v42 = vsel %vm2702_vm7, %v11572_v47, %v11562_v24  ;;  %v11578_v50 = vunpack.i.h.bf16 %v13626_v51 }
 0x29b   : > { %10590 = vmatpush1.bf16.msra.mxu1 %v10589_v63  ;;  %10572 = vmatprep.subr.bf16.mxu0 %v10571_v9  ;;  %v10601_v38 = vpack.c.bf16 %v3006_v8, %v3001_v25  ;;  %v11633_v39 = vunpack.i.h.bf16 %v13739_v3  ;;  %v13826_v63 = vld [vmem:[%s13292_s1 + $0x78] sm:$0xff]  ;;  %v2712_v4 = vsel %vm2702_vm7, %v11582_v48, %v11583_v31  ;;  %v3005_v51 = vsel %vm2998_vm8, %v11597_v20, %v11598_v26 }
 0x29c   : > { %10250 = vmatmul.mubr.msk.f32.gmra.mrb[2].mxu0 %vm985_vm2, %v13685_v34  ;;  %10600 = vmatprep.subr.bf16.mxu1 %v10599_v19  ;;  %v10591_v27 = vpack.c.bf16 %v11583_v31, %v11578_v50  ;;  %v2707_v0 = vsel %vm2702_vm7, %v11577_v46, %v11578_v50  ;;  %v13854_v19 = vld [vmem:[%s13292_s1 + $0x88] sm:$0xff]  ;;  %v11603_v46 = vunpack.i.h.bf16 %v13670_v32  ;;  %v11602_v48 = vunpack.i.l.bf16 %v13670_v32  ;;  %s12702_s1 = smov (!%p10354_p7), 1  }
 0x29d   : > { %10258 = vmatmul.mubr.msk.f32.gmra.mrb[2].mxu1 %vm985_vm2, %v13737_v1  ;;  %2357 = vmatprep.mubr.f32.mxu0 %v12687_v29  ;;  %v13767_v18 = vpop.permute.xlu1 %11645  ;;  %v10593_v22 = vpack.c.bf16 %v2712_v4, %v2707_v0  ;;  %v11613_v26 = vunpack.i.h.bf16 %v13687_v36  ;;  %v11627_v8 = vunpack.i.l.bf16 %v13719_v52  ;;  %v11638_v36 = vunpack.i.h.bf16 %v13744_v7 }
 0x29e   : > { %2872 = vmatprep.mubr.f32.mxu1 %v12687_v29  ;;  %v13762_v15 = vpop.permute.xlu0 %11640  ;;  %v11648_v44 = vunpack.i.h.bf16 %v13767_v18  ;;  %v11647_v45 = vunpack.i.l.bf16 %v13767_v18  ;;  %v2999_v14 = vsel %vm2998_vm8, %v11602_v48, %v11592_v28 }
 0x29f   : > { %v11643_v33 = vunpack.i.h.bf16 %v13762_v15  ;;  %v11642_v13 = vunpack.i.l.bf16 %v13762_v15  ;;  %v3676_v15 = vld [vmem:[#allocation3] sm:$0xff] }
 0x2a0   : > { %10253 = vmatmul.mubr.msk.f32.vlgmr.msra.gmra.mrb[8].mxu0 %vm985_vm2, %v13666_v10  ;;  %v3303_v10 = vsel %vm3294_vm9, %v11647_v45, %v11648_v44  ;;  %v3302_v6 = vsel %vm3294_vm9, %v11633_v39, %v11647_v45 }
 0x2a1   : > { %10263 = vmatmul.mubr.msk.f32.vlgmr.msra.gmra.mrb[0].mxu1 %vm985_vm2, %v13760_v30  ;;  %10574 = vmatpush1.bf16.msra.mxu0 %v10573_v11  ;;  %v3298_v41 = vsel %vm3294_vm9, %v11642_v13, %v11643_v33  ;;  %v3297_v62 = vsel %vm3294_vm9, %v11628_v57, %v11642_v13  ;;  %v11632_v11 = vunpack.i.l.bf16 %v13739_v3 }
 0x2a2   : > { %2363 = vmatprep.mubr.f32.mxu0 %v12687_v29  ;;  %2878 = vmatprep.mubr.f32.mxu1 %v12687_v29  ;;  %v10611_v17 = vpack.c.bf16 %v3303_v10, %v3298_v41  ;;  %v10613_v5 = vpack.c.bf16 %v3302_v6, %v3297_v62 }
 0x2a3   : > { %10602 = vmatpush1.bf16.msra.mxu1 %v10601_v38  ;;  %10580 = vmatprep.subr.bf16.mxu0 %v10579_v23  ;;  %v3003_v23 = vsel %vm2998_vm8, %v11612_v35, %v11613_v26  ;;  %v3300_v52 = vsel %vm3294_vm9, %v11638_v36, %v11632_v11 }
 0x2a4   : > { %10254 = vmatmul.mubr.msk.f32.gmra.mrb[10].mxu0 %vm985_vm2, %v13685_v34  ;;  %v11573_v34 = vunpack.i.h.bf16 %v13621_v61  ;;  %10612 = vmatprep.subr.bf16.mxu1 %v10611_v17  ;;  %v3601_v17 = vlaneseq }
 0x2a5   : > { %10264 = vmatmul.mubr.msk.f32.gmra.mrb[2].mxu1 %vm985_vm2, %v13783_v43  ;;  %2499 = vmatprep.mubr.f32.mxu0 %v12687_v29 }
 0x2a6   : > { %3168 = vmatprep.mubr.f32.mxu1 %v12687_v29  ;;  %v2708_v61 = vsel %vm2702_vm7, %v11573_v34, %v11567_v37  ;;  %v3296_v37 = vsel %vm3294_vm9, %v11627_v8, %v11628_v57  ;;  %v13937_v62 = vshrl.u32 %v3601_v17, 7  ;;  %v893_v34 = vld [vmem:[#allocation7] sm:$0x3f] }
 0x2a7   : > { %v10585_v9 = vpack.c.bf16 %v2708_v61, %v2703_v42 }
 0x2a8   : > { %10255 = vmatmul.mubr.msk.f32.vlgmr.msra.gmra.mrb[0].mxu0 %vm985_vm2, %v13714_v56  ;;  %v3611_v6 = vsub.s32 2, %v13937_v62  ;;  %v3615_v12 = vsub.s32 3, %v13937_v62 }
 0x2a9   : > { %10269 = vmatmul.mubr.msk.f32.vlgmr.msra.gmra.mrb[0].mxu1 %vm985_vm2, %v13815_v54  ;;  %2505 = vmatprep.mubr.f32.mxu0 %v12687_v29 }
 0x2aa   : > { %3174 = vmatprep.mubr.f32.mxu1 %v12687_v29  ;;  %10582 = vmatpush1.bf16.msra.mxu0 %v10581_v2  ;;  %v13941_v42 = vrot.slane %v893_v34, %v3611_v6 }
 0x2ab   : > { %10614 = vmatpush1.bf16.msra.mxu1 %v10613_v5  ;;  %10584 = vmatprep.subr.bf16.mxu0 %v10583_v60 }
 0x2ac   : > { %10256 = vmatmul.mubr.msk.f32.gmra.mrb[2].mxu0 %vm985_vm2, %v13737_v1 }
 0x2ad   : > { %10270 = vmatmul.mubr.msk.f32.gmra.mrb[2].mxu1 %vm985_vm2, %v13826_v63  ;;  %2653 = vmatprep.mubr.f32.mxu0 %v12687_v29 }
 0x2ae   : > { %3464 = vmatprep.mubr.f32.mxu1 %v12687_v29 }
 0x2b0   : > { %10259 = vmatmul.mubr.msk.f32.vlgmr.msra.gmra.mrb[8].mxu0 %vm985_vm2, %v13714_v56  ;;  %v3000_v56 = vsel %vm2998_vm8, %v11592_v28, %v11593_v40  ;;  %v3004_v40 = vsel %vm2998_vm8, %v11603_v46, %v11597_v20 }
 0x2b1   : > { %10275 = vmatmul.mubr.msk.f32.vlgmr.msra.gmra.mrb[0].mxu1 %vm985_vm2, %v13837_v16  ;;  %10586 = vmatpush1.bf16.msra.mxu0 %v10585_v9  ;;  %v10595_v21 = vpack.c.bf16 %v3005_v51, %v3000_v56  ;;  %v10597_v32 = vpack.c.bf16 %v3004_v40, %v2999_v14 }
 0x2b2   : > { %2659 = vmatprep.mubr.f32.mxu0 %v12687_v29  ;;  %3470 = vmatprep.mubr.f32.mxu1 %v12687_v29 }
 0x2b3   : > { %10592 = vmatprep.subr.bf16.mxu0 %v10591_v27 }
 0x2b4   : > { %10260 = vmatmul.mubr.msk.f32.gmra.mrb[10].mxu0 %vm985_vm2, %v13737_v1  ;;  %v11618_v1 = vunpack.i.h.bf16 %v13689_v59  ;;  %v11637_v59 = vunpack.i.l.bf16 %v13744_v7 }
 0x2b5   : > { %10276 = vmatmul.mubr.msk.f32.gmra.mrb[2].mxu1 %vm985_vm2, %v13854_v19  ;;  %2795 = vmatprep.mubr.f32.mxu0 %v12687_v29 }
 0x2b6   : > { %3816 = vmatprep.mubr.f32.mxu1 %v12687_v29  ;;  %v10603_v25 = vpack.c.bf16 %v11618_v1, %v11613_v26  ;;  %v3008_v24 = vsel %vm2998_vm8, %v11617_v58, %v11618_v1  ;;  %v11651_v58 = vpop.permute.xlu0 %11650  ;;  %v3295_v3 = vsel %vm3294_vm9, %v11637_v59, %v11627_v8  ;;  %v3603_v1 = vsub.s32 0, %v13937_v62 }
 0x2b7   : > { %v10605_v38 = vpack.c.bf16 %v3008_v24, %v3003_v23  ;;  %v11653_v13 = vunpack.i.h.bf16 %v11651_v58  ;;  %v11652_v57 = vunpack.i.l.bf16 %v11651_v58 }
 0x2b8   : > { %10261 = vmatmul.mubr.msk.f32.vlgmr.msra.gmra.mrb[0].mxu0 %vm985_vm2, %v13760_v30 }
 0x2b9   : > { %2801 = vmatprep.mubr.f32.mxu0 %v12687_v29  ;;  %10594 = vmatpush1.bf16.msra.mxu0 %v10593_v22  ;;  %v10615_v7 = vpack.c.bf16 %v11653_v13, %v11652_v57  ;;  %v3299_v45 = vsel %vm3294_vm9, %v11643_v33, %v11652_v57  ;;  %v3304_v41 = vsel %vm3294_vm9, %v11648_v44, %v11653_v13  ;;  %v3682_v33 = vld [vmem:[#allocation3 + $0x40] sm:$0xff]  ;;  %v3623_v57 = vsub.s32 5, %v13937_v62 }
 0x2ba   : > { %10596 = vmatprep.subr.bf16.mxu0 %v10595_v21  ;;  %v13933_v18 = vpack.i.bf16 %v3682_v33, %v3676_v15 }
 0x2bb   : > { %v14005_v17 = vrot.slane %v893_v34, %v3623_v57 }
 0x2bc   : > { %10262 = vmatmul.mubr.msk.f32.gmra.mrb[2].mxu0 %vm985_vm2, %v13783_v43  ;;  %11667 = vrot.lane.b32.xlu0 %v13933_v18, %s12686_s26 }
 0x2bd   : > { %2949 = vmatprep.mubr.f32.mxu0 %v12687_v29 }
 0x2c0   : > { %10265 = vmatmul.mubr.msk.f32.vlgmr.msra.gmra.mrb[8].mxu0 %vm985_vm2, %v13760_v30  ;;  %v3301_v30 = vsel %vm3294_vm9, %v11632_v11, %v11633_v39  ;;  %v10609_v39 = vpack.c.bf16 %v3300_v52, %v3295_v3  ;;  %v13977_v11 = vrot.slane %v893_v34, %v3603_v1  ;;  %v3619_v52 = vsub.s32 4, %v13937_v62 }
 0x2c1   : > { %10598 = vmatpush1.bf16.msra.mxu0 %v10597_v32  ;;  %2955 = vmatprep.mubr.f32.mxu0 %v12687_v29  ;;  %v10607_v35 = vpack.c.bf16 %v3301_v30, %v3296_v37  ;;  %v3607_v32 = vsub.s32 1, %v13937_v62 }
 0x2c2   : > { %10604 = vmatprep.subr.bf16.mxu0 %v10603_v25 }
 0x2c3   : > { %v13979_v37 = vrot.slane %v893_v34, %v3607_v32 }
 0x2c4   : > { %10266 = vmatmul.mubr.msk.f32.gmra.mrb[10].mxu0 %vm985_vm2, %v13783_v43  ;;  %v10617_v43 = vpack.c.bf16 %v3304_v41, %v3299_v45 }
 0x2c5   : > { %3091 = vmatprep.mubr.f32.mxu0 %v12687_v29 }
 0x2c8   : > { %10267 = vmatmul.mubr.msk.f32.vlgmr.msra.gmra.mrb[0].mxu0 %vm985_vm2, %v13815_v54 }
 0x2c9   : > { %3097 = vmatprep.mubr.f32.mxu0 %v12687_v29  ;;  %10606 = vmatpush1.bf16.msra.mxu0 %v10605_v38 }
 0x2ca   : > { %10608 = vmatprep.subr.bf16.mxu0 %v10607_v35 }
 0x2cc   : > { %10268 = vmatmul.mubr.msk.f32.gmra.mrb[2].mxu0 %vm985_vm2, %v13826_v63 }
 0x2cd   : > { %3245 = vmatprep.mubr.f32.mxu0 %v12687_v29 }
 0x2ce   : > { %v3569_v2 = vpop.permute.xlu1 %3568  ;;  %v13945_v31 = vpop.permute.xlu0 %3573 }
 0x2d0   : > { %10271 = vmatmul.mubr.msk.f32.vlgmr.msra.gmra.mrb[8].mxu0 %vm985_vm2, %v13815_v54 }
 0x2d1   : > { %10610 = vmatpush1.bf16.msra.mxu0 %v10609_v39  ;;  %3251 = vmatprep.mubr.f32.mxu0 %v12687_v29 }
 0x2d2   : > { %10616 = vmatprep.subr.bf16.mxu0 %v10615_v7 }
 0x2d4   : > { %10272 = vmatmul.mubr.msk.f32.gmra.mrb[10].mxu0 %vm985_vm2, %v13826_v63  ;;  %v13943_v63 = vrot.slane %v893_v34, %v3615_v12 }
 0x2d5   : > { %3387 = vmatprep.mubr.f32.mxu0 %v12687_v29 }
 0x2d8   : > { %10273 = vmatmul.mubr.msk.f32.vlgmr.msra.gmra.mrb[0].mxu0 %vm985_vm2, %v13837_v16 }
 0x2d9   : > { %10618 = vmatpush1.bf16.msra.mxu0 %v10617_v43  ;;  %3393 = vmatprep.mubr.f32.mxu0 %v12687_v29 }
 0x2dc   : > { %10274 = vmatmul.mubr.msk.f32.gmra.mrb[2].mxu0 %vm985_vm2, %v13854_v19 }
 0x2dd   : > { %3541 = vmatprep.mubr.f32.mxu0 %v12687_v29 }
 0x2e0   : > { %10277 = vmatmul.mubr.msk.f32.vlgmr.msra.gmra.mrb[8].mxu0 %vm985_vm2, %v13837_v16 }
 0x2e1   : > { %3547 = vmatprep.mubr.f32.mxu0 %v12687_v29 }
 0x2e4   : > { %10278 = vmatmul.mubr.msk.f32.gmra.mrb[10].mxu0 %vm985_vm2, %v13854_v19 }
 0x32b   : > { %v1135_v44 = vpop.f32.mrb[4].mxu0 }
 0x32c   : > { %v1137_v10 = vpop.f32.mrb[5].mxu0 }
 0x32f   : > { %v1141_v49 = vpop.f32.mrb[6].mxu0 }
 0x330   : > { %v1143_v53 = vpop.f32.mrb[7].mxu0 }
 0x384   : > { %v3466_v55 = vpop.f32.mrb[0].mxu1 }
 0x385   : > { %v10926_v47 = vadd.f32 %v3466_v55, %v1135_v44  ;;  %v3468_v54 = vpop.f32.mrb[1].mxu1  ;;  %v14000_v44 = vrot.slane %v893_v34, %v3619_v52 }
 0x386   : > { %v10927_v5 = vadd.f32 %v3468_v54, %v1137_v10 }
 0x387   : > { %v3578_v60 = vadd.f32 %v10926_v47, %v3569_v2 }
 0x388   : > { %v3579_v61 = vadd.f32 %v10927_v5, %v3569_v2  ;;  %v3472_v50 = vpop.f32.mrb[2].mxu1 }
 0x389   : > { %v3590_v9 = vmax.f32 %v3578_v60, 0.0  ;;  %v10928_v16 = vadd.f32 %v3472_v50, %v1141_v49  ;;  %v3474_v27 = vpop.f32.mrb[3].mxu1 }
 0x38a   : > { %v3591_v28 = vmax.f32 %v3579_v61, 0.0  ;;  %v10929_v20 = vadd.f32 %v3474_v27, %v1143_v53 }
 0x38b   : > { %v13948_v0 = vmul.f32 %v13941_v42, %v3590_v9  ;;  %v3584_v4 = vadd.f32 %v10928_v16, %v13945_v31 }
 0x38c   : > { %v13952_v19 = vmul.f32 %v13943_v63, %v3591_v28  ;;  %v3585_v56 = vadd.f32 %v10929_v20, %v13945_v31 }
 0x38d   : > { %v3596_v51 = vmax.f32 %v3584_v4, 0.0 }
 0x38e   : > { %v3597_v22 = vmax.f32 %v3585_v56, 0.0  ;;  %v13957_v46 = vpack.i.bf16 %v13952_v19, %v13948_v0 }
 0x38f   : > { %v13960_v48 = vmul.f32 %v13941_v42, %v3596_v51 }
 0x390   : > { %v13963_v21 = vmul.f32 %v13943_v63, %v3597_v22 }
 0x391   : > { %v10673_v14 = vpack.c.bf16 %v13960_v48, %v13948_v0 }
 0x392   : > { %v13969_v40 = vpack.i.bf16 %v13963_v21, %v13960_v48  ;;  %v10671_v26 = vpack.c.bf16 %v13963_v21, %v13952_v19 }
 0x394   : > { %11677 = vrot.lane.b32.xlu0 %v13969_v40, %s12686_s26 }
 0x3ab   : > { %v3389_v25 = vpop.f32.mrb[0].mxu0 }
 0x3ac   : > { %v3576_v8 = vadd.f32 %v3569_v2, %v3389_v25  ;;  %v3391_v23 = vpop.f32.mrb[1].mxu0 }
 0x3ad   : > { %v3577_v24 = vadd.f32 %v3569_v2, %v3391_v23  ;;  %v6738_v23 = vld [vmem:[%s749_s28] sm:$0xff] }
 0x3ae   : > { %v3588_v30 = vmax.f32 %v3576_v8, 0.0 }
 0x3af   : > { %v3589_v38 = vmax.f32 %v3577_v24, 0.0  ;;  %v3395_v36 = vpop.f32.mrb[2].mxu0  ;;  %v3674_v24 = vld [vmem:[%s713_s23] sm:$0xff] }
 0x3b0   : > { %v13982_v59 = vmul.f32 %v13977_v11, %v3588_v30  ;;  %v3582_v35 = vadd.f32 %v13945_v31, %v3395_v36  ;;  %v3397_v58 = vpop.f32.mrb[3].mxu0  ;;  %v6656_v30 = vld [vmem:[%s13306_s14] sm:$0xf]  ;;  %v11668_v36 = vpop.permute.xlu0 %11667 }
 0x3b1   : > { %v13987_v3 = vmul.f32 %v13979_v37, %v3589_v38  ;;  %v3583_v13 = vadd.f32 %v13945_v31, %v3397_v58  ;;  %v6739_v38 = vld [vmem:[%s749_s28 + $0x8] sm:$0xff]  ;;  %v11670_v58 = vunpack.i.h.bf16 %v11668_v36  ;;  %v11669_v52 = vunpack.i.l.bf16 %v11668_v36 }
 0x3b2   : > { %v3594_v39 = vmax.f32 %v3582_v35, 0.0 }
 0x3b3   : > { %v3595_v7 = vmax.f32 %v3583_v13, 0.0  ;;  %v3543_v45 = vpop.f32.mrb[8].mxu0  ;;  %v11686_v41 = vpack.i.bf16 %v13987_v3, %v13982_v59  ;;  %v13995_v43 = vpack.i.bf16 %v13948_v0, %v13987_v3 }
 0x3b4   : > { %v13998_v15 = vmul.f32 %v13977_v11, %v3594_v39  ;;  %v3580_v33 = vadd.f32 %v3569_v2, %v3543_v45  ;;  %v3545_v10 = vpop.f32.mrb[9].mxu0 }
 0x3b5   : > { %v14003_v49 = vmul.f32 %v13979_v37, %v3595_v7  ;;  %v3581_v53 = vadd.f32 %v3569_v2, %v3545_v10  ;;  %11687 = vrot.lane.b32.xlu0 %v11686_v41, %s12688_s27  ;;  %11657 = vrot.lane.b32.xlu1 %v11686_v41, %s12686_s26 }
 0x3b6   : > { %v3592_v6 = vmax.f32 %v3580_v33, 0.0  ;;  %v14011_v55 = vpack.i.bf16 %v13998_v15, %v13982_v59  ;;  %v10669_v12 = vpack.c.bf16 %v13998_v15, %v13982_v59  ;;  %v14235_v59 = vld [vmem:[%s13301_s6 + $0x40] sm:$0xff] }
 0x3b7   : > { %v3593_v47 = vmax.f32 %v3581_v53, 0.0  ;;  %v3549_v54 = vpop.f32.mrb[10].mxu0  ;;  %v11661_v5 = vpack.i.bf16 %v14003_v49, %v13998_v15  ;;  %v11786_v2 = vpack.i.bf16 %v13960_v48, %v14003_v49  ;;  %v10667_v34 = vpack.c.bf16 %v14003_v49, %v13987_v3  ;;  %v6347_v15 = vld [vmem:[#allocation10 + $0x30] sm:$0xff] }
 0x3b8   : > { %v14022_v60 = vmul.f32 %v14000_v44, %v3592_v6  ;;  %v3586_v61 = vadd.f32 %v13945_v31, %v3549_v54  ;;  %v3551_v50 = vpop.f32.mrb[11].mxu0 }
 0x3b9   : > { %v3636_v9 = vmul.f32 %v14005_v17, %v3593_v47  ;;  %v3587_v16 = vadd.f32 %v13945_v31, %v3551_v50  ;;  %11697 = vrot.lane.b32.xlu0 %v13933_v18, %s12688_s27  ;;  %11662 = vrot.lane.b32.xlu1 %v11661_v5, %s12686_s26 }
 0x3ba   : > { %v3598_v27 = vmax.f32 %v3586_v61, 0.0  ;;  %v11796_v28 = vpack.i.bf16 %v14022_v60, %v13952_v19 }
 0x3bb   : > { %3649 = vst.msk [vmem:[#allocation3 + $0x30] sm:$0xff] %vm3648_vm10, %v3636_v9  ;;  %v3599_v20 = vmax.f32 %v3587_v16, 0.0 }
 0x3bc   : > { %v14034_v4 = vmul.f32 %v14000_v44, %v3598_v27  ;;  %v3658_v27 = vld [vmem:[%s13301_s6 + $0x10] sm:$0xff] }
 0x3bd   : > { %v3642_v56 = vmul.f32 %v14005_v17, %v3599_v20  ;;  %11707 = vrot.lane.b32.xlu0 %v13969_v40, %s12688_s27  ;;  %11672 = vrot.lane.b32.xlu1 %v13957_v46, %s12686_s26 }
 0x3be   : > { %v11681_v31 = vpack.i.bf16 %v14034_v4, %v14022_v60  ;;  %v11801_v51 = vpack.i.bf16 %v14034_v4, %v13963_v21  ;;  %v10677_v22 = vpack.c.bf16 %v14034_v4, %v14022_v60 }
 0x3bf   : > { %3655 = vst.msk [vmem:[#allocation3 + $0x70] sm:$0xff] %vm3648_vm10, %v3642_v56 }
 0x3c1   : > { %11717 = vrot.lane.b32.xlu0 %v11686_v41, %s12689_s16  ;;  %11682 = vrot.lane.b32.xlu1 %v11681_v31, %s12686_s26 }
 0x3c2   : > { %v14055_v32 = vld [vmem:[#allocation3 + $0x30] sm:$0xff] }
 0x3c5   : > { %11727 = vrot.lane.b32.xlu0 %v13933_v18, %s12689_s16  ;;  %11692 = vrot.lane.b32.xlu1 %v11661_v5, %s12688_s27 }
 0x3c6   : > { %v14053_v1 = vld [vmem:[#allocation3 + $0x70] sm:$0xff] }
 0x3c7   : > { %v10675_v25 = vpack.c.bf16 %v14053_v1, %v14055_v32  ;;  %v11776_v8 = vpack.i.bf16 %v14053_v1, %v14034_v4 }
 0x3c9   : > { %11737 = vrot.lane.b32.xlu0 %v13969_v40, %s12689_s16  ;;  %11702 = vrot.lane.b32.xlu1 %v13957_v46, %s12688_s27 }
 0x3cd   : > { %11747 = vrot.lane.b32.xlu0 %v11686_v41, %s12690_s30  ;;  %11712 = vrot.lane.b32.xlu1 %v11681_v31, %s12688_s27 }
 0x3d1   : > { %11757 = vrot.lane.b32.xlu0 %v13933_v18, %s12690_s30  ;;  %11722 = vrot.lane.b32.xlu1 %v11661_v5, %s12689_s16  ;;  %v11806_v18 = vpack.i.bf16 %v14053_v1, %v14055_v32  ;;  %v6352_v1 = vld [vmem:[#allocation10 + $0x58] sm:$0xff] }
 0x3d5   : > { %11767 = vrot.lane.b32.xlu0 %v13969_v40, %s12690_s30  ;;  %11732 = vrot.lane.b32.xlu1 %v13957_v46, %s12689_s16  ;;  %v11771_v40 = vpack.i.bf16 %v14055_v32, %v14022_v60 }
 0x3d9   : > { %11777 = vrot.lane.b32.xlu0 %v11776_v8, %s12690_s30  ;;  %11742 = vrot.lane.b32.xlu1 %v11681_v31, %s12689_s16 }
 0x3dd   : > { %11787 = vrot.lane.b32.xlu0 %v11786_v2, %s12691_s20  ;;  %11752 = vrot.lane.b32.xlu1 %v11661_v5, %s12690_s30 }
 0x3e1   : > { %11797 = vrot.lane.b32.xlu0 %v11796_v28, %s12691_s20  ;;  %11762 = vrot.lane.b32.xlu1 %v13957_v46, %s12690_s30  ;;  %v3675_v46 = vld [vmem:[%s713_s23 + $0x8] sm:$0xff]  ;;  %s12707_s23 = smov (!%p10354_p7), 109  }
 0x3e5   : > { %11807 = vrot.lane.b32.xlu0 %v11806_v18, %s12691_s20  ;;  %11772 = vrot.lane.b32.xlu1 %v11771_v40, %s12690_s30 }
 0x3e9   : > { %11817 = vrot.lane.b32.xlu0 %v11786_v2, %s12692_s18  ;;  %11782 = vrot.lane.b32.xlu1 %v13995_v43, %s12691_s20 }
 0x3ed   : > { %11827 = vrot.lane.b32.xlu0 %v11796_v28, %s12692_s18  ;;  %11792 = vrot.lane.b32.xlu1 %v14011_v55, %s12691_s20 }
 0x3f1   : > { %11837 = vrot.lane.b32.xlu0 %v11806_v18, %s12692_s18  ;;  %11802 = vrot.lane.b32.xlu1 %v11801_v51, %s12691_s20 }
 0x3f5   : > { %11847 = vrot.lane.b32.xlu0 %v11786_v2, %s12693_s29  ;;  %11812 = vrot.lane.b32.xlu1 %v13995_v43, %s12692_s18 }
 0x3f9   : > { %11857 = vrot.lane.b32.xlu0 %v11796_v28, %s12693_s29  ;;  %11822 = vrot.lane.b32.xlu1 %v14011_v55, %s12692_s18 }
 0x3fd   : > { %11867 = vrot.lane.b32.xlu0 %v11806_v18, %s12693_s29  ;;  %11832 = vrot.lane.b32.xlu1 %v11801_v51, %s12692_s18 }
 0x401   : > { %11877 = vrot.lane.b32.xlu0 %v11786_v2, %s12694_s19  ;;  %11842 = vrot.lane.b32.xlu1 %v13995_v43, %s12693_s29 }
 0x405   : > { %11887 = vrot.lane.b32.xlu0 %v11796_v28, %s12694_s19  ;;  %11852 = vrot.lane.b32.xlu1 %v14011_v55, %s12693_s29 }
 0x406   : > { %v11678_v13 = vpop.permute.xlu0 %11677 }
 0x407   : > { %v11679_v33 = vunpack.i.l.bf16 %v11678_v13 }
 0x409   : > { %11897 = vrot.lane.b32.xlu0 %v11806_v18, %s12694_s19  ;;  %11862 = vrot.lane.b32.xlu1 %v11801_v51, %s12693_s29 }
 0x40d   : > { %6326 = vperm.xlu0 %11655, %v3675_v46   ;;  %11872 = vrot.lane.b32.xlu1 %v13995_v43, %s12694_s19  ;;  %v11680_v43 = vunpack.i.h.bf16 %v11678_v13 }
 0x40f   : > { %v3732_v20 = vsel %vm962_vm1, %v11679_v33, %v11680_v43 }
 0x411   : > { %6742 = vperm.xlu0 %11655, %v6738_v23   ;;  %11882 = vrot.lane.b32.xlu1 %v14011_v55, %s12694_s19 }
 0x415   : > { %11892 = vrot.lane.b32.xlu1 %v11801_v51, %s12694_s19 }
 0x419   : > { %6321 = vperm.xlu1 %11654, %v3674_v24   ;;  %v3659_v24 = vld [vmem:[%s13301_s6 + $0x18] sm:$0xff] }
 0x41d   : > { %6659 = vperm.xlu1 %11654, %v6656_v30  }
 0x421   : > { %6747 = vperm.xlu1 %11654, %v6739_v38  }
 0x427   : > { %v11658_v35 = vpop.permute.xlu1 %11657  ;;  %v11688_v50 = vpop.permute.xlu0 %11687 }
 0x428   : > { %v11660_v57 = vunpack.i.h.bf16 %v11658_v35  ;;  %v11659_v39 = vunpack.i.l.bf16 %v11658_v35  ;;  %v11690_v40 = vunpack.i.h.bf16 %v11688_v50  ;;  %v11689_v46 = vunpack.i.l.bf16 %v11688_v50 }
 0x42a   : > { %v3724_v10 = vsel %vm962_vm1, %v11669_v52, %v11659_v39  ;;  %v3725_v6 = vsel %vm962_vm1, %v11659_v39, %v11660_v57  ;;  %v4008_v13 = vsel %vm1247_vm3, %v11689_v46, %v11690_v40 }
 0x42b   : > { %v11663_v7 = vpop.permute.xlu1 %11662  ;;  %v11698_v30 = vpop.permute.xlu0 %11697 }
 0x42c   : > { %v11665_v45 = vunpack.i.h.bf16 %v11663_v7  ;;  %v11664_v41 = vunpack.i.l.bf16 %v11663_v7 }
 0x42e   : > { %v3729_v53 = vsel %vm962_vm1, %v11670_v58, %v11664_v41  ;;  %v3730_v55 = vsel %vm962_vm1, %v11664_v41, %v11665_v45  ;;  %v3731_v9 = vsel %vm962_vm1, %v11665_v45, %v11679_v33  ;;  %v11700_v41 = vunpack.i.h.bf16 %v11698_v30 }
 0x42f   : > { %v10621_v47 = vpack.c.bf16 %v3729_v53, %v3724_v10  ;;  %v11673_v54 = vpop.permute.xlu1 %11672  ;;  %v10619_v5 = vpack.c.bf16 %v3730_v55, %v3725_v6  ;;  %v11708_v33 = vpop.permute.xlu0 %11707 }
 0x430   : > { %v11675_v2 = vunpack.i.h.bf16 %v11673_v54  ;;  %v11674_v61 = vunpack.i.l.bf16 %v11673_v54  ;;  %v11710_v6 = vunpack.i.h.bf16 %v11708_v33  ;;  %v11709_v55 = vunpack.i.l.bf16 %v11708_v33 }
 0x431   : > { %10620 = vmatprep.subr.bf16.mxu1 %v10619_v5 }
 0x432   : > { %v3726_v16 = vsel %vm962_vm1, %v11660_v57, %v11674_v61  ;;  %10622 = vmatpush1.bf16.msra.mxu1 %v10621_v47  ;;  %v3727_v28 = vsel %vm962_vm1, %v11674_v61, %v11675_v2  ;;  %v4015_v61 = vsel %vm1247_vm3, %v11709_v55, %v11710_v6 }
 0x433   : > { %v10625_v56 = vpack.c.bf16 %v3731_v9, %v3726_v16  ;;  %v11683_v31 = vpop.permute.xlu1 %11682  ;;  %v10623_v51 = vpack.c.bf16 %v3732_v20, %v3727_v28  ;;  %v11718_v16 = vpop.permute.xlu0 %11717 }
 0x434   : > { %v11685_v8 = vunpack.i.h.bf16 %v11683_v31  ;;  %v11684_v18 = vunpack.i.l.bf16 %v11683_v31  ;;  %v3656_v31 = vld [vmem:[%s13301_s6] sm:$0xff] }
 0x435   : > { %10279 = vmatmul.mubr.msk.f32.vlgmr.msra.gmra.mrb[4].mxu1 %vm985_vm2, %v3658_v27  ;;  %10624 = vmatprep.subr.bf16.mxu1 %v10623_v51 }
 0x436   : > { %v10627_v23 = vpack.c.bf16 %v11685_v8, %v11684_v18  ;;  %10626 = vmatpush1.bf16.msra.mxu1 %v10625_v56  ;;  %3822 = vmatprep.mubr.f32.mxu1 %v12687_v29  ;;  %v3733_v58 = vsel %vm962_vm1, %v11680_v43, %v11685_v8  ;;  %v3728_v52 = vsel %vm962_vm1, %v11675_v2, %v11684_v18  ;;  %v11699_v43 = vunpack.i.l.bf16 %v11698_v30  ;;  %v3657_v30 = vld [vmem:[%s13301_s6 + $0x8] sm:$0xff] }
 0x437   : > { %v11693_v38 = vpop.permute.xlu1 %11692  ;;  %v10629_v45 = vpack.c.bf16 %v3733_v58, %v3728_v52 }
 0x438   : > { %v11695_v36 = vunpack.i.h.bf16 %v11693_v38  ;;  %v11694_v35 = vunpack.i.l.bf16 %v11693_v38  ;;  %10628 = vmatprep.subr.bf16.mxu1 %v10627_v23  ;;  %v4007_v5 = vsel %vm1247_vm3, %v11699_v43, %v11689_v46  ;;  %v11728_v38 = vpop.permute.xlu0 %11727 }
 0x439   : > { %10280 = vmatmul.mubr.msk.f32.gmra.mrb[6].mxu1 %vm985_vm2, %v3659_v24 }
 0x43a   : > { %3893 = vmatprep.mubr.f32.mxu1 %v12687_v29  ;;  %v4013_v57 = vsel %vm1247_vm3, %v11694_v35, %v11695_v36  ;;  %v4012_v47 = vsel %vm1247_vm3, %v11700_v41, %v11694_v35  ;;  %v4014_v51 = vsel %vm1247_vm3, %v11695_v36, %v11709_v55 }
 0x43b   : > { %v11703_v39 = vpop.permute.xlu1 %11702  ;;  %v10631_v7 = vpack.c.bf16 %v4013_v57, %v4008_v13  ;;  %v10633_v2 = vpack.c.bf16 %v4012_v47, %v4007_v5 }
 0x43c   : > { %v11705_v10 = vunpack.i.h.bf16 %v11703_v39  ;;  %v11704_v53 = vunpack.i.l.bf16 %v11703_v39  ;;  %v11730_v39 = vunpack.i.h.bf16 %v11728_v38 }
 0x43d   : > { %10281 = vmatmul.mubr.msk.f32.vlgmr.msra.gmra.mrb[8].mxu1 %vm985_vm2, %v3658_v27 }
 0x43e   : > { %10630 = vmatpush1.bf16.msra.mxu1 %v10629_v45  ;;  %3899 = vmatprep.mubr.f32.mxu1 %v12687_v29  ;;  %v4010_v54 = vsel %vm1247_vm3, %v11704_v53, %v11705_v10  ;;  %v4009_v28 = vsel %vm1247_vm3, %v11690_v40, %v11704_v53  ;;  %v11720_v40 = vunpack.i.h.bf16 %v11718_v16 }
 0x43f   : > { %10632 = vmatprep.subr.bf16.mxu1 %v10631_v7  ;;  %v11713_v50 = vpop.permute.xlu1 %11712  ;;  %v10635_v9 = vpack.c.bf16 %v4015_v61, %v4010_v54  ;;  %v11738_v7 = vpop.permute.xlu0 %11737 }
 0x440   : > { %v11715_v20 = vunpack.i.h.bf16 %v11713_v50  ;;  %v11714_v56 = vunpack.i.l.bf16 %v11713_v50  ;;  %v11740_v53 = vunpack.i.h.bf16 %v11738_v7  ;;  %v11739_v43 = vunpack.i.l.bf16 %v11738_v7 }
 0x441   : > { %10282 = vmatmul.mubr.msk.f32.gmra.mrb[10].mxu1 %vm985_vm2, %v3659_v24 }
 0x442   : > { %3970 = vmatprep.mubr.f32.mxu1 %v12687_v29  ;;  %v10639_v18 = vpack.c.bf16 %v11715_v20, %v11714_v56  ;;  %v4016_v35 = vsel %vm1247_vm3, %v11710_v6, %v11715_v20  ;;  %v4011_v58 = vsel %vm1247_vm3, %v11705_v10, %v11714_v56  ;;  %v11729_v10 = vunpack.i.l.bf16 %v11728_v38  ;;  %v3660_v20 = vld [vmem:[%s13301_s6 + $0x20] sm:$0xff] }
 0x443   : > { %v11723_v8 = vpop.permute.xlu1 %11722  ;;  %v10641_v13 = vpack.c.bf16 %v4016_v35, %v4011_v58  ;;  %v4298_v5 = vsel %vm1531_vm4, %v11739_v43, %v11740_v53  ;;  %v11748_v50 = vpop.permute.xlu0 %11747 }
 0x444   : > { %v11725_v46 = vunpack.i.h.bf16 %v11723_v8  ;;  %v11724_v23 = vunpack.i.l.bf16 %v11723_v8 }
 0x445   : > { %10283 = vmatmul.mubr.msk.f32.vlgmr.msra.gmra.mrb[12].mxu1 %vm985_vm2, %v3658_v27  ;;  %v10637_v27 = vpack.c.bf16 %v4014_v51, %v4009_v28 }
 0x446   : > { %10634 = vmatpush1.bf16.msra.mxu1 %v10633_v2  ;;  %3976 = vmatprep.mubr.f32.mxu1 %v12687_v29  ;;  %v4296_v36 = vsel %vm1531_vm4, %v11724_v23, %v11725_v46  ;;  %v4295_v6 = vsel %vm1531_vm4, %v11730_v39, %v11724_v23  ;;  %v4297_v56 = vsel %vm1531_vm4, %v11725_v46, %v11739_v43  ;;  %v3661_v23 = vld [vmem:[%s13301_s6 + $0x28] sm:$0xff] }
 0x447   : > { %10636 = vmatprep.subr.bf16.mxu1 %v10635_v9  ;;  %v11733_v52 = vpop.permute.xlu1 %11732  ;;  %v11758_v38 = vpop.permute.xlu0 %11757 }
 0x448   : > { %v11735_v41 = vunpack.i.h.bf16 %v11733_v52  ;;  %v11734_v33 = vunpack.i.l.bf16 %v11733_v52 }
 0x449   : > { %10284 = vmatmul.mubr.msk.f32.gmra.mrb[14].mxu1 %vm985_vm2, %v3659_v24  ;;  %v11719_v24 = vunpack.i.l.bf16 %v11718_v16 }
 0x44a   : > { %4099 = vmatprep.mubr.f32.mxu1 %v12687_v29  ;;  %v4293_v55 = vsel %vm1531_vm4, %v11734_v33, %v11735_v41  ;;  %v4292_v9 = vsel %vm1531_vm4, %v11720_v40, %v11734_v33 }
 0x44b   : > { %v4291_v57 = vsel %vm1531_vm4, %v11719_v24, %v11720_v40  ;;  %v4290_v47 = vsel %vm1531_vm4, %v11729_v10, %v11719_v24  ;;  %v11743_v2 = vpop.permute.xlu1 %11742  ;;  %v10647_v61 = vpack.c.bf16 %v4298_v5, %v4293_v55  ;;  %v11750_v40 = vunpack.i.h.bf16 %v11748_v50 }
 0x44c   : > { %v10643_v45 = vpack.c.bf16 %v4296_v36, %v4291_v57  ;;  %v10645_v54 = vpack.c.bf16 %v4295_v6, %v4290_v47  ;;  %v11745_v16 = vunpack.i.h.bf16 %v11743_v2  ;;  %v11744_v28 = vunpack.i.l.bf16 %v11743_v2  ;;  %v11768_v57 = vpop.permute.xlu0 %11767 }
 0x44d   : > { %10285 = vmatmul.mubr.msk.f32.vlgmr.msra.gmra.mrb[4].mxu1 %vm985_vm2, %v3656_v31  ;;  %v11770_v33 = vunpack.i.h.bf16 %v11768_v57  ;;  %v11769_v10 = vunpack.i.l.bf16 %v11768_v57  ;;  %v6343_v57 = vld [vmem:[#allocation10 + $0x10] sm:$0xff] }
 0x44e   : > { %10638 = vmatpush1.bf16.msra.mxu1 %v10637_v27  ;;  %4105 = vmatprep.mubr.f32.mxu1 %v12687_v29  ;;  %v10651_v8 = vpack.c.bf16 %v11745_v16, %v11744_v28  ;;  %v4299_v24 = vsel %vm1531_vm4, %v11740_v53, %v11745_v16  ;;  %v4294_v35 = vsel %vm1531_vm4, %v11735_v41, %v11744_v28  ;;  %v11759_v41 = vunpack.i.l.bf16 %v11758_v38 }
 0x44f   : > { %10640 = vmatprep.subr.bf16.mxu1 %v10639_v18  ;;  %v11753_v51 = vpop.permute.xlu1 %11752  ;;  %v10653_v36 = vpack.c.bf16 %v4299_v24, %v4294_v35  ;;  %v6358_v24 = vld [vmem:[#allocation10 + $0x88] sm:$0xff]  ;;  %v6341_v35 = vld [vmem:[#allocation10] sm:$0xff] }
 0x450   : > { %v11755_v27 = vunpack.i.h.bf16 %v11753_v51  ;;  %v11754_v18 = vunpack.i.l.bf16 %v11753_v51  ;;  %v11778_v5 = vpop.permute.xlu0 %11777 }
 0x451   : > { %10286 = vmatmul.mubr.msk.f32.gmra.mrb[6].mxu1 %vm985_vm2, %v3657_v30  ;;  %v11779_v16 = vunpack.i.l.bf16 %v11778_v5 }
 0x452   : > { %4176 = vmatprep.mubr.f32.mxu1 %v12687_v29  ;;  %v4624_v46 = vsel %vm1859_vm5, %v11754_v18, %v11755_v27 }
 0x453   : > { %v11763_v58 = vpop.permute.xlu1 %11762 }
 0x454   : > { %v11765_v7 = vunpack.i.h.bf16 %v11763_v58  ;;  %v14237_v19 = vpop.permute.xlu0 %11787 }
 0x455   : > { %10287 = vmatmul.mubr.msk.f32.vlgmr.msra.gmra.mrb[8].mxu1 %vm985_vm2, %v3656_v31 }
 0x456   : > { %10642 = vmatpush1.bf16.msra.mxu1 %v10641_v13  ;;  %4182 = vmatprep.mubr.f32.mxu1 %v12687_v29  ;;  %v11760_v13 = vunpack.i.h.bf16 %v11758_v38  ;;  %v3663_v38 = vld [vmem:[%s13301_s6 + $0x38] sm:$0xff] }
 0x457   : > { %10644 = vmatprep.subr.bf16.mxu1 %v10643_v45  ;;  %v11764_v45 = vunpack.i.l.bf16 %v11763_v58  ;;  %v11773_v55 = vpop.permute.xlu1 %11772  ;;  %v6342_v58 = vld [vmem:[#allocation10 + $0x8] sm:$0xff] }
 0x458   : > { %v4623_v53 = vsel %vm1859_vm5, %v11760_v13, %v11754_v18  ;;  %v10729_v13 = vpack.c.bf16 %v6342_v58, %v6341_v35  ;;  %v6353_v58 = vld [vmem:[#allocation10 + $0x60] sm:$0xff] }
 0x459   : > { %10288 = vmatmul.mubr.msk.f32.gmra.mrb[10].mxu1 %vm985_vm2, %v3657_v30  ;;  %v4620_v43 = vsel %vm1859_vm5, %v11764_v45, %v11765_v7  ;;  %v4619_v28 = vsel %vm1859_vm5, %v11750_v40, %v11764_v45 }
 0x45a   : > { %4253 = vmatprep.mubr.f32.mxu1 %v12687_v29 }
 0x45d   : > { %10289 = vmatmul.mubr.msk.f32.vlgmr.msra.gmra.mrb[12].mxu1 %vm985_vm2, %v3656_v31  ;;  %v10649_v31 = vpack.c.bf16 %v4297_v56, %v4292_v9  ;;  %v11780_v9 = vunpack.i.h.bf16 %v11778_v5  ;;  %v3662_v56 = vld [vmem:[%s13301_s6 + $0x30] sm:$0xff] }
 0x45e   : > { %10646 = vmatpush1.bf16.msra.mxu1 %v10645_v54  ;;  %4259 = vmatprep.mubr.f32.mxu1 %v12687_v29  ;;  %v4626_v54 = vsel %vm1859_vm5, %v11769_v10, %v11770_v33 }
 0x45f   : > { %10648 = vmatprep.subr.bf16.mxu1 %v10647_v61  ;;  %v10659_v2 = vpack.c.bf16 %v4626_v54, %v4620_v43  ;;  %v11775_v61 = vunpack.i.h.bf16 %v11773_v55  ;;  %v6364_v43 = vld [vmem:[#allocation10 + $0xb8] sm:$0xff]  ;;  %v6366_v54 = vld [vmem:[#allocation10 + $0xc8] sm:$0xff] }
 0x461   : > { %10290 = vmatmul.mubr.msk.f32.gmra.mrb[14].mxu1 %vm985_vm2, %v3657_v30  ;;  %v11749_v30 = vunpack.i.l.bf16 %v11748_v50  ;;  %v11774_v50 = vunpack.i.l.bf16 %v11773_v55 }
 0x462   : > { %4382 = vmatprep.mubr.f32.mxu1 %v12687_v29 }
 0x463   : > { %v4618_v52 = vsel %vm1859_vm5, %v11749_v30, %v11750_v40  ;;  %v4617_v6 = vsel %vm1859_vm5, %v11759_v41, %v11749_v30  ;;  %v4622_v51 = vsel %vm1859_vm5, %v11774_v50, %v11775_v61  ;;  %v4627_v40 = vsel %vm1859_vm5, %v11770_v33, %v11779_v16  ;;  %v6357_v30 = vld [vmem:[#allocation10 + $0x80] sm:$0xff]  ;;  %v6362_v41 = vld [vmem:[#allocation10 + $0xa8] sm:$0xff] }
 0x464   : > { %v10655_v39 = vpack.c.bf16 %v4624_v46, %v4618_v52  ;;  %v10657_v47 = vpack.c.bf16 %v4623_v53, %v4617_v6  ;;  %v10727_v46 = vpack.c.bf16 %v6358_v24, %v6357_v30  ;;  %v6360_v52 = vld [vmem:[#allocation10 + $0x98] sm:$0xff]  ;;  %v6346_v33 = vld [vmem:[#allocation10 + $0x28] sm:$0xff]  ;;  %v6363_v53 = vld [vmem:[#allocation10 + $0xb0] sm:$0xff] }
 0x465   : > { %10291 = vmatmul.mubr.msk.f32.vlgmr.msra.gmra.mrb[4].mxu1 %vm985_vm2, %v3660_v20  ;;  %v10739_v55 = vpack.c.bf16 %v6364_v43, %v6363_v53  ;;  %v14248_v61 = vld [vmem:[%s13301_s6 + $0x48] sm:$0xff]  ;;  %v3666_v53 = vld [vmem:[%s13301_s6 + $0x50] sm:$0xff] }
 0x466   : > { %10650 = vmatpush1.bf16.msra.mxu1 %v10649_v31  ;;  %4388 = vmatprep.mubr.f32.mxu1 %v12687_v29 }
 0x467   : > { %10652 = vmatprep.subr.bf16.mxu1 %v10651_v8  ;;  %v4628_v8 = vsel %vm1859_vm5, %v11779_v16, %v11780_v9  ;;  %10728 = vmatprep.subr.bf16.mxu0 %v10727_v46  ;;  %v6349_v9 = vld [vmem:[#allocation10 + $0x40] sm:$0xff]  ;;  %v6350_v16 = vld [vmem:[#allocation10 + $0x48] sm:$0xff] }
 0x468   : > { %v10663_v18 = vpack.c.bf16 %v4628_v8, %v4622_v51  ;;  %10730 = vmatpush3.bf16.msra.mxu0 %v10729_v13  ;;  %v6367_v51 = vld [vmem:[#allocation10 + $0xd0] sm:$0xff]  ;;  %v10745_v0 = vpack.c.bf16 %v6350_v16, %v6349_v9  ;;  %v6370_v8 = vld [vmem:[#allocation10 + $0xe8] sm:$0xff] }
 0x469   : > { %10292 = vmatmul.mubr.msk.f32.gmra.mrb[6].mxu1 %vm985_vm2, %v3661_v23 }
 0x46a   : > { %4459 = vmatprep.mubr.f32.mxu1 %v12687_v29 }
 0x46d   : > { %10293 = vmatmul.mubr.msk.f32.vlgmr.msra.gmra.mrb[8].mxu1 %vm985_vm2, %v3660_v20 }
 0x46e   : > { %10654 = vmatpush1.bf16.msra.mxu1 %v10653_v36  ;;  %4465 = vmatprep.mubr.f32.mxu1 %v12687_v29  ;;  %v6359_v36 = vld [vmem:[#allocation10 + $0x90] sm:$0xff] }
 0x46f   : > { %10656 = vmatprep.subr.bf16.mxu1 %v10655_v39  ;;  %v6344_v39 = vld [vmem:[#allocation10 + $0x18] sm:$0xff]  ;;  %v10731_v45 = vpack.c.bf16 %v6360_v52, %v6359_v36  ;;  %v6354_v36 = vld [vmem:[#allocation10 + $0x68] sm:$0xff] }
 0x470   : > { %v10733_v3 = vpack.c.bf16 %v6344_v39, %v6343_v57 }
 0x471   : > { %10294 = vmatmul.mubr.msk.f32.gmra.mrb[10].mxu1 %vm985_vm2, %v3661_v23  ;;  %10732 = vmatprep.subr.bf16.mxu0 %v10731_v45 }
 0x472   : > { %4536 = vmatprep.mubr.f32.mxu1 %v12687_v29  ;;  %10734 = vmatpush3.bf16.msra.mxu0 %v10733_v3 }
 0x475   : > { %10295 = vmatmul.mubr.msk.f32.vlgmr.msra.gmra.mrb[12].mxu1 %vm985_vm2, %v3660_v20  ;;  %v4625_v20 = vsel %vm1859_vm5, %v11755_v27, %v11769_v10  ;;  %v14227_v10 = vpop.permute.xlu1 %11782 }
 0x476   : > { %10658 = vmatpush1.bf16.msra.mxu1 %v10657_v47  ;;  %4542 = vmatprep.mubr.f32.mxu1 %v12687_v29  ;;  %v10661_v31 = vpack.c.bf16 %v4625_v20, %v4619_v28  ;;  %v6365_v47 = vld [vmem:[#allocation10 + $0xc0] sm:$0xff]  ;;  %v11785_v5 = vunpack.i.h.bf16 %v14227_v10  ;;  %v11790_v28 = vunpack.i.h.bf16 %v14237_v19  ;;  %v6368_v20 = vld [vmem:[#allocation10 + $0xd8] sm:$0xff] }
 0x477   : > { %10660 = vmatprep.subr.bf16.mxu1 %v10659_v2  ;;  %v11784_v2 = vunpack.i.l.bf16 %v14227_v10 }
 0x479   : > { %10296 = vmatmul.mubr.msk.f32.gmra.mrb[14].mxu1 %vm985_vm2, %v3661_v23  ;;  %v4621_v23 = vsel %vm1859_vm5, %v11765_v7, %v11774_v50  ;;  %v6361_v7 = vld [vmem:[#allocation10 + $0xa0] sm:$0xff]  ;;  %v11793_v21 = vpop.permute.xlu1 %11792  ;;  %v10743_v50 = vpack.c.bf16 %v6366_v54, %v6365_v47  ;;  %v5164_v48 = vsel %vm2406_vm6, %v11784_v2, %v11785_v5 }
 0x47a   : > { %4711 = vmatprep.mubr.f32.mxu1 %v12687_v29  ;;  %v10665_v27 = vpack.c.bf16 %v4627_v40, %v4621_v23  ;;  %v10735_v49 = vpack.c.bf16 %v6362_v41, %v6361_v7  ;;  %v11795_v23 = vunpack.i.h.bf16 %v11793_v21  ;;  %v11794_v40 = vunpack.i.l.bf16 %v11793_v21  ;;  %v3667_v54 = vld [vmem:[%s13301_s6 + $0x58] sm:$0xff] }
 0x47b   : > { %v10753_v7 = vpack.c.bf16 %v6354_v36, %v6353_v58 }
 0x47c   : > { %10736 = vmatprep.subr.bf16.mxu0 %v10735_v49  ;;  %v5163_v39 = vsel %vm2406_vm6, %v11794_v40, %v11784_v2 }
 0x47d   : > { %10297 = vmatmul.mubr.msk.f32.vlgmr.msra.gmra.mrb[4].mxu1 %vm985_vm2, %v3662_v56  ;;  %v14261_v32 = vpop.permute.xlu1 %11802 }
 0x47e   : > { %10662 = vmatpush1.bf16.msra.mxu1 %v10661_v31  ;;  %4717 = vmatprep.mubr.f32.mxu1 %v12687_v29  ;;  %v6369_v31 = vld [vmem:[#allocation10 + $0xe0] sm:$0xff]  ;;  %v11805_v24 = vunpack.i.h.bf16 %v14261_v32  ;;  %v11804_v35 = vunpack.i.l.bf16 %v14261_v32 }
 0x47f   : > { %10664 = vmatprep.subr.bf16.mxu1 %v10663_v18  ;;  %v10751_v46 = vpack.c.bf16 %v6370_v8, %v6369_v31 }
 0x480   : > { %v5171_v60 = vsel %vm2406_vm6, %v11804_v35, %v11805_v24 }
 0x481   : > { %10298 = vmatmul.mubr.msk.f32.gmra.mrb[6].mxu1 %vm985_vm2, %v3663_v38  ;;  %v14282_v3 = vpop.permute.xlu1 %11812 }
 0x482   : > { %4788 = vmatprep.mubr.f32.mxu1 %v12687_v29  ;;  %v11814_v47 = vunpack.i.l.bf16 %v14282_v3 }
 0x485   : > { %10299 = vmatmul.mubr.msk.f32.vlgmr.msra.gmra.mrb[8].mxu1 %vm985_vm2, %v3662_v56 }
 0x486   : > { %10666 = vmatpush1.bf16.msra.mxu1 %v10665_v27  ;;  %4794 = vmatprep.mubr.f32.mxu1 %v12687_v29 }
 0x487   : > { %10668 = vmatprep.subr.bf16.mxu1 %v10667_v34  ;;  %v6345_v34 = vld [vmem:[#allocation10 + $0x20] sm:$0xff] }
 0x488   : > { %v10737_v6 = vpack.c.bf16 %v6346_v33, %v6345_v34  ;;  %v5170_v33 = vsel %vm2406_vm6, %v11790_v28, %v11804_v35 }
 0x489   : > { %10300 = vmatmul.mubr.msk.f32.gmra.mrb[10].mxu1 %vm985_vm2, %v3663_v38 }
 0x48a   : > { %4865 = vmatprep.mubr.f32.mxu1 %v12687_v29  ;;  %10738 = vmatpush3.bf16.msra.mxu0 %v10737_v6 }
 0x48b   : > { %10740 = vmatprep.subr.bf16.mxu0 %v10739_v55  ;;  %v11815_v55 = vunpack.i.h.bf16 %v14282_v3 }
 0x48d   : > { %10301 = vmatmul.mubr.msk.f32.vlgmr.msra.gmra.mrb[12].mxu1 %vm985_vm2, %v3662_v56  ;;  %v11789_v56 = vunpack.i.l.bf16 %v14237_v19 }
 0x48e   : > { %10670 = vmatpush1.bf16.msra.mxu1 %v10669_v12  ;;  %4871 = vmatprep.mubr.f32.mxu1 %v12687_v29  ;;  %v6348_v12 = vld [vmem:[#allocation10 + $0x38] sm:$0xff] }
 0x48f   : > { %10672 = vmatprep.subr.bf16.mxu1 %v10671_v26  ;;  %v10741_v26 = vpack.c.bf16 %v6348_v12, %v6347_v15  ;;  %v5169_v18 = vsel %vm2406_vm6, %v11789_v56, %v11790_v28  ;;  %v5168_v57 = vsel %vm2406_vm6, %v11795_v23, %v11789_v56  ;;  %v11823_v12 = vpop.permute.xlu1 %11822 }
 0x490   : > { %v10679_v27 = vpack.c.bf16 %v5169_v18, %v5164_v48  ;;  %v10681_v4 = vpack.c.bf16 %v5168_v57, %v5163_v39  ;;  %v11825_v16 = vunpack.i.h.bf16 %v11823_v12  ;;  %v11824_v28 = vunpack.i.l.bf16 %v11823_v12  ;;  %v3669_v57 = vld [vmem:[%s13301_s6 + $0x68] sm:$0xff] }
 0x491   : > { %10302 = vmatmul.mubr.msk.f32.gmra.mrb[14].mxu1 %vm985_vm2, %v3663_v38  ;;  %10742 = vmatpush3.bf16.msra.mxu0 %v10741_v26  ;;  %v11798_v38 = vpop.permute.xlu0 %11797  ;;  %v5459_v26 = vsel %vm2702_vm7, %v11814_v47, %v11815_v55 }
 0x492   : > { %4960 = vmatprep.mubr.f32.mxu1 %v12687_v29  ;;  %10744 = vmatprep.subr.bf16.mxu0 %v10743_v50  ;;  %v11800_v52 = vunpack.i.h.bf16 %v11798_v38  ;;  %v11799_v13 = vunpack.i.l.bf16 %v11798_v38 }
 0x493   : > { %v11833_v2 = vpop.permute.xlu1 %11832 }
 0x494   : > { %v5165_v43 = vsel %vm2406_vm6, %v11785_v5, %v11799_v13 }
 0x495   : > { %10303 = vmatmul.mubr.msk.f32.vlgmr.msra.gmra.mrb[4].mxu1 %vm985_vm2, %v14235_v59  ;;  %10746 = vmatpush3.bf16.msra.mxu0 %v10745_v0  ;;  %v11808_v41 = vpop.permute.xlu0 %11807  ;;  %v10685_v6 = vpack.c.bf16 %v5170_v33, %v5165_v43 }
 0x496   : > { %10674 = vmatpush1.bf16.msra.mxu1 %v10673_v14  ;;  %4966 = vmatprep.mubr.f32.mxu1 %v12687_v29  ;;  %v6351_v14 = vld [vmem:[#allocation10 + $0x50] sm:$0xff]  ;;  %v11810_v49 = vunpack.i.h.bf16 %v11808_v41  ;;  %v11809_v34 = vunpack.i.l.bf16 %v11808_v41 }
 0x497   : > { %10676 = vmatprep.subr.bf16.mxu1 %v10675_v25  ;;  %v10747_v25 = vpack.c.bf16 %v6368_v20, %v6367_v51  ;;  %v10749_v30 = vpack.c.bf16 %v6352_v1, %v6351_v14  ;;  %v11835_v51 = vunpack.i.h.bf16 %v11833_v2  ;;  %v11834_v20 = vunpack.i.l.bf16 %v11833_v2  ;;  %v14313_v38 = vpop.permute.xlu1 %11842 }
 0x498   : > { %v5172_v10 = vsel %vm2406_vm6, %v11805_v24, %v11810_v49  ;;  %v5167_v5 = vsel %vm2406_vm6, %v11800_v52, %v11809_v34  ;;  %v5458_v1 = vsel %vm2702_vm7, %v11824_v28, %v11814_v47 }
 0x499   : > { %10304 = vmatmul.mubr.msk.f32.gmra.mrb[6].mxu1 %vm985_vm2, %v14248_v61  ;;  %10748 = vmatprep.subr.bf16.mxu0 %v10747_v25  ;;  %v11818_v15 = vpop.permute.xlu0 %11817  ;;  %v5466_v32 = vsel %vm2702_vm7, %v11834_v20, %v11835_v51 }
 0x49a   : > { %5037 = vmatprep.mubr.f32.mxu1 %v12687_v29  ;;  %10750 = vmatpush3.bf16.msra.mxu0 %v10749_v30  ;;  %v11820_v19 = vunpack.i.h.bf16 %v11818_v15  ;;  %v11819_v21 = vunpack.i.l.bf16 %v11818_v15  ;;  %v3668_v30 = vld [vmem:[%s13301_s6 + $0x60] sm:$0xff] }
 0x49b   : > { %10752 = vmatprep.subr.bf16.mxu0 %v10751_v46  ;;  %v11853_v36 = vpop.permute.xlu1 %11852 }
 0x49c   : > { %v5464_v50 = vsel %vm2702_vm7, %v11819_v21, %v11820_v19  ;;  %v5463_v14 = vsel %vm2702_vm7, %v11825_v16, %v11819_v21  ;;  %v11854_v33 = vunpack.i.l.bf16 %v11853_v36 }
 0x49d   : > { %10305 = vmatmul.mubr.msk.f32.vlgmr.msra.gmra.mrb[8].mxu1 %vm985_vm2, %v14235_v59  ;;  %v11828_v9 = vpop.permute.xlu0 %11827  ;;  %v10691_v56 = vpack.c.bf16 %v5464_v50, %v5459_v26  ;;  %v10693_v25 = vpack.c.bf16 %v5463_v14, %v5458_v1  ;;  %v3670_v50 = vld [vmem:[%s13301_s6 + $0x70] sm:$0xff] }
 0x49e   : > { %10678 = vmatpush1.bf16.msra.mxu1 %v10677_v22  ;;  %5043 = vmatprep.mubr.f32.mxu1 %v12687_v29  ;;  %v5166_v22 = vsel %vm2406_vm6, %v11799_v13, %v11800_v52  ;;  %v11830_v0 = vunpack.i.h.bf16 %v11828_v9  ;;  %v11829_v48 = vunpack.i.l.bf16 %v11828_v9  ;;  %v11845_v52 = vunpack.i.h.bf16 %v14313_v38 }
 0x49f   : > { %10680 = vmatprep.subr.bf16.mxu1 %v10679_v27  ;;  %v10683_v45 = vpack.c.bf16 %v5171_v60, %v5166_v22  ;;  %10754 = vmatpush3.bf16.msra.mxu0 %v10753_v7  ;;  %v5465_v27 = vsel %vm2702_vm7, %v11820_v19, %v11834_v20  ;;  %v11844_v13 = vunpack.i.l.bf16 %v14313_v38 }
 0x4a0   : > { %v5461_v31 = vsel %vm2702_vm7, %v11829_v48, %v11830_v0  ;;  %v5460_v24 = vsel %vm2702_vm7, %v11815_v55, %v11829_v48  ;;  %v3671_v48 = vld [vmem:[%s13301_s6 + $0x78] sm:$0xff] }
 0x4a1   : > { %10306 = vmatmul.mubr.msk.f32.gmra.mrb[10].mxu1 %vm985_vm2, %v14248_v61  ;;  %v10695_v8 = vpack.c.bf16 %v5466_v32, %v5461_v31  ;;  %v11838_v18 = vpop.permute.xlu0 %11837  ;;  %v10697_v35 = vpack.c.bf16 %v5465_v27, %v5460_v24  ;;  %v5753_v55 = vsel %vm2998_vm8, %v11854_v33, %v11844_v13  ;;  %v3673_v33 = vld [vmem:[%s13301_s6 + $0x88] sm:$0xff] }
 0x4a2   : > { %5114 = vmatprep.mubr.f32.mxu1 %v12687_v29  ;;  %v11840_v23 = vunpack.i.h.bf16 %v11838_v18  ;;  %v11839_v40 = vunpack.i.l.bf16 %v11838_v18 }
 0x4a4   : > { %v10699_v46 = vpack.c.bf16 %v11840_v23, %v11839_v40  ;;  %v5467_v60 = vsel %vm2702_vm7, %v11835_v51, %v11840_v23  ;;  %v5462_v22 = vsel %vm2702_vm7, %v11830_v0, %v11839_v40 }
 0x4a5   : > { %10307 = vmatmul.mubr.msk.f32.vlgmr.msra.gmra.mrb[12].mxu1 %vm985_vm2, %v14235_v59  ;;  %v10687_v59 = vpack.c.bf16 %v11810_v49, %v11809_v34  ;;  %v11848_v58 = vpop.permute.xlu0 %11847  ;;  %v10701_v41 = vpack.c.bf16 %v5467_v60, %v5462_v22  ;;  %v11855_v34 = vunpack.i.h.bf16 %v11853_v36 }
 0x4a6   : > { %10682 = vmatpush1.bf16.msra.mxu1 %v10681_v4  ;;  %5120 = vmatprep.mubr.f32.mxu1 %v12687_v29  ;;  %v11850_v39 = vunpack.i.h.bf16 %v11848_v58  ;;  %v11849_v7 = vunpack.i.l.bf16 %v11848_v58  ;;  %v5754_v4 = vsel %vm2998_vm8, %v11844_v13, %v11845_v52 }
 0x4a7   : > { %10684 = vmatprep.subr.bf16.mxu1 %v10683_v45  ;;  %v11863_v45 = vpop.permute.xlu1 %11862 }
 0x4a8   : > { %v5759_v3 = vsel %vm2998_vm8, %v11849_v7, %v11850_v39  ;;  %v11865_v43 = vunpack.i.h.bf16 %v11863_v45  ;;  %v5758_v12 = vsel %vm2998_vm8, %v11855_v34, %v11849_v7 }
 0x4a9   : > { %10308 = vmatmul.mubr.msk.f32.gmra.mrb[14].mxu1 %vm985_vm2, %v14248_v61  ;;  %v10689_v61 = vpack.c.bf16 %v5172_v10, %v5167_v5  ;;  %v11858_v49 = vpop.permute.xlu0 %11857 }
 0x4aa   : > { %5255 = vmatprep.mubr.f32.mxu1 %v12687_v29  ;;  %v11859_v15 = vunpack.i.l.bf16 %v11858_v49 }
 0x4ab   : > { %v14341_v26 = vpop.permute.xlu1 %11872 }
 0x4ac   : > { %v5755_v9 = vsel %vm2998_vm8, %v11845_v52, %v11859_v15  ;;  %v11875_v20 = vunpack.i.h.bf16 %v14341_v26  ;;  %v11874_v0 = vunpack.i.l.bf16 %v14341_v26  ;;  %v6373_v26 = vld [vmem:[#allocation10 + $0x100] sm:$0xff] }
 0x4ad   : > { %10309 = vmatmul.mubr.msk.f32.vlgmr.msra.gmra.mrb[4].mxu1 %vm985_vm2, %v3666_v53  ;;  %v11868_v10 = vpop.permute.xlu0 %11867 }
 0x4ae   : > { %10686 = vmatpush1.bf16.msra.mxu1 %v10685_v6  ;;  %5261 = vmatprep.mubr.f32.mxu1 %v12687_v29  ;;  %v11864_v6 = vunpack.i.l.bf16 %v11863_v45  ;;  %v11870_v5 = vunpack.i.h.bf16 %v11868_v10  ;;  %v11869_v2 = vunpack.i.l.bf16 %v11868_v10 }
 0x4af   : > { %10688 = vmatprep.subr.bf16.mxu1 %v10687_v59  ;;  %v11860_v59 = vunpack.i.h.bf16 %v11858_v49  ;;  %v11883_v51 = vpop.permute.xlu1 %11882 }
 0x4b0   : > { %v5761_v47 = vsel %vm2998_vm8, %v11864_v6, %v11865_v43  ;;  %v10711_v28 = vpack.c.bf16 %v11870_v5, %v11869_v2  ;;  %v5762_v32 = vsel %vm2998_vm8, %v11865_v43, %v11870_v5  ;;  %v11885_v40 = vunpack.i.h.bf16 %v11883_v51  ;;  %v6374_v5 = vld [vmem:[#allocation10 + $0x108] sm:$0xff] }
 0x4b1   : > { %10310 = vmatmul.mubr.msk.f32.gmra.mrb[6].mxu1 %vm985_vm2, %v3667_v54  ;;  %v5756_v19 = vsel %vm2998_vm8, %v11859_v15, %v11860_v59  ;;  %v5757_v31 = vsel %vm2998_vm8, %v11860_v59, %v11869_v2  ;;  %v11884_v27 = vunpack.i.l.bf16 %v11883_v51  ;;  %v6371_v59 = vld [vmem:[#allocation10 + $0xf0] sm:$0xff]  ;;  %v6372_v15 = vld [vmem:[#allocation10 + $0xf8] sm:$0xff] }
 0x4b2   : > { %5332 = vmatprep.mubr.f32.mxu1 %v12687_v29  ;;  %v10707_v21 = vpack.c.bf16 %v5761_v47, %v5756_v19  ;;  %v10713_v18 = vpack.c.bf16 %v5762_v32, %v5757_v31  ;;  %v6356_v47 = vld [vmem:[#allocation10 + $0x78] sm:$0xff]  ;;  %v6389_v19 = vld [vmem:[#allocation10 + $0x180] sm:$0xff]  ;;  %v6394_v32 = vld [vmem:[#allocation10 + $0x1a8] sm:$0xff] }
 0x4b3   : > { %v6048_v52 = vsel %vm3294_vm9, %v11884_v27, %v11874_v0  ;;  %v6378_v27 = vld [vmem:[#allocation10 + $0x128] sm:$0xff] }
 0x4b5   : > { %10311 = vmatmul.mubr.msk.f32.vlgmr.msra.gmra.mrb[8].mxu1 %vm985_vm2, %v3666_v53 }
 0x4b6   : > { %10690 = vmatpush1.bf16.msra.mxu1 %v10689_v61  ;;  %5338 = vmatprep.mubr.f32.mxu1 %v12687_v29  ;;  %v5760_v61 = vsel %vm2998_vm8, %v11850_v39, %v11864_v6 }
 0x4b7   : > { %10692 = vmatprep.subr.bf16.mxu1 %v10691_v56  ;;  %v10709_v16 = vpack.c.bf16 %v5760_v61, %v5755_v9  ;;  %v11878_v56 = vpop.permute.xlu0 %11877  ;;  %v6391_v61 = vld [vmem:[#allocation10 + $0x190] sm:$0xff] }
 0x4b8   : > { %v11880_v14 = vunpack.i.h.bf16 %v11878_v56  ;;  %v11879_v1 = vunpack.i.l.bf16 %v11878_v56  ;;  %v10761_v56 = vpack.c.bf16 %v6374_v5, %v6373_v26  ;;  %v6386_v26 = vld [vmem:[#allocation10 + $0x168] sm:$0xff]  ;;  %v6403_v5 = vld [vmem:[#allocation10 + $0x1f0] sm:$0xff] }
 0x4b9   : > { %10312 = vmatmul.mubr.msk.f32.gmra.mrb[10].mxu1 %vm985_vm2, %v3667_v54 }
 0x4ba   : > { %5409 = vmatprep.mubr.f32.mxu1 %v12687_v29  ;;  %v6054_v38 = vsel %vm3294_vm9, %v11879_v1, %v11880_v14  ;;  %v6053_v36 = vsel %vm3294_vm9, %v11885_v40, %v11879_v1  ;;  %v6393_v1 = vld [vmem:[#allocation10 + $0x1a0] sm:$0xff] }
 0x4bb   : > { %v11888_v23 = vpop.permute.xlu0 %11887  ;;  %v6377_v40 = vld [vmem:[#allocation10 + $0x120] sm:$0xff] }
 0x4bc   : > { %v11889_v58 = vunpack.i.l.bf16 %v11888_v23 }
 0x4bd   : > { %10313 = vmatmul.mubr.msk.f32.vlgmr.msra.gmra.mrb[12].mxu1 %vm985_vm2, %v3666_v53  ;;  %v10703_v53 = vpack.c.bf16 %v5759_v3, %v5754_v4 }
 0x4be   : > { %10694 = vmatpush1.bf16.msra.mxu1 %v10693_v25  ;;  %5415 = vmatprep.mubr.f32.mxu1 %v12687_v29  ;;  %v6049_v25 = vsel %vm3294_vm9, %v11874_v0, %v11875_v20  ;;  %v6050_v3 = vsel %vm3294_vm9, %v11875_v20, %v11889_v58  ;;  %v6375_v0 = vld [vmem:[#allocation10 + $0x110] sm:$0xff] }
 0x4bf   : > { %10696 = vmatprep.subr.bf16.mxu1 %v10695_v8  ;;  %v11893_v8 = vpop.permute.xlu1 %11892  ;;  %v11898_v60 = vpop.permute.xlu0 %11897 }
 0x4c0   : > { %v11895_v24 = vunpack.i.h.bf16 %v11893_v8  ;;  %v11900_v4 = vunpack.i.h.bf16 %v11898_v60  ;;  %v11899_v22 = vunpack.i.l.bf16 %v11898_v60  ;;  %v6398_v60 = vld [vmem:[#allocation10 + $0x1c8] sm:$0xff] }
 0x4c1   : > { %10314 = vmatmul.mubr.msk.f32.gmra.mrb[14].mxu1 %vm985_vm2, %v3667_v54  ;;  %v10705_v54 = vpack.c.bf16 %v5758_v12, %v5753_v55  ;;  %v10755_v12 = vpack.c.bf16 %v6372_v15, %v6371_v59  ;;  %v6355_v55 = vld [vmem:[#allocation10 + $0x70] sm:$0xff]  ;;  %v6384_v15 = vld [vmem:[#allocation10 + $0x158] sm:$0xff] }
 0x4c2   : > { %5550 = vmatprep.mubr.f32.mxu1 %v12687_v29  ;;  %v10723_v34 = vpack.c.bf16 %v11900_v4, %v11899_v22  ;;  %v6383_v59 = vld [vmem:[#allocation10 + $0x150] sm:$0xff] }
 0x4c3   : > { %10756 = vmatprep.subr.bf16.mxu0 %v10755_v12  ;;  %v14388_v9 = vpop.permute.xlu1 %6321 }
 0x4c5   : > { %10315 = vmatmul.mubr.msk.f32.vlgmr.msra.gmra.mrb[4].mxu1 %vm985_vm2, %v3668_v30 }
 0x4c6   : > { %10698 = vmatpush1.bf16.msra.mxu1 %v10697_v35  ;;  %5556 = vmatprep.mubr.f32.mxu1 %v12687_v29  ;;  %v11894_v35 = vunpack.i.l.bf16 %v11893_v8 }
 0x4c7   : > { %10700 = vmatprep.subr.bf16.mxu1 %v10699_v46  ;;  %v11890_v46 = vunpack.i.h.bf16 %v11888_v23  ;;  %v10767_v23 = vpack.c.bf16 %v6394_v32, %v6393_v1  ;;  %v12696_v32 = vmov 0.0|0.0  }
 0x4c8   : > { %v6056_v13 = vsel %vm3294_vm9, %v11894_v35, %v11895_v24  ;;  %v6055_v45 = vsel %vm3294_vm9, %v11880_v14, %v11894_v35  ;;  %v6396_v35 = vld [vmem:[#allocation10 + $0x1b8] sm:$0xff] }
 0x4c9   : > { %10316 = vmatmul.mubr.msk.f32.gmra.mrb[6].mxu1 %vm985_vm2, %v3669_v57  ;;  %v6051_v39 = vsel %vm3294_vm9, %v11889_v58, %v11890_v46  ;;  %v10721_v49 = vpack.c.bf16 %v6055_v45, %v6050_v3  ;;  %v6052_v43 = vsel %vm3294_vm9, %v11890_v46, %v11899_v22  ;;  %v6382_v3 = vld [vmem:[#allocation10 + $0x148] sm:$0xff] }
 0x4ca   : > { %5627 = vmatprep.mubr.f32.mxu1 %v12687_v29  ;;  %v10719_v7 = vpack.c.bf16 %v6056_v13, %v6051_v39  ;;  %v6379_v13 = vld [vmem:[#allocation10 + $0x130] sm:$0xff] }
 0x4cd   : > { %10317 = vmatmul.mubr.msk.f32.vlgmr.msra.gmra.mrb[8].mxu1 %vm985_vm2, %v3668_v30 }
 0x4ce   : > { %10702 = vmatpush1.bf16.msra.mxu1 %v10701_v41  ;;  %5633 = vmatprep.mubr.f32.mxu1 %v12687_v29  ;;  %v3672_v41 = vld [vmem:[%s13301_s6 + $0x80] sm:$0xff]  ;;  %s12706_s6 = smov (!%p10354_p7), 110  }
 0x4cf   : > { %10704 = vmatprep.subr.bf16.mxu1 %v10703_v53  ;;  %v6057_v53 = vsel %vm3294_vm9, %v11895_v24, %v11900_v4  ;;  %v6395_v24 = vld [vmem:[#allocation10 + $0x1b0] sm:$0xff] }
 0x4d0   : > { %v10725_v6 = vpack.c.bf16 %v6057_v53, %v6052_v43 }
 0x4d1   : > { %10318 = vmatmul.mubr.msk.f32.gmra.mrb[10].mxu1 %vm985_vm2, %v3669_v57 }
 0x4d2   : > { %5704 = vmatprep.mubr.f32.mxu1 %v12687_v29 }
 0x4d5   : > { %10319 = vmatmul.mubr.msk.f32.vlgmr.msra.gmra.mrb[12].mxu1 %vm985_vm2, %v3668_v30  ;;  %v10715_v30 = vpack.c.bf16 %v6054_v38, %v6049_v25  ;;  %v14397_v25 = vpop.permute.xlu0 %6326 }
 0x4d6   : > { %10706 = vmatpush1.bf16.msra.mxu1 %v10705_v54  ;;  %5710 = vmatprep.mubr.f32.mxu1 %v12687_v29  ;;  %v10757_v54 = vpack.c.bf16 %v6356_v47, %v6355_v55  ;;  %v6401_v55 = vld [vmem:[#allocation10 + $0x1e0] sm:$0xff]  ;;  %v6402_v47 = vld [vmem:[#allocation10 + $0x1e8] sm:$0xff] }
 0x4d7   : > { %10708 = vmatprep.subr.bf16.mxu1 %v10707_v21  ;;  %v6390_v21 = vld [vmem:[#allocation10 + $0x188] sm:$0xff] }
 0x4d8   : > { %10758 = vmatpush3.bf16.msra.mxu0 %v10757_v54  ;;  %v10759_v10 = vpack.c.bf16 %v6390_v21, %v6389_v19  ;;  %v10781_v19 = vpack.c.bf16 %v6384_v15, %v6383_v59  ;;  %v10783_v21 = vpack.c.bf16 %v6402_v47, %v6401_v55 }
 0x4d9   : > { %10320 = vmatmul.mubr.msk.f32.gmra.mrb[14].mxu1 %vm985_vm2, %v3669_v57  ;;  %v10717_v57 = vpack.c.bf16 %v6053_v36, %v6048_v52  ;;  %v10769_v36 = vpack.c.bf16 %v6378_v27, %v6377_v40  ;;  %v10771_v52 = vpack.c.bf16 %v6396_v35, %v6395_v24  ;;  %v6409_v24 = vld [vmem:[#allocation10 + $0x220] sm:$0xff] }
 0x4da   : > { %5845 = vmatprep.mubr.f32.mxu1 %v12687_v29  ;;  %10760 = vmatprep.subr.bf16.mxu0 %v10759_v10  ;;  %v6385_v10 = vld [vmem:[#allocation10 + $0x160] sm:$0xff] }
 0x4dd   : > { %10321 = vmatmul.mubr.msk.f32.vlgmr.msra.gmra.mrb[4].mxu1 %vm985_vm2, %v3670_v50 }
 0x4de   : > { %10710 = vmatpush1.bf16.msra.mxu1 %v10709_v16  ;;  %5851 = vmatprep.mubr.f32.mxu1 %v12687_v29 }
 0x4df   : > { %10712 = vmatprep.subr.bf16.mxu1 %v10711_v28 }
 0x4e1   : > { %10322 = vmatmul.mubr.msk.f32.gmra.mrb[6].mxu1 %vm985_vm2, %v3671_v48 }
 0x4e2   : > { %5922 = vmatprep.mubr.f32.mxu1 %v12687_v29 }
 0x4e5   : > { %10323 = vmatmul.mubr.msk.f32.vlgmr.msra.gmra.mrb[8].mxu1 %vm985_vm2, %v3670_v50 }
 0x4e6   : > { %10714 = vmatpush1.bf16.msra.mxu1 %v10713_v18  ;;  %5928 = vmatprep.mubr.f32.mxu1 %v12687_v29 }
 0x4e7   : > { %10716 = vmatprep.subr.bf16.mxu1 %v10715_v30 }
 0x4e9   : > { %10324 = vmatmul.mubr.msk.f32.gmra.mrb[10].mxu1 %vm985_vm2, %v3671_v48 }
 0x4ea   : > { %5999 = vmatprep.mubr.f32.mxu1 %v12687_v29 }
 0x4ed   : > { %10325 = vmatmul.mubr.msk.f32.vlgmr.msra.gmra.mrb[12].mxu1 %vm985_vm2, %v3670_v50  ;;  %v6392_v50 = vld [vmem:[#allocation10 + $0x198] sm:$0xff] }
 0x4ee   : > { %10718 = vmatpush1.bf16.msra.mxu1 %v10717_v57  ;;  %6005 = vmatprep.mubr.f32.mxu1 %v12687_v29  ;;  %v10763_v20 = vpack.c.bf16 %v6392_v50, %v6391_v61  ;;  %v6380_v57 = vld [vmem:[#allocation10 + $0x138] sm:$0xff]  ;;  %v10785_v61 = vpack.c.bf16 %v6386_v26, %v6385_v10 }
 0x4ef   : > { %10720 = vmatprep.subr.bf16.mxu1 %v10719_v7  ;;  %v6397_v7 = vld [vmem:[#allocation10 + $0x1c0] sm:$0xff]  ;;  %v10773_v22 = vpack.c.bf16 %v6380_v57, %v6379_v13 }
 0x4f0   : > { %v10775_v45 = vpack.c.bf16 %v6398_v60, %v6397_v7  ;;  %v6413_v57 = vld [vmem:[#allocation10 + $0x240] sm:$0xff]  ;;  %v6415_v60 = vld [vmem:[#allocation10 + $0x250] sm:$0xff] }
 0x4f1   : > { %10326 = vmatmul.mubr.msk.f32.gmra.mrb[14].mxu1 %vm985_vm2, %v3671_v48  ;;  %v6376_v48 = vld [vmem:[#allocation10 + $0x118] sm:$0xff] }
 0x4f2   : > { %6140 = vmatprep.mubr.f32.mxu1 %v12687_v29  ;;  %v10765_v18 = vpack.c.bf16 %v6376_v48, %v6375_v0  ;;  %v6405_v0 = vld [vmem:[#allocation10 + $0x200] sm:$0xff]  ;;  %v6406_v48 = vld [vmem:[#allocation10 + $0x208] sm:$0xff] }
 0x4f5   : > { %10327 = vmatmul.mubr.msk.f32.vlgmr.msra.gmra.mrb[4].mxu1 %vm985_vm2, %v3672_v41 }
 0x4f6   : > { %10722 = vmatpush1.bf16.msra.mxu1 %v10721_v49  ;;  %6146 = vmatprep.mubr.f32.mxu1 %v12687_v29 }
 0x4f7   : > { %10724 = vmatprep.subr.bf16.mxu1 %v10723_v34  ;;  %v6399_v34 = vld [vmem:[#allocation10 + $0x1d0] sm:$0xff] }
 0x4f9   : > { %10328 = vmatmul.mubr.msk.f32.gmra.mrb[6].mxu1 %vm985_vm2, %v3673_v33 }
 0x4fa   : > { %6217 = vmatprep.mubr.f32.mxu1 %v12687_v29 }
 0x4fd   : > { %10329 = vmatmul.mubr.msk.f32.vlgmr.msra.gmra.mrb[8].mxu1 %vm985_vm2, %v3672_v41 }
 0x4fe   : > { %10726 = vmatpush1.bf16.msra.mxu1 %v10725_v6  ;;  %6223 = vmatprep.mubr.f32.mxu1 %v12687_v29 }
 0x501   : > { %10330 = vmatmul.mubr.msk.f32.gmra.mrb[10].mxu1 %vm985_vm2, %v3673_v33 }
 0x502   : > { %6294 = vmatprep.mubr.f32.mxu1 %v12687_v29 }
 0x505   : > { %10331 = vmatmul.mubr.msk.f32.vlgmr.msra.gmra.mrb[12].mxu1 %vm985_vm2, %v3672_v41  ;;  %v6381_v41 = vld [vmem:[#allocation10 + $0x140] sm:$0xff] }
 0x506   : > { %6300 = vmatprep.mubr.f32.mxu1 %v12687_v29  ;;  %v10777_v43 = vpack.c.bf16 %v6382_v3, %v6381_v41  ;;  %v6418_v41 = vld [vmem:[#allocation10 + $0x268] sm:$0xff] }
 0x509   : > { %10332 = vmatmul.mubr.msk.f32.gmra.mrb[14].mxu1 %vm985_vm2, %v3673_v33  ;;  %v6400_v33 = vld [vmem:[#allocation10 + $0x1d8] sm:$0xff] }
 0x50a   : > { %v10779_v6 = vpack.c.bf16 %v6400_v33, %v6399_v34  ;;  %v6419_v34 = vld [vmem:[#allocation10 + $0x270] sm:$0xff]  ;;  %v6420_v33 = vld [vmem:[#allocation10 + $0x278] sm:$0xff] }
 0x5c8   : > { %v6142_v2 = vpop.f32.mrb[4].mxu1 }
 0x5c9   : > { %v6144_v16 = vpop.f32.mrb[5].mxu1  ;;  %v14394_v51 = vadd.f32 %v14388_v9, %v6142_v2  ;;  %v6404_v2 = vld [vmem:[#allocation10 + $0x1f8] sm:$0xff] }
 0x5ca   : > { %v14391_v28 = vadd.f32 %v14388_v9, %v6144_v16  ;;  %v10787_v50 = vpack.c.bf16 %v6404_v2, %v6403_v5  ;;  %v6387_v16 = vld [vmem:[#allocation10 + $0x170] sm:$0xff] }
 0x5cc   : > { %v6148_v14 = vpop.f32.mrb[6].mxu1  ;;  %6492 = vmatprep.mubr.f32.mxu0 %v14391_v28 }
 0x5cd   : > { %v6150_v31 = vpop.f32.mrb[7].mxu1  ;;  %6493 = vmatmul.mubr.f32.vlgmr.msra.gmra.mrb[12].mxu0 %v14394_v51  ;;  %v14404_v38 = vadd.f32 %v14397_v25, %v6148_v14  ;;  %v10792_v14 = vpack.c.bf16 %v6406_v48, %v6405_v0 }
 0x5ce   : > { %v14401_v8 = vadd.f32 %v14397_v25, %v6150_v31  ;;  %10762 = vmatpush3.bf16.msra.mxu0 %v10761_v56  ;;  %v6388_v56 = vld [vmem:[#allocation10 + $0x178] sm:$0xff]  ;;  %v6407_v31 = vld [vmem:[#allocation10 + $0x210] sm:$0xff] }
 0x5cf   : > { %10764 = vmatprep.subr.bf16.mxu0 %v10763_v20  ;;  %v10789_v20 = vpack.c.bf16 %v6388_v56, %v6387_v16 }
 0x5d0   : > { %v6219_v30 = vpop.f32.mrb[8].mxu1  ;;  %6497 = vmatprep.mubr.f32.mxu0 %v14401_v8 }
 0x5d1   : > { %v6221_v46 = vpop.f32.mrb[9].mxu1  ;;  %6498 = vmatmul.mubr.f32.gmra.mrb[14].mxu0 %v14404_v38  ;;  %v14419_v1 = vadd.f32 %v14388_v9, %v6219_v30  ;;  %v6410_v30 = vld [vmem:[#allocation10 + $0x228] sm:$0xff] }
 0x5d2   : > { %v14409_v58 = vadd.f32 %v14388_v9, %v6221_v46  ;;  %10766 = vmatpush3.bf16.msra.mxu0 %v10765_v18  ;;  %v6408_v18 = vld [vmem:[#allocation10 + $0x218] sm:$0xff]  ;;  %v10798_v46 = vpack.c.bf16 %v6410_v30, %v6409_v24  ;;  %v6660_v24 = vpop.permute.xlu1 %6659 }
 0x5d3   : > { %10768 = vmatprep.subr.bf16.mxu0 %v10767_v23  ;;  %v10795_v40 = vpack.c.bf16 %v6408_v18, %v6407_v31  ;;  %v6655_v18 = vld [vmem:[%s13304_s7] sm:$0xf] }
 0x5d4   : > { %v6225_v39 = vpop.f32.mrb[10].mxu1  ;;  %6567 = vmatprep.mubr.f32.mxu0 %v14409_v58 }
 0x5d5   : > { %v6227_v4 = vpop.f32.mrb[11].mxu1  ;;  %v14427_v27 = vadd.f32 %v14397_v25, %v6225_v39  ;;  %v6414_v39 = vld [vmem:[#allocation10 + $0x248] sm:$0xff] }
 0x5d6   : > { %10770 = vmatpush3.bf16.msra.mxu0 %v10769_v36  ;;  %v14422_v23 = vadd.f32 %v14397_v25, %v6227_v4  ;;  %v6411_v36 = vld [vmem:[#allocation10 + $0x230] sm:$0xff]  ;;  %v10804_v7 = vpack.c.bf16 %v6414_v39, %v6413_v57  ;;  %v6416_v4 = vld [vmem:[#allocation10 + $0x258] sm:$0xff]  ;;  %v12698_v57 = vmov 1983009808  }
 0x5d7   : > { %10772 = vmatprep.subr.bf16.mxu0 %v10771_v52  ;;  %v6412_v52 = vld [vmem:[#allocation10 + $0x238] sm:$0xff]  ;;  %v6854_v39 = vunpack.c.l.s4 %v12698_v57 }
 0x5d8   : > { %v14412_v49 = vpop.f32.mrb[12].mxu1  ;;  %v10801_v13 = vpack.c.bf16 %v6412_v52, %v6411_v36 }
 0x5d9   : > { %v6298_v53 = vpop.f32.mrb[13].mxu1 }
 0x5da   : > { %10774 = vmatpush3.bf16.msra.mxu0 %v10773_v22  ;;  %v14430_v35 = vadd.f32 %v14388_v9, %v6298_v53  ;;  %v10807_v22 = vpack.c.bf16 %v6416_v4, %v6415_v60  ;;  %v10813_v53 = vpack.c.bf16 %v6420_v33, %v6419_v34  ;;  %v6848_v60 = vld [vmem:[#allocation9] sm:$0xff]  ;;  %v6748_v33 = vpop.permute.xlu1 %6747 }
 0x5db   : > { %10776 = vmatprep.subr.bf16.mxu0 %v10775_v45  ;;  %v6417_v45 = vld [vmem:[#allocation10 + $0x260] sm:$0xff] }
 0x5dc   : > { %v14414_v12 = vpop.f32.mrb[14].mxu1  ;;  %v10810_v3 = vpack.c.bf16 %v6418_v41, %v6417_v45  ;;  %v6852_v41 = vcombine.high %v6848_v60, %v6848_v60 }
 0x5dd   : > { %v14416_v54 = vpop.f32.mrb[15].mxu1  ;;  %v14449_v15 = vadd.f32 %v14397_v25, %v14414_v12 }
 0x5de   : > { %10778 = vmatpush3.bf16.msra.mxu0 %v10777_v43  ;;  %v6421_v43 = vld [vmem:[#allocation10 + $0x280] sm:$0xff]  ;;  %v14442_v59 = vadd.f32 %v14397_v25, %v14416_v54 }
 0x5df   : > { %10780 = vmatprep.subr.bf16.mxu0 %v10779_v6  ;;  %v14438_v6 = vadd.f32 %v14388_v9, %v14412_v49 }
 0x5e2   : > { %10782 = vmatpush3.bf16.msra.mxu0 %v10781_v19 }
 0x5e3   : > { %10784 = vmatprep.subr.bf16.mxu0 %v10783_v21 }
 0x5e6   : > { %10786 = vmatpush3.bf16.msra.mxu0 %v10785_v61 }
 0x5e7   : > { %10788 = vmatprep.subr.bf16.mxu0 %v10787_v50 }
 0x5ea   : > { %10790 = vmatpush3.bf16.msra.mxu0 %v10789_v20 }
 0x5eb   : > { %10791 = vmatprep.subr.bf16.mxu0 %v12696_v32 }
 0x5ed   : > { %6568 = vmatmul.mubr.f32.vlgmr.msra.gmra.mrb[16].mxu0 %v14419_v1 }
 0x5ee   : > { %6572 = vmatprep.mubr.f32.mxu0 %v14422_v23  ;;  %10793 = vmatpush1.bf16.msra.mxu0 %v10792_v14 }
 0x5ef   : > { %10794 = vmatprep.subr.bf16.mxu0 %v12696_v32 }
 0x5f1   : > { %6573 = vmatmul.mubr.f32.gmra.mrb[18].mxu0 %v14427_v27 }
 0x5f2   : > { %10796 = vmatpush1.bf16.msra.mxu0 %v10795_v40  ;;  %10333 = vmatprep.mubr.msk.f32.mxu0 %vm3648_vm10, %v14430_v35  ;;  %v6736_v40 = vld [vmem:[%s740_s0] sm:$0xff] }
 0x5f3   : > { %10797 = vmatprep.subr.bf16.mxu0 %v12696_v32 }
 0x5f6   : > { %10799 = vmatpush1.bf16.msra.mxu0 %v10798_v46 }
 0x5f7   : > { %10800 = vmatprep.subr.bf16.mxu0 %v12696_v32 }
 0x5fa   : > { %10802 = vmatpush1.bf16.msra.mxu0 %v10801_v13  ;;  %v6737_v13 = vld [vmem:[%s740_s0 + $0x8] sm:$0xff] }
 0x5fb   : > { %10803 = vmatprep.subr.bf16.mxu0 %v12696_v32 }
 0x5fe   : > { %10805 = vmatpush1.bf16.msra.mxu0 %v10804_v7  ;;  %v6855_v7 = vunpack.c.0.s8 %v6854_v39 }
 0x5ff   : > { %10806 = vmatprep.subr.bf16.mxu0 %v12696_v32 }
 0x600   : > { %v6858_v4 = vsub.s32 %v6855_v7, %v13937_v62  ;;  %v7136_v7 = vld [vmem:[#allocation2 + $0x58] sm:$0xff] }
 0x602   : > { %10808 = vmatpush1.bf16.msra.mxu0 %v10807_v22  ;;  %v6859_v22 = vrot.slane %v6848_v60, %v6858_v4 }
 0x603   : > { %10809 = vmatprep.subr.bf16.mxu0 %v12696_v32 }
 0x604   : > { %v6867_v45 = vcombine.high %v6859_v22, %v6859_v22 }
 0x606   : > { %10811 = vmatpush1.bf16.msra.mxu0 %v10810_v3  ;;  %v6866_v3 = vrot.slane %v6852_v41, %v6858_v4  ;;  %v7137_v4 = vld [vmem:[#allocation2 + $0x60] sm:$0xff] }
 0x607   : > { %10812 = vmatprep.subr.bf16.mxu0 %v12696_v32 }
 0x608   : > { %v6868_v34 = vcombine.high %v6866_v3, %v6866_v3 }
 0x60a   : > { %10814 = vmatpush1.bf16.msra.mxu0 %v10813_v53 }
 0x60b   : > { %6610 = vmatprep.subr.mxu0 %v12687_v29 }
 0x60e   : > { %6611 = vmatpush1.msra.mxu0 %v6421_v43  ;;  %v6743_v43 = vpop.permute.xlu0 %6742 }
 0x60f   : > { %6643 = vmatmul.mubr.f32.vlgmr.msra.gmra.mrb[20].mxu0 %v14438_v6  ;;  %10815 = vmatprep.subr.bf16.mxu0 %v12696_v32 }
 0x610   : > { %10334 = vmatprep.mubr.msk.f32.mxu0 %vm3648_vm10, %v14442_v59 }
 0x613   : > { %6648 = vmatmul.mubr.f32.gmra.mrb[22].mxu0 %v14449_v15 }
 0x614   : > { %10503 = vmatprep.mubr.msk.f32.mxu0 %vm12697_vm11, %v12687_v29 }
 0x6a0   : > { %v10449_v9 = vpop.f32.mrb[12].mxu0 }
 0x6a1   : > { %v10450_v49 = vpop.f32.mrb[13].mxu0 }
 0x6a2   : > { %v10451_v55 = vadd.f32 %v10450_v49, %v10449_v9 }
 0x6a4   : > { %v10452_v47 = vpop.f32.mrb[14].mxu0 }
 0x6a5   : > { %v10453_v54 = vpop.f32.mrb[15].mxu0 }
 0x6a6   : > { %v10454_v19 = vadd.f32 %v10453_v54, %v10452_v47 }
 0x6c0   : > { %v10487_v21 = vpop.f32.mrb[16].mxu0 }
 0x6c1   : > { %v10488_v10 = vpop.f32.mrb[17].mxu0 }
 0x6c2   : > { %v10489_v26 = vadd.f32 %v10488_v10, %v10487_v21 }
 0x6c4   : > { %v10490_v5 = vpop.f32.mrb[18].mxu0  ;;  %v6570_v2 = vadd.f32 %v10489_v26, %v10451_v55  ;;  %v10341_v26 = vld.sshfl [vmem:[#allocation9 + $0x8] sm:$0x33 pattern:$0x76325410] }
 0x6c5   : > { %v10491_v25 = vpop.f32.mrb[19].mxu0 }
 0x6c6   : > { %v10492_v12 = vadd.f32 %v10491_v25, %v10490_v5  ;;  %v6876_v5 = vcombine.high %v10341_v26, %v10341_v26 }
 0x6c8   : > { %v6575_v61 = vadd.f32 %v10492_v12, %v10454_v19 }
 0x6e2   : > { %v6644_v50 = vpop.f32.mrb[20].mxu0 }
 0x6e3   : > { %v6645_v16 = vadd.f32 %v6644_v50, %v6570_v2  ;;  %v6646_v56 = vpop.f32.mrb[21].mxu0 }
 0x6e4   : > { %v7129_v56 = vld [vmem:[#allocation2 + $0x10] sm:$0xff] }
 0x6e5   : > { %v6653_v14 = vmul.f32 0.00390625, %v6645_v16 }
 0x6e6   : > { %v6649_v20 = vpop.f32.mrb[22].mxu0 }
 0x6e7   : > { %v6650_v0 = vadd.f32 %v6649_v20, %v6575_v61  ;;  %v6651_v48 = vpop.f32.mrb[23].mxu0  ;;  %v7128_v61 = vld [vmem:[#allocation2 + $0x8] sm:$0xff] }
 0x6e9   : > { %v6654_v32 = vmul.f32 0.00390625, %v6650_v0 }
 0x6eb   : > { %v10816_v31 = vpack.c.bf16 %v6654_v32, %v6653_v14  ;;  %v7134_v32 = vld [vmem:[#allocation2 + $0x48] sm:$0xff] }
 0x6ed   : > { %10817 = vmatpush3.bf16.msra.mxu0 %v10816_v31 }
 0x6f0   : > { %10504 = vmatmul.mubr.msk.f32.vlgmr.msra.gmra.mrb[24].mxu0 %vm985_vm2, %v6655_v18 }
 0x6f1   : > { %10508 = vmatprep.mubr.msk.f32.mxu0 %vm6750_vm12, %v6736_v40  ;;  %v7135_v40 = vld [vmem:[#allocation2 + $0x50] sm:$0xff] }
 0x7c3   : > { %v6731_v30 = vpop.f32.mrb[24].mxu0 }
 0x7c4   : > { %v6732_v46 = vadd.f32 %v6731_v30, %v6660_v24  ;;  %v10505_v36 = vpop.f32.mrb[25].mxu0 }
 0x7c6   : > { %v6735_v52 = vmax.f32 %v6732_v46, 0.0 }
 0x7c8   : > { %10506 = vmatprep.subr.msk.mxu0 %vm6757_vm13, %v6735_v52 }
 0x7c9   : > { %10507 = vmatpush3.msk.msra.mxu0 %vm6757_vm13, %v6735_v52  ;;  %v7131_v52 = vld [vmem:[#allocation2 + $0x20] sm:$0xff] }
 0x7ca   : > { %10509 = vmatmul.mubr.msk.f32.vlgmr.msra.gmra.mrb[26].mxu0 %vm6750_vm12, %v6737_v13  ;;  %10342 = vmatprep.subr.msk.mxu0 %vm6884_vm14, %v6867_v45 }
 0x7cb   : > { %6961 = vmatprep.mubr.f32.mxu0 %v12687_v29  ;;  %10343 = vmatpush1.msk.msra.mxu0 %vm6884_vm14, %v6859_v22 }
 0x7cc   : > { %10346 = vmatprep.subr.msk.mxu0 %vm6884_vm14, %v6868_v34 }
 0x89d   : > { %v10510_v53 = vpop.f32.mrb[26].mxu0 }
 0x89e   : > { %v6833_v9 = vadd.f32 %v10510_v53, %v6748_v33  ;;  %v6827_v49 = vpop.f32.mrb[27].mxu0  ;;  %v7133_v33 = vld [vmem:[#allocation2 + $0x30] sm:$0xff] }
 0x89f   : > { %v6828_v55 = vadd.f32 %v6827_v49, %v6743_v43  ;;  %v7138_v49 = vld [vmem:[#allocation2 + $0x68] sm:$0xff] }
 0x8a0   : > { %v10340_v47 = vmul.f32 -1.442695, %v6833_v9 }
 0x8a1   : > { %v10339_v62 = vmul.f32 -1.442695, %v6828_v55 }
 0x8a2   : > { %11902 = vpow2.f32 %v10340_v47  ;;  %v7139_v47 = vld [vmem:[#allocation2 + $0x70] sm:$0xff] }
 0x8a3   : > { %11904 = vpow2.f32 %v10339_v62 }
 0x8ac   : > { %v11903_v54 = vpop.eup %11902 }
 0x8ad   : > { %v11905_v19 = vpop.eup %11904  ;;  %v6843_v10 = vadd.f32 1.0, %v11903_v54 }
 0x8ae   : > { %v6842_v21 = vadd.f32 1.0, %v11905_v19 }
 0x8b0   : > { %11906 = vrcp.f32 %v6842_v21  ;;  %v7200_v21 = vld [vmem:[#allocation2] sm:$0xff] (!%p10354_p7) }
 0x8b1   : > { %11908 = vrcp.f32 %v6843_v10  ;;  %v7206_v10 = vld [vmem:[#allocation2 + $0x40] sm:$0xff] (!%p10354_p7) }
 0x8ba   : > { %v11907_v2 = vpop.eup %11906 }
 0x8bb   : > { %10344 = vmatmul.mubr.msk.f32.vlgmr.msra.gmra.mrb[28].mxu0 %vm6877_vm15, %v11907_v2  ;;  %v11909_v25 = vpop.eup %11908 }
 0x8bc   : > { %6967 = vmatprep.mubr.f32.mxu0 %v12687_v29  ;;  %10347 = vmatpush1.msk.msra.mxu0 %vm6884_vm14, %v6866_v3  ;;  %v7132_v3 = vld [vmem:[#allocation2 + $0x28] sm:$0xff] }
 0x8bd   : > { %10350 = vmatprep.subr.msk.mxu0 %vm6884_vm14, %v6876_v5  ;;  %v11920_v5 = vpack.i.bf16 (!%p10354_p7), %v7206_v10, %v7200_v21 }
 0x8bf   : > { %10345 = vmatmul.mubr.msk.f32.gmra.mrb[30].mxu0 %vm6877_vm15, %v11909_v25  ;;  %11921 = vrot.lane.b32.xlu1 (!%p10354_p7), %v11920_v5, %s12699_s5 }
 0x8c0   : > { %7038 = vmatprep.mubr.f32.mxu0 %v12687_v29 }
 0x8c3   : > { %10348 = vmatmul.mubr.msk.f32.vlgmr.msra.gmra.mrb[32].mxu0 %vm6877_vm15, %v11907_v2 }
 0x8c4   : > { %7044 = vmatprep.mubr.f32.mxu0 %v12687_v29  ;;  %10351 = vmatpush1.msk.msra.mxu0 %vm6884_vm14, %v10341_v26 }
 0x8c7   : > { %10349 = vmatmul.mubr.msk.f32.gmra.mrb[34].mxu0 %vm6877_vm15, %v11909_v25 }
 0x8c8   : > { %7115 = vmatprep.mubr.f32.mxu0 %v12687_v29 }
 0x8cb   : > { %10352 = vmatmul.mubr.msk.f32.vlgmr.msra.gmra.mrb[36].mxu0 %vm6877_vm15, %v11907_v2 }
 0x8cc   : > { %7121 = vmatprep.mubr.f32.mxu0 %v12687_v29 }
 0x8cf   : > { %10353 = vmatmul.mubr.msk.f32.gmra.mrb[38].mxu0 %vm6877_vm15, %v11909_v25  ;;  %v12700_v25 = vmov (!%p10354_p7), 0.0  }
 0x8d0   : > { %7906 = vmatprep.mubr.f32.mxu0 (!%p10354_p7), %v12700_v25  ;;  %7340 = vmatprep.mubr.f32.mxu1 (!%p10354_p7), %v12700_v25 }
 0x98e   : > { %v6963_v12 = vpop.f32.mrb[28].mxu0 }
 0x98f   : > { %v7140_v50 = vmul.f32 %v6963_v12, %v14394_v51  ;;  %v6965_v16 = vpop.f32.mrb[29].mxu0  ;;  %v7130_v51 = vld [vmem:[#allocation2 + $0x18] sm:$0xff] }
 0x990   : > { %v7141_v20 = vmul.f32 %v6965_v16, %v14391_v28 }
 0x991   : > { %v7152_v0 = vadd.f32 %v7140_v50, %v7128_v61 }
 0x992   : > { %v7153_v48 = vadd.f32 %v7141_v20, %v7129_v56  ;;  %v6969_v14 = vpop.f32.mrb[30].mxu0 }
 0x993   : > { %7164 = vst [vmem:[#allocation2 + $0x8] sm:$0xff] %v7152_v0  ;;  %v7146_v31 = vmul.f32 %v6969_v14, %v14404_v38  ;;  %v6971_v18 = vpop.f32.mrb[31].mxu0 }
 0x994   : > { %7165 = vst [vmem:[#allocation2 + $0x10] sm:$0xff] %v7153_v48  ;;  %v7147_v29 = vmul.f32 %v6971_v18, %v14401_v8 }
 0x995   : > { %v7158_v24 = vadd.f32 %v7146_v31, %v7134_v32 }
 0x996   : > { %v7159_v30 = vadd.f32 %v7147_v29, %v7135_v40  ;;  %v7040_v46 = vpop.f32.mrb[32].mxu0 }
 0x997   : > { %7170 = vst [vmem:[#allocation2 + $0x48] sm:$0xff] %v7158_v24  ;;  %v7142_v36 = vmul.f32 %v7040_v46, %v14419_v1  ;;  %v7042_v28 = vpop.f32.mrb[33].mxu0 }
 0x998   : > { %7171 = vst [vmem:[#allocation2 + $0x50] sm:$0xff] %v7159_v30  ;;  %v7143_v13 = vmul.f32 %v7042_v28, %v14409_v58 }
 0x999   : > { %v7154_v57 = vadd.f32 %v7142_v36, %v7130_v51 }
 0x99a   : > { %v7155_v39 = vadd.f32 %v7143_v13, %v7131_v52  ;;  %v7046_v38 = vpop.f32.mrb[34].mxu0 }
 0x99b   : > { %7166 = vst [vmem:[#allocation2 + $0x18] sm:$0xff] %v7154_v57  ;;  %v7148_v60 = vmul.f32 %v7046_v38, %v14427_v27  ;;  %v7048_v8 = vpop.f32.mrb[35].mxu0  ;;  %v14495_v19 = vld [vmem:[#allocation2 + $0x10] sm:$0xff] (!%p10354_p7)  ;;  %v7198_v38 = vld [vmem:[#allocation21] sm:$0xff] (!%p10354_p7) }
 0x99c   : > { %7167 = vst [vmem:[#allocation2 + $0x20] sm:$0xff] %v7155_v39  ;;  %v7149_v22 = vmul.f32 %v7048_v8, %v14422_v23 }
 0x99d   : > { %v7160_v45 = vadd.f32 %v7148_v60, %v7136_v7  ;;  %v7199_v7 = vld [vmem:[#allocation21 + $0x8] sm:$0xff] (!%p10354_p7)  ;;  %v12708_v60 = vmov (!%p10354_p7), 0  }
 0x99e   : > { %v7161_v41 = vadd.f32 %v7149_v22, %v7137_v4  ;;  %v7117_v1 = vpop.f32.mrb[36].mxu0  ;;  %v14499_v26 = vld [vmem:[#allocation2 + $0x48] sm:$0xff] (!%p10354_p7)  ;;  %12155 = vset.pattern.permute.xlu1 (!%p10354_p7), %v12708_v60  ;;  %12156 = vset.pattern.permute.xlu0 (!%p10354_p7), %v12708_v60  ;;  %v11922_v4 = vpop.permute.xlu1 (!%p10354_p7), %11921 }
 0x99f   : > { %7172 = vst [vmem:[#allocation2 + $0x58] sm:$0xff] %v7160_v45  ;;  %v7144_v34 = vmul.f32 %v7117_v1, %v14438_v6  ;;  %v7119_v58 = vpop.f32.mrb[37].mxu0 }
 0x9a0   : > { %7173 = vst [vmem:[#allocation2 + $0x60] sm:$0xff] %v7161_v41  ;;  %v7145_v53 = vmul.f32 %v7119_v58, %v14430_v35  ;;  %v14493_v35 = vld [vmem:[#allocation2 + $0x8] sm:$0xff] (!%p10354_p7)  ;;  %v11923_v41 = vunpack.i.l.bf16 (!%p10354_p7), %v11922_v4 }
 0x9a1   : > { %v7156_v43 = vadd.f32 %v7144_v34, %v7132_v3  ;;  %v10868_v51 = vpack.c.bf16 (!%p10354_p7), %v14499_v26, %v14493_v35  ;;  %v12035_v57 = vpack.i.bf16 (!%p10354_p7), %v14499_v26, %v14493_v35  ;;  %v11924_v3 = vunpack.i.h.bf16 (!%p10354_p7), %v11922_v4 }
 0x9a2   : > { %v7157_v9 = vadd.f32 %v7145_v53, %v7133_v33  ;;  %v7123_v27 = vpop.f32.mrb[38].mxu0  ;;  %7179 = sbr.rel (%p10354_p7) target bundleno = 2930 (0xb72), region = 140  ;;  %v14522_v0 = vld [vmem:[#allocation2 + $0x18] sm:$0xff] (!%p10354_p7) }
 0x9a3   : > { %7168 = vst [vmem:[#allocation2 + $0x28] sm:$0xff] %v7156_v43  ;;  %v7150_v55 = vmul.f32 %v7123_v27, %v14449_v15  ;;  %v7125_v23 = vpop.f32.mrb[39].mxu0  ;;  %v11910_v15 = vpack.i.bf16 (!%p10354_p7), %v14495_v19, %v14493_v35  ;;  %v14509_v12 = vld [vmem:[#allocation2 + $0x20] sm:$0xff] (!%p10354_p7)  ;;  %v12025_v52 = vpack.i.bf16 (!%p10354_p7), %v14522_v0, %v14495_v19 }
 0x9a4   : > { %7169 = vst.msk [vmem:[#allocation2 + $0x30] sm:$0xff] %vm3648_vm10, %v7157_v9  ;;  %v7151_v62 = vmul.f32 %v7125_v23, %v14442_v59  ;;  %v14501_v59 = vld [vmem:[#allocation2 + $0x50] sm:$0xff] (!%p10354_p7)  ;;  %v11950_v14 = vpack.i.bf16 (!%p10354_p7), %v14509_v12, %v14522_v0 }
 0x9a5   : > { %v7162_v54 = vadd.f32 %v7150_v55, %v7138_v49  ;;  %11911 = vrot.lane.b32.xlu0 (!%p10354_p7), %v11910_v15, %s12699_s5  ;;  %v11915_v2 = vpack.i.bf16 (!%p10354_p7), %v14501_v59, %v14499_v26  ;;  %11926 = vrot.lane.b32.xlu1 (!%p10354_p7), %v11910_v15, %s12701_s15  ;;  %v10866_v46 = vpack.c.bf16 (!%p10354_p7), %v14501_v59, %v14495_v19 }
 0x9a6   : > { %v7163_v6 = vadd.f32 %v7151_v62, %v7139_v47  ;;  %v14524_v48 = vld [vmem:[#allocation2 + $0x58] sm:$0xff] (!%p10354_p7) }
 0x9a7   : > { %7174 = vst [vmem:[#allocation2 + $0x68] sm:$0xff] %v7162_v54  ;;  %v14514_v50 = vld [vmem:[#allocation2 + $0x60] sm:$0xff] (!%p10354_p7)  ;;  %v12030_v13 = vpack.i.bf16 (!%p10354_p7), %v14524_v48, %v14501_v59  ;;  %v12050_v39 = vpack.i.bf16 (!%p10354_p7), %v14524_v48, %v14522_v0 }
 0x9a8   : > { %7175 = vst.msk [vmem:[#allocation2 + $0x70] sm:$0xff] %vm3648_vm10, %v7163_v6  ;;  %v11955_v32 = vpack.i.bf16 (!%p10354_p7), %v14514_v50, %v14524_v48  ;;  %v11990_v30 = vpack.i.bf16 (!%p10354_p7), %v14514_v50, %v14509_v12 }
 0x9a9   : > { %11916 = vrot.lane.b32.xlu0 %v11915_v2, %s12699_s5  ;;  %11936 = vrot.lane.b32.xlu1 %v11920_v5, %s12701_s15 }
 0x9aa   : > { %v14511_v61 = vld [vmem:[#allocation2 + $0x28] sm:$0xff] }
 0x9ab   : > { %v11940_v56 = vpack.i.bf16 %v14511_v61, %v14509_v12  ;;  %v14536_v18 = vld [vmem:[#allocation2 + $0x30] sm:$0xff] }
 0x9ac   : > { %v11980_v29 = vpack.i.bf16 %v14536_v18, %v14511_v61 }
 0x9ad   : > { %11931 = vrot.lane.b32.xlu0 %v11915_v2, %s12701_s15 }
 0x9ae   : > { %v14516_v16 = vld [vmem:[#allocation2 + $0x68] sm:$0xff] }
 0x9af   : > { %v11945_v20 = vpack.i.bf16 %v14516_v16, %v14514_v50  ;;  %v11975_v31 = vpack.i.bf16 %v14516_v16, %v14511_v61  ;;  %v14538_v40 = vld [vmem:[#allocation2 + $0x70] sm:$0xff]  ;;  %v10876_v28 = vpack.c.bf16 %v14516_v16, %v14511_v61 }
 0x9b0   : > { %v11985_v24 = vpack.i.bf16 %v14538_v40, %v14516_v16  ;;  %v10874_v36 = vpack.c.bf16 %v14538_v40, %v14536_v18  ;;  %v14718_v18 = vld [vmem:[#allocation20 + $0x40] sm:$0xff] }
 0x9b1   : > { %11941 = vrot.lane.b32.xlu0 %v11940_v56, %s12699_s5  ;;  %11946 = vrot.lane.b32.xlu1 %v11945_v20, %s12699_s5  ;;  %v14592_v56 = vld [vmem:[#allocation20 + $0x20] sm:$0xff] }
 0x9b5   : > { %11951 = vrot.lane.b32.xlu0 %v11950_v14, %s12701_s15  ;;  %11956 = vrot.lane.b32.xlu1 %v11955_v32, %s12701_s15 }
 0x9b9   : > { %11961 = vrot.lane.b32.xlu0 %v11910_v15, %s12702_s1  ;;  %11966 = vrot.lane.b32.xlu1 %v11915_v2, %s12702_s1 }
 0x9bd   : > { %11971 = vrot.lane.b32.xlu0 %v11920_v5, %s12702_s1  ;;  %11976 = vrot.lane.b32.xlu1 %v11975_v31, %s12701_s15 }
 0x9c1   : > { %11981 = vrot.lane.b32.xlu0 %v11980_v29, %s12702_s1  ;;  %11986 = vrot.lane.b32.xlu1 %v11985_v24, %s12702_s1 }
 0x9c5   : > { %11991 = vrot.lane.b32.xlu0 %v11990_v30, %s12702_s1  ;;  %11996 = vrot.lane.b32.xlu1 %v11910_v15, %s12703_s22 }
 0x9c9   : > { %12001 = vrot.lane.b32.xlu0 %v11915_v2, %s12703_s22  ;;  %12006 = vrot.lane.b32.xlu1 %v11920_v5, %s12703_s22 }
 0x9cd   : > { %12011 = vrot.lane.b32.xlu0 %v11950_v14, %s12703_s22  ;;  %12016 = vrot.lane.b32.xlu1 %v11955_v32, %s12703_s22 }
 0x9d1   : > { %12021 = vrot.lane.b32.xlu0 %v11975_v31, %s12703_s22  ;;  %12026 = vrot.lane.b32.xlu1 %v12025_v52, %s12704_s21 }
 0x9d5   : > { %12031 = vrot.lane.b32.xlu0 %v12030_v13, %s12704_s21  ;;  %12036 = vrot.lane.b32.xlu1 %v12035_v57, %s12704_s21 }
 0x9d9   : > { %12041 = vrot.lane.b32.xlu0 %v11980_v29, %s12704_s21  ;;  %12046 = vrot.lane.b32.xlu1 %v11985_v24, %s12704_s21 }
 0x9dd   : > { %12051 = vrot.lane.b32.xlu0 %v12050_v39, %s12699_s5  ;;  %12056 = vrot.lane.b32.xlu1 %v12025_v52, %s12705_s4 }
 0x9e1   : > { %12061 = vrot.lane.b32.xlu0 %v12030_v13, %s12705_s4  ;;  %12066 = vrot.lane.b32.xlu1 %v12035_v57, %s12705_s4 }
 0x9e5   : > { %12071 = vrot.lane.b32.xlu0 %v12050_v39, %s12702_s1  ;;  %12076 = vrot.lane.b32.xlu1 %v11980_v29, %s12705_s4 }
 0x9e9   : > { %12081 = vrot.lane.b32.xlu0 %v11985_v24, %s12705_s4  ;;  %12086 = vrot.lane.b32.xlu1 %v12025_v52, %s12706_s6 }
 0x9ed   : > { %12091 = vrot.lane.b32.xlu0 %v12030_v13, %s12706_s6  ;;  %12096 = vrot.lane.b32.xlu1 %v12035_v57, %s12706_s6 }
 0x9f1   : > { %12101 = vrot.lane.b32.xlu0 %v11990_v30, %s12704_s21  ;;  %12106 = vrot.lane.b32.xlu1 %v11980_v29, %s12706_s6 }
 0x9f5   : > { %12111 = vrot.lane.b32.xlu0 %v11985_v24, %s12706_s6  ;;  %12116 = vrot.lane.b32.xlu1 %v11990_v30, %s12705_s4 }
 0x9f9   : > { %12121 = vrot.lane.b32.xlu0 %v12025_v52, %s12707_s23  ;;  %12126 = vrot.lane.b32.xlu1 %v12030_v13, %s12707_s23 }
 0x9fd   : > { %12131 = vrot.lane.b32.xlu0 %v12035_v57, %s12707_s23  ;;  %12136 = vrot.lane.b32.xlu1 %v11990_v30, %s12706_s6 }
 0xa01   : > { %12141 = vrot.lane.b32.xlu0 %v11980_v29, %s12707_s23  ;;  %12146 = vrot.lane.b32.xlu1 %v11985_v24, %s12707_s23 }
 0xa05   : > { %12151 = vrot.lane.b32.xlu0 %v11990_v30, %s12707_s23  ;;  %9845 = vperm.xlu1 %12155, %v7198_v38   ;;  %v14609_v38 = vld [vmem:[#allocation20 + $0x10] sm:$0xff] }
 0xa09   : > { %9850 = vperm.xlu0 %12156, %v7199_v7  }
 0xa17   : > { %v14568_v8 = vpop.permute.xlu0 %11911  ;;  %v11927_v33 = vpop.permute.xlu1 %11926 }
 0xa18   : > { %v11914_v22 = vunpack.i.h.bf16 %v14568_v8  ;;  %v11913_v45 = vunpack.i.l.bf16 %v14568_v8  ;;  %v11929_v9 = vunpack.i.h.bf16 %v11927_v33  ;;  %v11928_v27 = vunpack.i.l.bf16 %v11927_v33 }
 0xa1a   : > { %v7815_v53 = vsel %vm1531_vm4, %v11913_v45, %v11914_v22  ;;  %v7814_v43 = vsel %vm1531_vm4, %v11923_v41, %v11913_v45  ;;  %v7249_v5 = vsel %vm962_vm1, %v11928_v27, %v11929_v9 }
 0xa1b   : > { %v14572_v1 = vpop.permute.xlu0 %11916  ;;  %v11937_v21 = vpop.permute.xlu1 %11936 }
 0xa1c   : > { %v11919_v34 = vunpack.i.h.bf16 %v14572_v1  ;;  %v11918_v58 = vunpack.i.l.bf16 %v14572_v1  ;;  %v11939_v15 = vunpack.i.h.bf16 %v11937_v21  ;;  %v11938_v10 = vunpack.i.l.bf16 %v11937_v21 }
 0xa1e   : > { %v7820_v49 = vsel %vm1531_vm4, %v11918_v58, %v11919_v34  ;;  %v7819_v55 = vsel %vm1531_vm4, %v11924_v3, %v11918_v58  ;;  %v7248_v32 = vsel %vm962_vm1, %v11938_v10, %v11928_v27 }
 0xa1f   : > { %v11932_v23 = vpop.permute.xlu0 %11931  ;;  %v14584_v47 = vpack.c.bf16 %v7820_v49, %v7815_v53  ;;  %v14586_v62 = vpack.c.bf16 %v7819_v55, %v7814_v43  ;;  %v14620_v49 = vld [vmem:[#allocation20 + $0x18] sm:$0xff] }
 0xa20   : > { %v11934_v54 = vunpack.i.h.bf16 %v11932_v23  ;;  %v11933_v6 = vunpack.i.l.bf16 %v11932_v23 }
 0xa21   : > { %10843 = vmatprep.subr.bf16.mxu0 %v14584_v47 }
 0xa22   : > { %10845 = vmatpush1.bf16.msra.mxu0 %v14586_v62  ;;  %v7254_v2 = vsel %vm962_vm1, %v11933_v6, %v11934_v54  ;;  %v7253_v31 = vsel %vm962_vm1, %v11939_v15, %v11933_v6 }
 0xa23   : > { %v14594_v20 = vpop.permute.xlu0 %11941  ;;  %v10818_v14 = vpack.c.bf16 %v7254_v2, %v7249_v5  ;;  %v14600_v30 = vpop.permute.xlu1 %11946  ;;  %v10820_v52 = vpack.c.bf16 %v7253_v31, %v7248_v32  ;;  %v14640_v32 = vld [vmem:[#allocation20 + $0x28] sm:$0xff] }
 0xa24   : > { %v11944_v29 = vunpack.i.h.bf16 %v14594_v20  ;;  %v11943_v24 = vunpack.i.l.bf16 %v14594_v20  ;;  %v11949_v13 = vunpack.i.h.bf16 %v14600_v30  ;;  %v11948_v57 = vunpack.i.l.bf16 %v14600_v30 }
 0xa25   : > { %10819 = vmatprep.subr.bf16.mxu1 %v10818_v14  ;;  %10367 = vmatmul.mubr.msk.f32.vlgmr.msra.gmra.mrb[0].mxu0 %vm985_vm2, %v14592_v56 }
 0xa26   : > { %v7818_v39 = vsel %vm1531_vm4, %v11943_v24, %v11944_v29  ;;  %10821 = vmatpush1.bf16.msra.mxu1 %v10820_v52  ;;  %8060 = vmatprep.mubr.f32.mxu0 %v12700_v25  ;;  %v10850_v7 = vpack.c.bf16 %v11949_v13, %v11944_v29  ;;  %v7823_v60 = vsel %vm1531_vm4, %v11948_v57, %v11949_v13 }
 0xa27   : > { %v11952_v4 = vpop.permute.xlu0 %11951  ;;  %v10852_v45 = vpack.c.bf16 %v7823_v60, %v7818_v39  ;;  %v11957_v58 = vpop.permute.xlu1 %11956 }
 0xa28   : > { %v11954_v41 = vunpack.i.h.bf16 %v11952_v4  ;;  %v11953_v3 = vunpack.i.l.bf16 %v11952_v4  ;;  %v11959_v33 = vunpack.i.h.bf16 %v11957_v58  ;;  %v11958_v53 = vunpack.i.l.bf16 %v11957_v58  ;;  %10851 = vmatprep.subr.bf16.mxu0 %v10850_v7 }
 0xa29   : > { %10355 = vmatmul.mubr.msk.f32.vlgmr.msra.gmra.mrb[0].mxu1 %vm985_vm2, %v14609_v38  ;;  %10853 = vmatpush1.bf16.msra.mxu0 %v10852_v45 }
 0xa2a   : > { %v7250_v43 = vsel %vm962_vm1, %v11929_v9, %v11953_v3  ;;  %v7251_v27 = vsel %vm962_vm1, %v11953_v3, %v11954_v41  ;;  %7346 = vmatprep.mubr.f32.mxu1 %v12700_v25  ;;  %v7255_v55 = vsel %vm962_vm1, %v11934_v54, %v11958_v53  ;;  %v7256_v23 = vsel %vm962_vm1, %v11958_v53, %v11959_v33 }
 0xa2b   : > { %v14624_v6 = vpop.permute.xlu0 %11961  ;;  %v10824_v21 = vpack.c.bf16 %v7255_v55, %v7250_v43  ;;  %v14628_v5 = vpop.permute.xlu1 %11966  ;;  %v10822_v9 = vpack.c.bf16 %v7256_v23, %v7251_v27 }
 0xa2c   : > { %v11964_v15 = vunpack.i.h.bf16 %v14624_v6  ;;  %v11963_v10 = vunpack.i.l.bf16 %v14624_v6  ;;  %v11969_v2 = vunpack.i.h.bf16 %v14628_v5  ;;  %v11968_v14 = vunpack.i.l.bf16 %v14628_v5  ;;  %10371 = vmatmul.mubr.msk.f32.vlgmr.msra.gmra.mrb[2].mxu0 %vm985_vm2, %v14592_v56 }
 0xa2d   : > { %10356 = vmatmul.mubr.msk.f32.gmra.mrb[2].mxu1 %vm985_vm2, %v14620_v49  ;;  %10823 = vmatprep.subr.bf16.mxu1 %v10822_v9  ;;  %v10870_v6 = vpack.c.bf16 %v14514_v50, %v14509_v12 }
 0xa2e   : > { %v8142_v54 = vsel %vm1859_vm5, %v11963_v10, %v11964_v15  ;;  %8066 = vmatprep.mubr.f32.mxu0 %v12700_v25  ;;  %v8148_v31 = vsel %vm1859_vm5, %v11968_v14, %v11969_v2  ;;  %10825 = vmatpush1.bf16.msra.mxu1 %v10824_v21 }
 0xa2f   : > { %v11972_v29 = vpop.permute.xlu0 %11971  ;;  %7417 = vmatprep.mubr.f32.mxu1 %v12700_v25  ;;  %v11977_v39 = vpop.permute.xlu1 %11976  ;;  %v10854_v7 = vpack.c.bf16 %v8148_v31, %v8142_v54  ;;  %v14656_v31 = vld [vmem:[#allocation20 + $0x30] sm:$0xff] }
 0xa30   : > { %v11974_v52 = vunpack.i.h.bf16 %v11972_v29  ;;  %v11973_v13 = vunpack.i.l.bf16 %v11972_v29  ;;  %v11979_v60 = vunpack.i.h.bf16 %v11977_v39  ;;  %v11978_v4 = vunpack.i.l.bf16 %v11977_v39  ;;  %10372 = vmatmul.mubr.msk.f32.gmra.mrb[4].mxu0 %vm985_vm2, %v14640_v32 }
 0xa31   : > { %10855 = vmatprep.subr.bf16.mxu0 %v10854_v7  ;;  %10357 = vmatmul.mubr.msk.f32.vlgmr.msra.gmra.mrb[4].mxu1 %vm985_vm2, %v14609_v38 }
 0xa32   : > { %v8141_v45 = vsel %vm1859_vm5, %v11973_v13, %v11963_v10  ;;  %v8147_v3 = vsel %vm1859_vm5, %v11974_v52, %v11968_v14  ;;  %v7252_v53 = vsel %vm962_vm1, %v11954_v41, %v11978_v4  ;;  %v7257_v43 = vsel %vm962_vm1, %v11959_v33, %v11979_v60  ;;  %8235 = vmatprep.mubr.f32.mxu0 %v12700_v25 }
 0xa33   : > { %v10856_v58 = vpack.c.bf16 %v8147_v3, %v8141_v45  ;;  %v10826_v27 = vpack.c.bf16 %v11979_v60, %v11978_v4  ;;  %v11982_v55 = vpop.permute.xlu0 %11981  ;;  %v10828_v23 = vpack.c.bf16 %v7257_v43, %v7252_v53  ;;  %v11987_v54 = vpop.permute.xlu1 %11986  ;;  %7423 = vmatprep.mubr.f32.mxu1 %v12700_v25  ;;  %v14670_v60 = vld [vmem:[#allocation20 + $0x38] sm:$0xff] }
 0xa34   : > { %v11984_v21 = vunpack.i.h.bf16 %v11982_v55  ;;  %v11983_v9 = vunpack.i.l.bf16 %v11982_v55  ;;  %v11989_v10 = vunpack.i.h.bf16 %v11987_v54  ;;  %v11988_v14 = vunpack.i.l.bf16 %v11987_v54 }
 0xa35   : > { %10827 = vmatprep.subr.bf16.mxu1 %v10826_v27  ;;  %10857 = vmatpush1.bf16.msra.mxu0 %v10856_v58 }
 0xa36   : > { %v8146_v41 = vsel %vm1859_vm5, %v11983_v9, %v11984_v21  ;;  %10829 = vmatpush1.bf16.msra.mxu1 %v10828_v23  ;;  %v8152_v33 = vsel %vm1859_vm5, %v11988_v14, %v11989_v10 }
 0xa37   : > { %v14660_v29 = vpop.permute.xlu0 %11991  ;;  %10358 = vmatmul.mubr.msk.f32.gmra.mrb[6].mxu1 %vm985_vm2, %v14620_v49  ;;  %v11997_v39 = vpop.permute.xlu1 %11996  ;;  %v10862_v7 = vpack.c.bf16 %v8152_v33, %v8146_v41 }
 0xa38   : > { %v11994_v52 = vunpack.i.h.bf16 %v14660_v29  ;;  %v11993_v13 = vunpack.i.l.bf16 %v14660_v29  ;;  %10373 = vmatmul.mubr.msk.f32.vlgmr.msra.gmra.mrb[0].mxu0 %vm985_vm2, %v14656_v31  ;;  %7494 = vmatprep.mubr.f32.mxu1 %v12700_v25  ;;  %v11999_v3 = vunpack.i.h.bf16 %v11997_v39  ;;  %v11998_v58 = vunpack.i.l.bf16 %v11997_v39 }
 0xa39   : > { %8241 = vmatprep.mubr.f32.mxu0 %v12700_v25  ;;  %10863 = vmatprep.subr.bf16.mxu0 %v10862_v7 }
 0xa3a   : > { %v8145_v4 = vsel %vm1859_vm5, %v11993_v13, %v11983_v9  ;;  %v8151_v45 = vsel %vm1859_vm5, %v11994_v52, %v11988_v14  ;;  %v7532_v54 = vsel %vm1247_vm3, %v11998_v58, %v11999_v3 }
 0xa3b   : > { %v10864_v53 = vpack.c.bf16 %v8151_v45, %v8145_v4  ;;  %v12002_v43 = vpop.permute.xlu0 %12001  ;;  %10359 = vmatmul.mubr.msk.f32.vlgmr.msra.gmra.mrb[8].mxu1 %vm985_vm2, %v14609_v38  ;;  %v12007_v23 = vpop.permute.xlu1 %12006 }
 0xa3c   : > { %v12004_v27 = vunpack.i.h.bf16 %v12002_v43  ;;  %v12003_v55 = vunpack.i.l.bf16 %v12002_v43  ;;  %10374 = vmatmul.mubr.msk.f32.gmra.mrb[6].mxu0 %vm985_vm2, %v14670_v60  ;;  %7500 = vmatprep.mubr.f32.mxu1 %v12700_v25  ;;  %v12009_v21 = vunpack.i.h.bf16 %v12007_v23  ;;  %v12008_v9 = vunpack.i.l.bf16 %v12007_v23 }
 0xa3d   : > { %10865 = vmatpush1.bf16.msra.mxu0 %v10864_v53  ;;  %8389 = vmatprep.mubr.f32.mxu0 %v12700_v25 }
 0xa3e   : > { %v7537_v10 = vsel %vm1247_vm3, %v12003_v55, %v12004_v27  ;;  %10867 = vmatprep.subr.bf16.mxu0 %v10866_v46  ;;  %v7536_v38 = vsel %vm1247_vm3, %v12009_v21, %v12003_v55  ;;  %v7531_v14 = vsel %vm1247_vm3, %v12008_v9, %v11998_v58 }
 0xa3f   : > { %v12012_v41 = vpop.permute.xlu0 %12011  ;;  %10360 = vmatmul.mubr.msk.f32.gmra.mrb[10].mxu1 %vm985_vm2, %v14620_v49  ;;  %v10830_v33 = vpack.c.bf16 %v7537_v10, %v7532_v54  ;;  %v10832_v39 = vpack.c.bf16 %v7536_v38, %v7531_v14  ;;  %v12017_v45 = vpop.permute.xlu1 %12016  ;;  %v14699_v49 = vld [vmem:[#allocation20] sm:$0xff] }
 0xa40   : > { %v12014_v7 = vunpack.i.h.bf16 %v12012_v41  ;;  %v12013_v4 = vunpack.i.l.bf16 %v12012_v41  ;;  %10377 = vmatmul.mubr.msk.f32.vlgmr.msra.gmra.mrb[2].mxu0 %vm985_vm2, %v14656_v31  ;;  %7623 = vmatprep.mubr.f32.mxu1 %v12700_v25  ;;  %v12019_v19 = vunpack.i.h.bf16 %v12017_v45  ;;  %v12018_v59 = vunpack.i.l.bf16 %v12017_v45  ;;  %v14737_v45 = vld [vmem:[#allocation20 + $0x48] sm:$0xff] }
 0xa41   : > { %10831 = vmatprep.subr.bf16.mxu1 %v10830_v33  ;;  %8395 = vmatprep.mubr.f32.mxu0 %v12700_v25 }
 0xa42   : > { %v7533_v46 = vsel %vm1247_vm3, %v11999_v3, %v12013_v4  ;;  %v7534_v58 = vsel %vm1247_vm3, %v12013_v4, %v12014_v7  ;;  %10833 = vmatpush1.bf16.msra.mxu1 %v10832_v39  ;;  %10869 = vmatpush1.bf16.msra.mxu0 %v10868_v51  ;;  %v7538_v53 = vsel %vm1247_vm3, %v12004_v27, %v12018_v59  ;;  %v14721_v51 = vld [vmem:[#allocation20 + $0x8] sm:$0xff] }
 0xa43   : > { %v7539_v43 = vsel %vm1247_vm3, %v12018_v59, %v12019_v19  ;;  %v12022_v55 = vpop.permute.xlu0 %12021  ;;  %10875 = vmatprep.subr.bf16.mxu0 %v10874_v36  ;;  %v10836_v23 = vpack.c.bf16 %v7538_v53, %v7533_v46  ;;  %v14709_v9 = vpop.permute.xlu1 %12026 }
 0xa44   : > { %v12024_v3 = vunpack.i.h.bf16 %v12022_v55  ;;  %v12023_v21 = vunpack.i.l.bf16 %v12022_v55  ;;  %10378 = vmatmul.mubr.msk.f32.gmra.mrb[4].mxu0 %vm985_vm2, %v14670_v60  ;;  %v10834_v54 = vpack.c.bf16 %v7539_v43, %v7534_v58  ;;  %v12029_v35 = vunpack.i.h.bf16 %v14709_v9 }
 0xa45   : > { %v12028_v26 = vunpack.i.l.bf16 %v14709_v9  ;;  %10361 = vmatmul.mubr.msk.f32.vlgmr.msra.gmra.mrb[0].mxu1 %vm985_vm2, %v14699_v49  ;;  %8484 = vmatprep.mubr.f32.mxu0 %v12700_v25 }
 0xa46   : > { %v10838_v40 = vpack.c.bf16 %v12024_v3, %v12023_v21  ;;  %10835 = vmatprep.subr.bf16.mxu1 %v10834_v54  ;;  %7629 = vmatprep.mubr.f32.mxu1 %v12700_v25  ;;  %v7535_v41 = vsel %vm1247_vm3, %v12014_v7, %v12023_v21  ;;  %v7540_v33 = vsel %vm1247_vm3, %v12019_v19, %v12024_v3 }
 0xa47   : > { %10837 = vmatpush1.bf16.msra.mxu1 %v10836_v23  ;;  %v14723_v36 = vpop.permute.xlu0 %12031  ;;  %v8688_v27 = vsel %vm2406_vm6, %v12028_v26, %v12029_v35  ;;  %v12037_v14 = vpop.permute.xlu1 %12036  ;;  %v10840_v53 = vpack.c.bf16 %v7540_v33, %v7535_v41 }
 0xa48   : > { %v12034_v10 = vunpack.i.h.bf16 %v14723_v36  ;;  %v12033_v38 = vunpack.i.l.bf16 %v14723_v36  ;;  %10379 = vmatmul.mubr.msk.f32.vlgmr.msra.gmra.mrb[0].mxu0 %vm985_vm2, %v14718_v18  ;;  %10839 = vmatprep.subr.bf16.mxu1 %v10838_v40  ;;  %v12039_v39 = vunpack.i.h.bf16 %v12037_v14  ;;  %v12038_v4 = vunpack.i.l.bf16 %v12037_v14 }
 0xa49   : > { %10362 = vmatmul.mubr.msk.f32.gmra.mrb[2].mxu1 %vm985_vm2, %v14721_v51  ;;  %8490 = vmatprep.mubr.f32.mxu0 %v12700_v25 }
 0xa4a   : > { %v8693_v59 = vsel %vm2406_vm6, %v12033_v38, %v12034_v10  ;;  %7700 = vmatprep.mubr.f32.mxu1 %v12700_v25  ;;  %10877 = vmatpush1.bf16.msra.mxu0 %v10876_v28  ;;  %v8692_v7 = vsel %vm2406_vm6, %v12039_v39, %v12033_v38  ;;  %v8687_v19 = vsel %vm2406_vm6, %v12038_v4, %v12028_v26 }
 0xa4b   : > { %v14748_v46 = vpop.permute.xlu0 %12041  ;;  %v10878_v58 = vpack.c.bf16 %v8693_v59, %v8688_v27  ;;  %v14751_v55 = vpop.permute.xlu1 %12046  ;;  %v10880_v23 = vpack.c.bf16 %v8692_v7, %v8687_v19 }
 0xa4c   : > { %v12044_v43 = vunpack.i.h.bf16 %v14748_v46  ;;  %10380 = vmatmul.mubr.msk.f32.gmra.mrb[6].mxu0 %vm985_vm2, %v14737_v45  ;;  %v12049_v3 = vunpack.i.h.bf16 %v14751_v55  ;;  %v12043_v61 = vunpack.i.l.bf16 %v14748_v46  ;;  %v12048_v16 = vunpack.i.l.bf16 %v14751_v55  ;;  %v14893_v55 = vld [vmem:[#allocation20 + $0x68] sm:$0xff] }
 0xa4d   : > { %10363 = vmatmul.mubr.msk.f32.vlgmr.msra.gmra.mrb[4].mxu1 %vm985_vm2, %v14699_v49  ;;  %8638 = vmatprep.mubr.f32.mxu0 %v12700_v25 }
 0xa4e   : > { %10841 = vmatpush1.bf16.msra.mxu1 %v10840_v53  ;;  %7706 = vmatprep.mubr.f32.mxu1 %v12700_v25  ;;  %v10886_v28 = vpack.c.bf16 %v12049_v3, %v12044_v43  ;;  %v8696_v14 = vsel %vm2406_vm6, %v12048_v16, %v12049_v3 }
 0xa4f   : > { %11118 = vmatprep.subr.bf16.mxu1 %v14584_v47  ;;  %v12052_v21 = vpop.permute.xlu0 %12051  ;;  %10879 = vmatprep.subr.bf16.mxu0 %v10878_v58  ;;  %v14763_v40 = vpop.permute.xlu1 %12056  ;;  %v8691_v47 = vsel %vm2406_vm6, %v12043_v61, %v12044_v43 }
 0xa50   : > { %v12054_v54 = vunpack.i.h.bf16 %v12052_v21  ;;  %v12053_v26 = vunpack.i.l.bf16 %v12052_v21  ;;  %10383 = vmatmul.mubr.msk.f32.vlgmr.msra.gmra.mrb[2].mxu0 %vm985_vm2, %v14718_v18  ;;  %v12059_v27 = vunpack.i.h.bf16 %v14763_v40  ;;  %v12058_v38 = vunpack.i.l.bf16 %v14763_v40 }
 0xa51   : > { %10364 = vmatmul.mubr.msk.f32.gmra.mrb[6].mxu1 %vm985_vm2, %v14721_v51  ;;  %10881 = vmatpush1.bf16.msra.mxu0 %v10880_v23  ;;  %v10888_v30 = vpack.c.bf16 %v8696_v14, %v8691_v47  ;;  %v14816_v47 = vld [vmem:[#allocation20 + $0x58] sm:$0xff] }
 0xa52   : > { %v7817_v41 = vsel %vm1531_vm4, %v12053_v26, %v11943_v24  ;;  %v7822_v33 = vsel %vm1531_vm4, %v12054_v54, %v11948_v57  ;;  %8644 = vmatprep.mubr.f32.mxu0 %v12700_v25  ;;  %7777 = vmatprep.mubr.f32.mxu1 %v12700_v25  ;;  %v8983_v59 = vsel %vm2702_vm7, %v12058_v38, %v12059_v27  ;;  %v14797_v57 = vld [vmem:[#allocation20 + $0x50] sm:$0xff] }
 0xa53   : > { %v14784_v39 = vpop.permute.xlu0 %12061  ;;  %v10846_v4 = vpack.c.bf16 %v7822_v33, %v7817_v41  ;;  %10887 = vmatprep.subr.bf16.mxu0 %v10886_v28  ;;  %v12067_v7 = vpop.permute.xlu1 %12066  ;;  %v7816_v21 = vsel %vm1531_vm4, %v11914_v22, %v12053_v26 }
 0xa54   : > { %v12064_v20 = vunpack.i.h.bf16 %v14784_v39  ;;  %v12063_v24 = vunpack.i.l.bf16 %v14784_v39  ;;  %10384 = vmatmul.mubr.msk.f32.gmra.mrb[4].mxu0 %vm985_vm2, %v14737_v45  ;;  %v12069_v58 = vunpack.i.h.bf16 %v12067_v7  ;;  %v12068_v53 = vunpack.i.l.bf16 %v12067_v7 }
 0xa55   : > { %10365 = vmatmul.mubr.msk.f32.vlgmr.msra.gmra.mrb[8].mxu1 %vm985_vm2, %v14699_v49  ;;  %8779 = vmatprep.mubr.f32.mxu0 %v12700_v25 }
 0xa56   : > { %v8988_v19 = vsel %vm2702_vm7, %v12063_v24, %v12064_v20  ;;  %11119 = vmatpush1.bf16.msra.mxu1 %v14586_v62  ;;  %7783 = vmatprep.mubr.f32.mxu1 %v12700_v25  ;;  %v7821_v62 = vsel %vm1531_vm4, %v11919_v34, %v12054_v54  ;;  %v8987_v14 = vsel %vm2702_vm7, %v12069_v58, %v12063_v24 }
 0xa57   : > { %10847 = vmatprep.subr.bf16.mxu1 %v10846_v4  ;;  %v12072_v43 = vpop.permute.xlu0 %12071  ;;  %v10890_v23 = vpack.c.bf16 %v8988_v19, %v8983_v59  ;;  %v14804_v49 = vpop.permute.xlu1 %12076  ;;  %v8982_v41 = vsel %vm2702_vm7, %v12068_v53, %v12058_v38 }
 0xa58   : > { %v12074_v3 = vunpack.i.h.bf16 %v12072_v43  ;;  %v12073_v28 = vunpack.i.l.bf16 %v12072_v43  ;;  %10385 = vmatmul.mubr.msk.f32.vlgmr.msra.gmra.mrb[0].mxu0 %vm985_vm2, %v14797_v57  ;;  %v12079_v54 = vunpack.i.h.bf16 %v14804_v49  ;;  %v10892_v29 = vpack.c.bf16 %v8987_v14, %v8982_v41 }
 0xa59   : > { %10366 = vmatmul.mubr.msk.f32.gmra.mrb[10].mxu1 %vm985_vm2, %v14721_v51  ;;  %10889 = vmatpush1.bf16.msra.mxu0 %v10888_v30  ;;  %v10848_v51 = vpack.c.bf16 %v7821_v62, %v7816_v21  ;;  %v12078_v5 = vunpack.i.l.bf16 %v14804_v49 }
 0xa5a   : > { %v8144_v8 = vsel %vm1859_vm5, %v12073_v28, %v11993_v13  ;;  %v8150_v22 = vsel %vm1859_vm5, %v12074_v3, %v11994_v52  ;;  %8785 = vmatprep.mubr.f32.mxu0 %v12700_v25  ;;  %7912 = vmatprep.mubr.f32.mxu1 %v12700_v25  ;;  %v8143_v52 = vsel %vm1859_vm5, %v11964_v15, %v12073_v28 }
 0xa5b   : > { %v14827_v1 = vpop.permute.xlu0 %12081  ;;  %v10858_v34 = vpack.c.bf16 %v8150_v22, %v8144_v8  ;;  %10891 = vmatprep.subr.bf16.mxu0 %v10890_v23  ;;  %v14832_v38 = vpop.permute.xlu1 %12086  ;;  %v8149_v13 = vsel %vm1859_vm5, %v11969_v2, %v12074_v3  ;;  %v14871_v23 = vld [vmem:[#allocation20 + $0x60] sm:$0xff]  ;;  %v10872_v3 = vpack.c.bf16 %v14524_v48, %v14522_v0 }
 0xa5c   : > { %v12084_v26 = vunpack.i.h.bf16 %v14827_v1  ;;  %10386 = vmatmul.mubr.msk.f32.gmra.mrb[6].mxu0 %vm985_vm2, %v14816_v47  ;;  %v10860_v4 = vpack.c.bf16 %v8149_v13, %v8143_v52  ;;  %v12083_v2 = vunpack.i.l.bf16 %v14827_v1  ;;  %v12089_v24 = vunpack.i.h.bf16 %v14832_v38 }
 0xa5d   : > { %10368 = vmatmul.mubr.msk.f32.vlgmr.msra.gmra.mrb[2].mxu1 %vm985_vm2, %v14640_v32  ;;  %8933 = vmatprep.mubr.f32.mxu0 %v12700_v25  ;;  %v12088_v12 = vunpack.i.l.bf16 %v14832_v38 }
 0xa5e   : > { %10849 = vmatpush1.bf16.msra.mxu1 %v10848_v51  ;;  %7983 = vmatprep.mubr.f32.mxu1 %v12700_v25  ;;  %v10898_v15 = vpack.c.bf16 %v12084_v26, %v12079_v54  ;;  %v8991_v43 = vsel %vm2702_vm7, %v12083_v2, %v12084_v26 }
 0xa5f   : > { %10859 = vmatprep.subr.bf16.mxu1 %v10858_v34  ;;  %v14846_v33 = vpop.permute.xlu0 %12091  ;;  %v12097_v59 = vpop.permute.xlu1 %12096  ;;  %v9278_v41 = vsel %vm2998_vm8, %v12088_v12, %v12089_v24 }
 0xa60   : > { %10389 = vmatmul.mubr.msk.f32.vlgmr.msra.gmra.mrb[2].mxu0 %vm985_vm2, %v14797_v57  ;;  %v12094_v7 = vunpack.i.h.bf16 %v14846_v33  ;;  %v12093_v30 = vunpack.i.l.bf16 %v14846_v33  ;;  %v12099_v28 = vunpack.i.h.bf16 %v12097_v59  ;;  %v12098_v49 = vunpack.i.l.bf16 %v12097_v59 }
 0xa61   : > { %10369 = vmatmul.mubr.msk.f32.vlgmr.msra.gmra.mrb[4].mxu1 %vm985_vm2, %v14592_v56  ;;  %10893 = vmatpush1.bf16.msra.mxu0 %v10892_v29  ;;  %v8986_v56 = vsel %vm2702_vm7, %v12078_v5, %v12079_v54 }
 0xa62   : > { %10861 = vmatpush1.bf16.msra.mxu1 %v10860_v4  ;;  %8939 = vmatprep.mubr.f32.mxu0 %v12700_v25  ;;  %v9283_v0 = vsel %vm2998_vm8, %v12093_v30, %v12094_v7  ;;  %v10900_v46 = vpack.c.bf16 %v8991_v43, %v8986_v56 }
 0xa63   : > { %v12102_v50 = vpop.permute.xlu0 %12101  ;;  %7989 = vmatprep.mubr.f32.mxu1 %v12700_v25  ;;  %10871 = vmatprep.subr.bf16.mxu1 %v10870_v6  ;;  %v14862_v53 = vpop.permute.xlu1 %12106  ;;  %v10902_v34 = vpack.c.bf16 %v9283_v0, %v9278_v41 }
 0xa64   : > { %v12104_v19 = vunpack.i.h.bf16 %v12102_v50  ;;  %v12103_v58 = vunpack.i.l.bf16 %v12102_v50  ;;  %10390 = vmatmul.mubr.msk.f32.gmra.mrb[4].mxu0 %vm985_vm2, %v14816_v47  ;;  %10899 = vmatprep.subr.bf16.mxu0 %v10898_v15  ;;  %v12109_v51 = vunpack.i.h.bf16 %v14862_v53 }
 0xa65   : > { %10370 = vmatmul.mubr.msk.f32.gmra.mrb[6].mxu1 %vm985_vm2, %v14640_v32  ;;  %9074 = vmatprep.mubr.f32.mxu0 %v12700_v25 }
 0xa66   : > { %v8690_v21 = vsel %vm2406_vm6, %v12103_v58, %v12043_v61  ;;  %v8695_v62 = vsel %vm2406_vm6, %v12104_v19, %v12048_v16  ;;  %8312 = vmatprep.mubr.f32.mxu1 %v12700_v25  ;;  %v9282_v61 = vsel %vm2998_vm8, %v12099_v28, %v12093_v30  ;;  %v9277_v16 = vsel %vm2998_vm8, %v12098_v49, %v12088_v12 }
 0xa67   : > { %v10882_v32 = vpack.c.bf16 %v8695_v62, %v8690_v21  ;;  %v12112_v14 = vpop.permute.xlu0 %12111  ;;  %v12117_v48 = vpop.permute.xlu1 %12116  ;;  %v10904_v26 = vpack.c.bf16 %v9282_v61, %v9277_v16  ;;  %v8689_v29 = vsel %vm2406_vm6, %v12029_v35, %v12103_v58  ;;  %v8694_v52 = vsel %vm2406_vm6, %v12034_v10, %v12104_v19 }
 0xa68   : > { %10391 = vmatmul.mubr.msk.f32.vlgmr.msra.gmra.mrb[0].mxu0 %vm985_vm2, %v14871_v23  ;;  %v12119_v8 = vunpack.i.h.bf16 %v12117_v48  ;;  %v12118_v22 = vunpack.i.l.bf16 %v12117_v48  ;;  %v12114_v4 = vunpack.i.h.bf16 %v12112_v14  ;;  %v12113_v15 = vunpack.i.l.bf16 %v12112_v14 }
 0xa69   : > { %10375 = vmatmul.mubr.msk.f32.vlgmr.msra.gmra.mrb[4].mxu1 %vm985_vm2, %v14656_v31  ;;  %9080 = vmatprep.mubr.f32.mxu0 %v12700_v25  ;;  %v12108_v31 = vunpack.i.l.bf16 %v14862_v53  ;;  %v10884_v35 = vpack.c.bf16 %v8694_v52, %v8689_v29 }
 0xa6a   : > { %10873 = vmatpush1.bf16.msra.mxu1 %v10872_v3  ;;  %8318 = vmatprep.mubr.f32.mxu1 %v12700_v25  ;;  %v8990_v13 = vsel %vm2702_vm7, %v12119_v8, %v12083_v2  ;;  %v8985_v6 = vsel %vm2702_vm7, %v12118_v22, %v12078_v5  ;;  %v9286_v50 = vsel %vm2998_vm8, %v12113_v15, %v12114_v4 }
 0xa6b   : > { %10883 = vmatprep.subr.bf16.mxu1 %v10882_v32  ;;  %v14898_v1 = vpop.permute.xlu0 %12121  ;;  %v14902_v54 = vpop.permute.xlu1 %12126  ;;  %10901 = vmatpush1.bf16.msra.mxu0 %v10900_v46  ;;  %v9281_v36 = vsel %vm2998_vm8, %v12108_v31, %v12109_v51  ;;  %v10894_v12 = vpack.c.bf16 %v8990_v13, %v8985_v6  ;;  %v10910_v30 = vpack.c.bf16 %v12114_v4, %v12109_v51 }
 0xa6c   : > { %10392 = vmatmul.mubr.msk.f32.gmra.mrb[6].mxu0 %vm985_vm2, %v14893_v55  ;;  %10903 = vmatprep.subr.bf16.mxu0 %v10902_v34  ;;  %v12124_v10 = vunpack.i.h.bf16 %v14898_v1  ;;  %v12128_v5 = vunpack.i.l.bf16 %v14902_v54  ;;  %v12123_v2 = vunpack.i.l.bf16 %v14898_v1  ;;  %v8989_v53 = vsel %vm2702_vm7, %v12064_v20, %v12119_v8  ;;  %v7197_v1 = vld [vmem:[#allocation20 + $0x88] sm:$0xff] }
 0xa6d   : > { %10376 = vmatmul.mubr.msk.f32.gmra.mrb[6].mxu1 %vm985_vm2, %v14670_v60  ;;  %9228 = vmatprep.mubr.f32.mxu0 %v12700_v25  ;;  %v12129_v60 = vunpack.i.h.bf16 %v14902_v54  ;;  %v10912_v28 = vpack.c.bf16 %v9286_v50, %v9281_v36 }
 0xa6e   : > { %8561 = vmatprep.mubr.f32.mxu1 %v12700_v25  ;;  %v9573_v40 = vsel %vm3294_vm9, %v12123_v2, %v12124_v10 }
 0xa6f   : > { %v12132_v9 = vpop.permute.xlu0 %12131  ;;  %v12137_v59 = vpop.permute.xlu1 %12136  ;;  %v9578_v39 = vsel %vm3294_vm9, %v12128_v5, %v12129_v60 }
 0xa70   : > { %10395 = vmatmul.mubr.msk.f32.vlgmr.msra.gmra.mrb[2].mxu0 %vm985_vm2, %v14871_v23  ;;  %v12139_v19 = vunpack.i.h.bf16 %v12137_v59  ;;  %v12138_v58 = vunpack.i.l.bf16 %v12137_v59  ;;  %v12134_v49 = vunpack.i.h.bf16 %v12132_v9  ;;  %v12133_v21 = vunpack.i.l.bf16 %v12132_v9 }
 0xa71   : > { %10381 = vmatmul.mubr.msk.f32.vlgmr.msra.gmra.mrb[4].mxu1 %vm985_vm2, %v14718_v18  ;;  %10905 = vmatpush1.bf16.msra.mxu0 %v10904_v26  ;;  %v8984_v18 = vsel %vm2702_vm7, %v12059_v27, %v12118_v22  ;;  %v7194_v27 = vld [vmem:[#allocation20 + $0x70] sm:$0xff]  ;;  %v10914_v0 = vpack.c.bf16 %v9578_v39, %v9573_v40 }
 0xa72   : > { %10885 = vmatpush1.bf16.msra.mxu1 %v10884_v35  ;;  %9234 = vmatprep.mubr.f32.mxu0 %v12700_v25  ;;  %v9285_v43 = vsel %vm2998_vm8, %v12139_v19, %v12113_v15  ;;  %v9280_v3 = vsel %vm2998_vm8, %v12138_v58, %v12108_v31  ;;  %v10896_v14 = vpack.c.bf16 %v8989_v53, %v8984_v18 }
 0xa73   : > { %10895 = vmatprep.subr.bf16.mxu1 %v10894_v12  ;;  %v12142_v56 = vpop.permute.xlu0 %12141  ;;  %8567 = vmatprep.mubr.f32.mxu1 %v12700_v25  ;;  %v12147_v20 = vpop.permute.xlu1 %12146  ;;  %v10906_v62 = vpack.c.bf16 %v9285_v43, %v9280_v3  ;;  %v9572_v46 = vsel %vm3294_vm9, %v12133_v21, %v12123_v2  ;;  %v9577_v61 = vsel %vm3294_vm9, %v12134_v49, %v12128_v5  ;;  %v9883_v49 = vld [vmem:[#allocation4 + $0x30] sm:$0xff] }
 0xa74   : > { %10396 = vmatmul.mubr.msk.f32.gmra.mrb[4].mxu0 %vm985_vm2, %v14893_v55  ;;  %10911 = vmatprep.subr.bf16.mxu0 %v10910_v30  ;;  %v12143_v41 = vunpack.i.l.bf16 %v12142_v56  ;;  %v12148_v48 = vunpack.i.l.bf16 %v12147_v20  ;;  %v12144_v22 = vunpack.i.h.bf16 %v12142_v56  ;;  %v9284_v31 = vsel %vm2998_vm8, %v12094_v7, %v12139_v19  ;;  %v9877_v19 = vld [vmem:[#allocation4] sm:$0xff]  ;;  %v9878_v56 = vld [vmem:[#allocation4 + $0x8] sm:$0xff] }
 0xa75   : > { %10382 = vmatmul.mubr.msk.f32.gmra.mrb[6].mxu1 %vm985_vm2, %v14737_v45  ;;  %9369 = vmatprep.mubr.f32.mxu0 %v12700_v25  ;;  %v7195_v45 = vld [vmem:[#allocation20 + $0x78] sm:$0xff]  ;;  %v9279_v26 = vsel %vm2998_vm8, %v12089_v24, %v12138_v58  ;;  %v10916_v29 = vpack.c.bf16 %v9577_v61, %v9572_v46 }
 0xa76   : > { %8856 = vmatprep.mubr.f32.mxu1 %v12700_v25  ;;  %v10908_v13 = vpack.c.bf16 %v9284_v31, %v9279_v26  ;;  %v9576_v38 = vsel %vm3294_vm9, %v12143_v41, %v12144_v22  ;;  %v9881_v31 = vld [vmem:[#allocation4 + $0x20] sm:$0xff] }
 0xa77   : > { %v12152_v32 = vpop.permute.xlu0 %12151 }
 0xa78   : > { %10397 = vmatmul.mubr.msk.f32.vlgmr.msra.gmra.mrb[0].mxu0 %vm985_vm2, %v7194_v27  ;;  %v12154_v16 = vunpack.i.h.bf16 %v12152_v32  ;;  %v12153_v8 = vunpack.i.l.bf16 %v12152_v32  ;;  %v9884_v32 = vld [vmem:[#allocation4 + $0x38] sm:$0xff] }
 0xa79   : > { %10387 = vmatmul.mubr.msk.f32.vlgmr.msra.gmra.mrb[4].mxu1 %vm985_vm2, %v14797_v57  ;;  %10913 = vmatpush1.bf16.msra.mxu0 %v10912_v28  ;;  %v12149_v57 = vunpack.i.h.bf16 %v12147_v20 }
 0xa7a   : > { %10897 = vmatpush1.bf16.msra.mxu1 %v10896_v14  ;;  %9375 = vmatprep.mubr.f32.mxu0 %v12700_v25  ;;  %v9575_v34 = vsel %vm3294_vm9, %v12153_v8, %v12143_v41  ;;  %v9580_v51 = vsel %vm3294_vm9, %v12154_v16, %v12148_v48  ;;  %v9579_v24 = vsel %vm3294_vm9, %v12129_v60, %v12154_v16 }
 0xa7b   : > { %10907 = vmatprep.subr.bf16.mxu1 %v10906_v62  ;;  %8862 = vmatprep.mubr.f32.mxu1 %v12700_v25  ;;  %v10918_v52 = vpack.c.bf16 %v9580_v51, %v9575_v34  ;;  %v10922_v6 = vpack.c.bf16 %v12149_v57, %v12144_v22  ;;  %v9581_v33 = vsel %vm3294_vm9, %v12148_v48, %v12149_v57  ;;  %v9879_v34 = vld [vmem:[#allocation4 + $0x10] sm:$0xff] }
 0xa7c   : > { %10398 = vmatmul.mubr.msk.f32.gmra.mrb[6].mxu0 %vm985_vm2, %v7195_v45  ;;  %10915 = vmatprep.subr.bf16.mxu0 %v10914_v0  ;;  %v10924_v7 = vpack.c.bf16 %v9581_v33, %v9576_v38 }
 0xa7d   : > { %10388 = vmatmul.mubr.msk.f32.gmra.mrb[6].mxu1 %vm985_vm2, %v14816_v47  ;;  %9523 = vmatprep.mubr.f32.mxu0 %v12700_v25  ;;  %v9574_v47 = vsel %vm3294_vm9, %v12124_v10, %v12153_v8 }
 0xa7e   : > { %9151 = vmatprep.mubr.f32.mxu1 %v12700_v25  ;;  %v10920_v4 = vpack.c.bf16 %v9579_v24, %v9574_v47 }
 0xa80   : > { %10401 = vmatmul.mubr.msk.f32.vlgmr.msra.gmra.mrb[2].mxu0 %vm985_vm2, %v7194_v27 }
 0xa81   : > { %10393 = vmatmul.mubr.msk.f32.vlgmr.msra.gmra.mrb[4].mxu1 %vm985_vm2, %v14871_v23  ;;  %10917 = vmatpush1.bf16.msra.mxu0 %v10916_v29  ;;  %v7196_v23 = vld [vmem:[#allocation20 + $0x80] sm:$0xff] }
 0xa82   : > { %10909 = vmatpush1.bf16.msra.mxu1 %v10908_v13  ;;  %9529 = vmatprep.mubr.f32.mxu0 %v12700_v25 }
 0xa83   : > { %9157 = vmatprep.mubr.f32.mxu1 %v12700_v25  ;;  %10919 = vmatprep.subr.bf16.mxu1 %v10918_v52  ;;  %v9880_v52 = vld [vmem:[#allocation4 + $0x18] sm:$0xff] }
 0xa84   : > { %10402 = vmatmul.mubr.msk.f32.gmra.mrb[4].mxu0 %vm985_vm2, %v7195_v45  ;;  %10923 = vmatprep.subr.bf16.mxu0 %v10922_v6  ;;  %v9846_v5 = vpop.permute.xlu1 %9845  ;;  %v9882_v6 = vld [vmem:[#allocation4 + $0x28] sm:$0xff] }
 0xa85   : > { %10394 = vmatmul.mubr.msk.f32.gmra.mrb[6].mxu1 %vm985_vm2, %v14893_v55  ;;  %9664 = vmatprep.mubr.f32.mxu0 %v12700_v25 }
 0xa86   : > { %9446 = vmatprep.mubr.f32.mxu1 %v12700_v25 }
 0xa88   : > { %10403 = vmatmul.mubr.msk.f32.vlgmr.msra.gmra.mrb[0].mxu0 %vm985_vm2, %v7196_v23  ;;  %v9851_v53 = vpop.permute.xlu0 %9850 }
 0xa89   : > { %10399 = vmatmul.mubr.msk.f32.vlgmr.msra.gmra.mrb[4].mxu1 %vm985_vm2, %v7194_v27  ;;  %10925 = vmatpush1.bf16.msra.mxu0 %v10924_v7 }
 0xa8a   : > { %10921 = vmatpush1.bf16.msra.mxu1 %v10920_v4  ;;  %9670 = vmatprep.mubr.f32.mxu0 %v12700_v25 }
 0xa8b   : > { %9452 = vmatprep.mubr.f32.mxu1 %v12700_v25 }
 0xa8c   : > { %10404 = vmatmul.mubr.msk.f32.gmra.mrb[6].mxu0 %vm985_vm2, %v7197_v1 }
 0xa8d   : > { %10400 = vmatmul.mubr.msk.f32.gmra.mrb[6].mxu1 %vm985_vm2, %v7195_v45  ;;  %9818 = vmatprep.mubr.f32.mxu0 %v12700_v25 }
 0xa8e   : > { %9741 = vmatprep.mubr.f32.mxu1 %v12700_v25 }
 0xa90   : > { %10407 = vmatmul.mubr.msk.f32.vlgmr.msra.gmra.mrb[2].mxu0 %vm985_vm2, %v7196_v23 }
 0xa91   : > { %10405 = vmatmul.mubr.msk.f32.vlgmr.msra.gmra.mrb[4].mxu1 %vm985_vm2, %v7196_v23  ;;  %9824 = vmatprep.mubr.f32.mxu0 %v12700_v25 }
 0xa92   : > { %9747 = vmatprep.mubr.f32.mxu1 %v12700_v25 }
 0xa94   : > { %10408 = vmatmul.mubr.msk.f32.gmra.mrb[4].mxu0 %vm985_vm2, %v7197_v1 }
 0xa95   : > { %10406 = vmatmul.mubr.msk.f32.gmra.mrb[6].mxu1 %vm985_vm2, %v7197_v1 }
 0xb18   : > { %v7625_v55 = vpop.f32.mrb[0].mxu1 }
 0xb19   : > { %v7627_v54 = vpop.f32.mrb[1].mxu1 }
 0xb28   : > { %v7779_v15 = vpop.f32.mrb[8].mxu1 }
 0xb29   : > { %v7781_v9 = vpop.f32.mrb[9].mxu1 }
 0xb2c   : > { %v7785_v35 = vpop.f32.mrb[10].mxu1 }
 0xb2d   : > { %v7787_v36 = vpop.f32.mrb[11].mxu1 }
 0xb30   : > { %v7914_v10 = vpop.f32.mrb[2].mxu1 }
 0xb31   : > { %v7916_v59 = vpop.f32.mrb[3].mxu1 }
 0xb5b   : > { %v9666_v60 = vpop.f32.mrb[0].mxu0 }
 0xb5c   : > { %v11120_v2 = vadd.f32 %v9666_v60, %v7625_v55  ;;  %v9668_v12 = vpop.f32.mrb[1].mxu0  ;;  %v9887_v60 = vld [vmem:[#allocation4 + $0x50] sm:$0xff] }
 0xb5d   : > { %v11121_v50 = vadd.f32 %v9668_v12, %v7627_v54 }
 0xb5e   : > { %v9853_v30 = vadd.f32 %v11120_v2, %v9846_v5  ;;  %v9886_v2 = vld [vmem:[#allocation4 + $0x48] sm:$0xff] }
 0xb5f   : > { %v9854_v25 = vadd.f32 %v11121_v50, %v9846_v5  ;;  %v9672_v58 = vpop.f32.mrb[6].mxu0  ;;  %v9888_v50 = vld [vmem:[#allocation4 + $0x58] sm:$0xff] }
 0xb60   : > { %v9865_v18 = vmul.f32 %v9853_v30, %v13977_v11  ;;  %v11122_v43 = vadd.f32 %v9672_v58, %v7914_v10  ;;  %v9674_v3 = vpop.f32.mrb[7].mxu0 }
 0xb61   : > { %v9866_v28 = vmul.f32 %v9854_v25, %v13979_v37  ;;  %v11123_v39 = vadd.f32 %v9674_v3, %v7916_v59 }
 0xb62   : > { %v9889_v40 = vadd.f32 %v9877_v19, %v9865_v18  ;;  %v9859_v27 = vadd.f32 %v11122_v43, %v9851_v53 }
 0xb63   : > { %v9890_v20 = vadd.f32 %v9878_v56, %v9866_v28  ;;  %v9860_v21 = vadd.f32 %v11123_v39, %v9851_v53  ;;  %v9820_v62 = vpop.f32.mrb[2].mxu0 }
 0xb64   : > { %9901 = vst [vmem:[#allocation22] sm:$0xff] %v9889_v40  ;;  %v9871_v14 = vmul.f32 %v9859_v27, %v13977_v11  ;;  %v11124_v41 = vadd.f32 %v9820_v62, %v7779_v15  ;;  %v9743_v0 = vpop.f32.mrb[4].mxu1  ;;  %v9822_v48 = vpop.f32.mrb[3].mxu0 }
 0xb65   : > { %9902 = vst [vmem:[#allocation22 + $0x8] sm:$0xff] %v9890_v20  ;;  %v9872_v45 = vmul.f32 %v9860_v21, %v13979_v37  ;;  %v9855_v46 = vadd.f32 %v9846_v5, %v9743_v0  ;;  %v11125_v61 = vadd.f32 %v9822_v48, %v7781_v9  ;;  %v9745_v16 = vpop.f32.mrb[5].mxu1  ;;  %v9885_v9 = vld [vmem:[#allocation4 + $0x40] sm:$0xff] }
 0xb66   : > { %v9895_v8 = vadd.f32 %v9883_v49, %v9871_v14  ;;  %v9857_v22 = vadd.f32 %v11124_v41, %v9846_v5  ;;  %v9856_v57 = vadd.f32 %v9846_v5, %v9745_v16 }
 0xb67   : > { %v9896_v51 = vadd.f32 %v9884_v32, %v9872_v45  ;;  %v9867_v26 = vmul.f32 %v9855_v46, %v13941_v42  ;;  %v9858_v29 = vadd.f32 %v11125_v61, %v9846_v5  ;;  %v9826_v11 = vpop.f32.mrb[4].mxu0 }
 0xb68   : > { %9907 = vst [vmem:[#allocation22 + $0x30] sm:$0xff] %v9895_v8  ;;  %v9869_v13 = vmul.f32 %v9857_v22, %v14000_v44  ;;  %v9868_v37 = vmul.f32 %v9856_v57, %v13943_v63  ;;  %v11126_v38 = vadd.f32 %v9826_v11, %v7785_v35  ;;  %v9749_v33 = vpop.f32.mrb[6].mxu1  ;;  %v9828_v47 = vpop.f32.mrb[5].mxu0 }
 0xb69   : > { %9908 = vst [vmem:[#allocation22 + $0x38] sm:$0xff] %v9896_v51  ;;  %v9891_v24 = vadd.f32 %v9879_v34, %v9867_v26  ;;  %v9870_v7 = vmul.f32 %v9858_v29, %v14005_v17  ;;  %v9861_v23 = vadd.f32 %v9851_v53, %v9749_v33  ;;  %v11127_v4 = vadd.f32 %v9828_v47, %v7787_v36  ;;  %v9751_v1 = vpop.f32.mrb[7].mxu1 }
 0xb6a   : > { %v9893_v55 = vadd.f32 %v9881_v31, %v9869_v13  ;;  %v9892_v54 = vadd.f32 %v9880_v52, %v9868_v37  ;;  %v9863_v15 = vadd.f32 %v11126_v38, %v9851_v53  ;;  %v9862_v10 = vadd.f32 %v9851_v53, %v9751_v1 }
 0xb6b   : > { %9903 = vst [vmem:[#allocation22 + $0x10] sm:$0xff] %v9891_v24  ;;  %v9894_v59 = vadd.f32 %v9882_v6, %v9870_v7  ;;  %v9873_v5 = vmul.f32 %v9861_v23, %v13941_v42  ;;  %v9864_v35 = vadd.f32 %v11127_v4, %v9851_v53 }
 0xb6c   : > { %9905 = vst [vmem:[#allocation22 + $0x20] sm:$0xff] %v9893_v55  ;;  %9904 = vst [vmem:[#allocation22 + $0x18] sm:$0xff] %v9892_v54  ;;  %v9875_v12 = vmul.f32 %v9863_v15, %v14000_v44  ;;  %v9874_v36 = vmul.f32 %v9862_v10, %v13943_v63 }
 0xb6d   : > { %9906 = vst.msk [vmem:[#allocation22 + $0x28] sm:$0xff] %vm3648_vm10, %v9894_v59  ;;  %v9897_v30 = vadd.f32 %v9885_v9, %v9873_v5  ;;  %v9876_v19 = vmul.f32 %v9864_v35, %v14005_v17 }
 0xb6e   : > { %v9899_v25 = vadd.f32 %v9887_v60, %v9875_v12  ;;  %v9898_v58 = vadd.f32 %v9886_v2, %v9874_v36 }
 0xb6f   : > { %9909 = vst [vmem:[#allocation22 + $0x40] sm:$0xff] %v9897_v30  ;;  %v9900_v56 = vadd.f32 %v9888_v50, %v9876_v19 }
 0xb70   : > { %9911 = vst [vmem:[#allocation22 + $0x50] sm:$0xff] %v9899_v25  ;;  %9910 = vst [vmem:[#allocation22 + $0x48] sm:$0xff] %v9898_v58 }
 0xb71   : > { %9912 = vst.msk [vmem:[#allocation22 + $0x58] sm:$0xff] %vm3648_vm10, %v9900_v56 }
 0xb72 PF: > { %s15170_s7 = sld [smem:[#allocation34_spill]]  ;;  %s12709_s14 = smov [#allocation22]  }
 0xb73   : > { %s9922_s0 = sshll.u32 %s12709_s14, 4  ;;  %s9923_s0 = int_to_ptr.vmem [resolvable:$true] %s9922_s0 }
 0xb74   : > { %s12565_s28 = scalar_lea.vmem %s9923_s0, 1536  ;;  %p12572_p2 = scmp.lt.s32.totalorder %s9923_s0, %s9923_s0 }
 0xb75   : > { %p12566_p12 = scmp.ne.s32.totalorder %s9923_s0, %s12565_s28  ;;  %p12573_p11 = scmp.lt.s32.totalorder %s12565_s28, %s12565_s28 }
 0xb77   : > { %p12574_p4 = por %p12573_p11, %p12572_p2 }
 0xb78   : > { %p11322_p13 = scmp.eq.s32.totalorder %s15170_s7, 1 }
 0xb7a   : > { %p12567_p10 = pnand %p12566_p12, %p11322_p13 }
 0xb7c   : > { %p12568_p1 = pneg %p12567_p10 }
 0xb7e   : > { %p12575_p0 = pnand %p12574_p4, %p12568_p1 }
 0xb80   : > { %12578 = shalt.err (!%p12575_p0)
}
 0xb81   : > { %s15171_s27 = sld [smem:[#allocation46_spill]] }
 0xb87   : > { %s12579_s16 = scalar_lea.hbm %s15171_s27, 1536 }
 0xb88   : > { %p12580_p5 = scmp.ne.s32.totalorder %s15171_s27, %s12579_s16  ;;  %p12585_p8 = scmp.lt.u32.totalorder %s12579_s16, %s15171_s27 }
 0xb8a   : > { %p12581_p6 = pnand %p12580_p5, %p11322_p13 }
 0xb8c   : > { %p12582_p3 = pneg %p12581_p6 }
 0xb8e   : > { %p12587_p9 = pnand %p12585_p8, %p12582_p3 }
 0xb90   : > { %12590 = shalt.err (!%p12587_p9)
}
 0xb91   : > { %s12710_s19 = smov 768   ;;  %s12711_s25 = smov 48  }
 0xb92   : > { %11262 = dma.vmem_to_hbm [thread:$0]  (%p11322_p13), %s9923_s0, 1536, %s15171_s27, [#allocation6], %s12710_s19, %s12710_s19, %s12711_s25  }
 0xb93   : > { %12640 = dma.done.wait (%p11322_p13), [#allocation6], 1536  }
 0xb94   : > { %12642 = vsyncadd (%p11322_p13), [#allocation6], 4294965760 }
 0xb95 PF: > { %s15172_s1 = sld [smem:[#allocation33_spill]]  ;;  %s15173_s29 = sld [smem:[#allocation30_spill]] }
 0xb96   : > { %s15174_s30 = sld [smem:[#allocation31_spill]]  ;;  %s15175_s15 = sld [smem:[#allocation38_spill]] }
 0xb97   : > { %s15176_s22 = sld [smem:[#allocation36_spill]]  ;;  %s15177_s16 = smov %s12661_s17 }
 0xb9b   : > { %s28_s18 = sadd.s32 1, %s15172_s1  }
 0xb9c   : > { %p25_p7 = scmp.ge.s32.totalorder %s28_s18, 4  }
 0xb9d   : > { %s15178_s17 = smov %s15176_s22 }
 0xb9e   :  { %27 = sbr.rel (!%p25_p7) target bundleno = 15 (0xf), region = 223 }
 0xba5   :  { %9938 = vsyncpa [#allocation5], 1 }
 0xba6   :  { %9940 = vsyncpa [#allocation5 + $0x1], 1 }
 0xba7   :  { %9941 = vsyncpa [#allocation8], 1 }
 0xba8   :  { %9942 = vsyncpa [#allocation11], 1 }
 0xba9   :  { %9943 = vsyncpa [#allocation6], 1 }
 0xbaa   :  { %9945 = vsyncpa [#allocation6 + $0x1], 1 }

</bundles_post_ra>
